<compile_context>
chip_gen: v5e
topology: v5e:2x2
jax: 0.10.0
libtpu: 0.0.40
codegen_flags: <defaults>
</compile_context>

<pallas_src>
import numpy as np

import jax
import jax.numpy as jnp
from jax import lax
from jax.experimental import pallas as pl
from jax.experimental.pallas import tpu as pltpu

EPS = 1e-5            # nn.InstanceNorm2d default eps
NEG_SLOPE = 0.2       # LeakyReLU(0.2)
# Separable blur taps: outer([1,3,3,1],[1,3,3,1])/64 == outer(F, F), F = [1,3,3,1]/8
F0, F1, F2, F3 = 1.0 / 8.0, 3.0 / 8.0, 3.0 / 8.0, 1.0 / 8.0


def _blur_downsample_matrix(n):
    """(n, nd) f32 matrix folding reflect-pad [1,2] + [1,3,3,1]/8 taps + stride 2.

    out[j] = sum_w m[w, j] * a[w]  ==  blurpool-1D(a) along one axis.
    """
    npad = n + 3
    nd = (npad - 4) // 2 + 1
    taps = np.array([1.0, 3.0, 3.0, 1.0], np.float64) / 8.0

    def src(p):                       # reflect (no edge repeat), pad left=1 right=2
        if p == 0:
            return 1
        if p <= n:
            return p - 1
        if p == n + 1:
            return n - 2
        return n - 3                  # p == n + 2

    m = np.zeros((n, nd), np.float32)
    for j in range(nd):
        for k in range(4):
            m[src(2 * j + k), j] += taps[k]
    return jnp.asarray(m, dtype=jnp.float32)


def unet_down_kernel(x_ref, w_ref, bw_ref, o_ref):
    """Fused per-sample UNetDown.

    x_ref : (1, H+2, Cin, W+2)  bf16  zero-padded input, H leading / Cin sublane / W lane
    w_ref : (16, Cout, Cin)     bf16  conv weights, tap-major (kh*4 + kw)
    bw_ref: (Wo, Wd)            f32   fused reflect-pad + blur + stride-2 (W direction)
    o_ref : (1, Hd, Cout, Wd)   f32
    """
    _, hp_in, cin, wp_in = x_ref.shape
    _, cout, _ = w_ref.shape
    wo, wd = bw_ref.shape
    ho = hp_in - 3                      # conv output height (k=4, s=1, p=1)
    hd = o_ref.shape[1]

    xs = x_ref[0]                       # (hp_in, cin, wp_in) bf16, loaded once
    dn = (((2,), (1,)), ((0,), (0,)))   # contract Cin / Wo; batch over leading spatial dim

    # ---- Conv2d: 16 shifted batched matmuls (bf16 operands, f32 accumulate) ----
    y = jnp.zeros((ho, cout, wo), jnp.float32)
    for kh in range(4):
        for kw in range(4):
            s = xs[kh:kh + ho, :, kw:kw + wo]                       # (ho, cin, wo) bf16
            wk = jnp.broadcast_to(w_ref[kh * 4 + kw], (ho, cout, cin))  # bf16
            y = y + lax.dot_general(wk, s, dn,
                                    preferred_element_type=jnp.float32)  # (ho, cout, wo)

    # ---- InstanceNorm2d (affine=False): per-channel biased stats over spatial ----
    inv_n = 1.0 / float(ho * wo)
    mean = jnp.sum(jnp.sum(y, axis=2, keepdims=True), axis=0, keepdims=True) * inv_n
    cen = y - mean
    var = jnp.sum(jnp.sum(cen * cen, axis=2, keepdims=True), axis=0, keepdims=True) * inv_n
    yn = cen * lax.rsqrt(var + EPS)

    # ---- LeakyReLU(0.2) ----
    act = jnp.where(yn >= 0, yn, NEG_SLOPE * yn)                    # (ho, cout, wo) f32

    # ---- BlurPool, H direction (leading axis): reflect pad (1,2) + 4 taps, stride 2 ----
    p = jnp.concatenate(
        [act[1:2], act, act[ho - 2:ho - 1], act[ho - 3:ho - 2]], axis=0)  # (ho+3, cout, wo)
    hp = ho + 3                                                     # even (H even)
    p4 = p.reshape(hp // 2, 2, cout, wo)                            # leading-dim split only
    ev = p4[:, 0]                                                   # rows 0,2,4,...
    od = p4[:, 1]                                                   # rows 1,3,5,...
    t = (F0 * ev[:hd] + F1 * od[:hd] + F2 * ev[1:] + F3 * od[1:])   # (hd, cout, wo)

    # ---- BlurPool, W direction (lane axis): folded reflect+blur+stride-2 matmul ----
    bwb = jnp.broadcast_to(bw_ref[...], (hd, wo, wd))               # f32
    out = lax.dot_general(t, bwb, dn, preferred_element_type=jnp.float32)  # (hd, cout, wd)

    o_ref[0] = out.astype(o_ref.dtype)


def unet_down(x, conv_w):
    """x: (B, Cin, H, W) f32, conv_w: (Cout, Cin, 4, 4) f32 -> (B, Cout, H/2, W/2) f32."""
    B, Cin, H, W = x.shape
    Cout = conv_w.shape[0]
    assert conv_w.shape == (Cout, Cin, 4, 4)
    assert H % 2 == 0 and W % 2 == 0 and H >= 6 and W >= 6

    Ho, Wo = H - 1, W - 1
    Hd, Wd = H // 2, W // 2
    Hp_in, Wp_in = H + 2, W + 2

    # Host glue (cheap, |x|-sized): zero-pad for the conv, put channels on the
    # sublane axis / W on the lane axis, cast MXU operands to bf16.
    xp = jnp.pad(x, ((0, 0), (0, 0), (1, 1), (1, 1)))
    xt = xp.transpose(0, 2, 1, 3).astype(jnp.bfloat16)              # (B, H+2, Cin, W+2)
    w_taps = conv_w.transpose(2, 3, 0, 1).reshape(16, Cout, Cin).astype(jnp.bfloat16)
    bw = _blur_downsample_matrix(Wo)                                # (Wo, Wd) f32

    out = pl.pallas_call(
        unet_down_kernel,
        out_shape=jax.ShapeDtypeStruct((B, Hd, Cout, Wd), jnp.float32),
        grid_spec=pltpu.PrefetchScalarGridSpec(
            num_scalar_prefetch=0,
            grid=(B,),
            in_specs=[
                pl.BlockSpec((1, Hp_in, Cin, Wp_in), lambda b: (b, 0, 0, 0)),
                pl.BlockSpec((16, Cout, Cin), lambda b: (0, 0, 0)),
                pl.BlockSpec((Wo, Wd), lambda b: (0, 0)),
            ],
            out_specs=pl.BlockSpec((1, Hd, Cout, Wd), lambda b: (b, 0, 0, 0)),
        ),
        compiler_params=pltpu.CompilerParams(dimension_semantics=("parallel",)),
    )(xt, w_taps, bw)

    return out.transpose(0, 2, 1, 3)                                # (B, Cout, Hd, Wd)


def unet_down_ref(x, conv_w):
    """Pure-JAX reference (same bf16 rounding of the conv operands)."""
    xb = x.astype(jnp.bfloat16).astype(jnp.float32)
    wb = conv_w.astype(jnp.bfloat16).astype(jnp.float32)
    y = lax.conv_general_dilated(
        xb, wb, window_strides=(1, 1), padding=((1, 1), (1, 1)),
        dimension_numbers=("NCHW", "OIHW", "NCHW"),
        precision=lax.Precision.HIGHEST)
    mean = jnp.mean(y, axis=(2, 3), keepdims=True)
    var = jnp.mean((y - mean) ** 2, axis=(2, 3), keepdims=True)
    yn = (y - mean) * lax.rsqrt(var + EPS)
    act = jnp.where(yn >= 0, yn, NEG_SLOPE * yn)

    a = jnp.array([1.0, 3.0, 3.0, 1.0], jnp.float32)
    filt2d = jnp.outer(a, a) / 64.0
    C = act.shape[1]
    filt = jnp.tile(filt2d[None, None], (C, 1, 1, 1))               # (C,1,4,4) depthwise
    pad = jnp.pad(act, ((0, 0), (0, 0), (1, 2), (1, 2)), mode="reflect")
    return lax.conv_general_dilated(
        pad, filt, window_strides=(2, 2), padding="VALID",
        dimension_numbers=("NCHW", "OIHW", "NCHW"),
        feature_group_count=C, precision=lax.Precision.HIGHEST)


if __name__ == "__main__":
    key = jax.random.PRNGKey(0)
    kx, kw = jax.random.split(key)

    B, Cin, H, W = 2, 4, 16, 16
    Cout = 8

    x = jax.random.normal(kx, (B, Cin, H, W), dtype=jnp.float32)
    conv_w = jax.random.normal(kw, (Cout, Cin, 4, 4), dtype=jnp.float32) / jnp.sqrt(
        float(Cin * 16)
    )

    fwd = jax.jit(unet_down)
    out = jax.block_until_ready(fwd(x, conv_w))
    assert out.shape == (B, Cout, H // 2, W // 2), out.shape
    assert bool(jnp.all(jnp.isfinite(out)))

    ref = jax.block_until_ready(unet_down_ref(x, conv_w))
    max_err = float(jnp.max(jnp.abs(out - ref)))
    assert bool(jnp.allclose(out, ref, atol=5e-2, rtol=5e-2)), f"max_err={max_err}"

    print("KERNEL_OK")
</pallas_src>

<mosaic_0001>
module attributes {stable_mosaic.version = 11 : i64} {
  func.func @unet_down_kernel(%arg0: i32, %arg1: memref<1x18x4x18xbf16, #tpu.memory_space<vmem>>, %arg2: memref<16x8x4xbf16, #tpu.memory_space<vmem>>, %arg3: memref<15x8xf32, #tpu.memory_space<vmem>>, %arg4: memref<1x8x8x8xf32, #tpu.memory_space<vmem>>) attributes {dimension_semantics = [#tpu.dimension_semantics<parallel>], iteration_bounds = array<i64: 2>, scalar_prefetch = 0 : i64, scratch_operands = 0 : i64, tpu.core_type = #tpu.core_type<tc>, window_params = [{transform_indices = @transform_0, window_bounds = array<i64: 1, 18, 4, 18>}, {pipeline_mode = #tpu.pipeline_mode<synchronous>, transform_indices = @transform_1, window_bounds = array<i64: 16, 8, 4>}, {pipeline_mode = #tpu.pipeline_mode<synchronous>, transform_indices = @transform_2, window_bounds = array<i64: 15, 8>}, {transform_indices = @transform_3, window_bounds = array<i64: 1, 8, 8, 8>}]} {
    %c0 = arith.constant 0 : index
    %c0_0 = arith.constant 0 : index
    %c0_1 = arith.constant 0 : index
    %c0_2 = arith.constant 0 : index
    %0 = vector.load %arg1[%c0, %c0_0, %c0_1, %c0_2] : memref<1x18x4x18xbf16, #tpu.memory_space<vmem>>, vector<1x18x4x18xbf16>
    %1 = vector.shape_cast %0 : vector<1x18x4x18xbf16> to vector<18x4x18xbf16>
    %cst = arith.constant 0.000000e+00 : f32
    %2 = vector.broadcast %cst : f32 to vector<15x8x15xf32>
    %3 = vector.extract_strided_slice %1 {offsets = [0, 0, 0], sizes = [15, 4, 15], strides = [1, 1, 1]} : vector<18x4x18xbf16> to vector<15x4x15xbf16>
    %c0_3 = arith.constant 0 : index
    %c0_4 = arith.constant 0 : index
    %c0_5 = arith.constant 0 : index
    %4 = vector.load %arg2[%c0_3, %c0_4, %c0_5] : memref<16x8x4xbf16, #tpu.memory_space<vmem>>, vector<1x8x4xbf16>
    %5 = vector.shape_cast %4 : vector<1x8x4xbf16> to vector<8x4xbf16>
    %6 = vector.shape_cast %5 : vector<8x4xbf16> to vector<1x8x4xbf16>
    %7 = vector.broadcast %6 : vector<1x8x4xbf16> to vector<15x8x4xbf16>
    %cst_6 = arith.constant dense<0.000000e+00> : vector<15x8x15xf32>
    %8 = tpu.matmul %7, %3, %cst_6 {dimension_numbers = #tpu.dot_dimension_numbers<[2], [1], [1], [2], [0, 0, 0, 1, 1, 2], [0], [0]>} : vector<15x8x4xbf16>, vector<15x4x15xbf16>, vector<15x8x15xf32> -> vector<15x8x15xf32>
    %9 = arith.addf %2, %8 : vector<15x8x15xf32>
    %10 = vector.extract_strided_slice %1 {offsets = [0, 0, 1], sizes = [15, 4, 15], strides = [1, 1, 1]} : vector<18x4x18xbf16> to vector<15x4x15xbf16>
    %c1 = arith.constant 1 : index
    %c0_7 = arith.constant 0 : index
    %c0_8 = arith.constant 0 : index
    %11 = vector.load %arg2[%c1, %c0_7, %c0_8] : memref<16x8x4xbf16, #tpu.memory_space<vmem>>, vector<1x8x4xbf16>
    %12 = vector.shape_cast %11 : vector<1x8x4xbf16> to vector<8x4xbf16>
    %13 = vector.shape_cast %12 : vector<8x4xbf16> to vector<1x8x4xbf16>
    %14 = vector.broadcast %13 : vector<1x8x4xbf16> to vector<15x8x4xbf16>
    %cst_9 = arith.constant dense<0.000000e+00> : vector<15x8x15xf32>
    %15 = tpu.matmul %14, %10, %cst_9 {dimension_numbers = #tpu.dot_dimension_numbers<[2], [1], [1], [2], [0, 0, 0, 1, 1, 2], [0], [0]>} : vector<15x8x4xbf16>, vector<15x4x15xbf16>, vector<15x8x15xf32> -> vector<15x8x15xf32>
    %16 = arith.addf %9, %15 : vector<15x8x15xf32>
    %17 = vector.extract_strided_slice %1 {offsets = [0, 0, 2], sizes = [15, 4, 15], strides = [1, 1, 1]} : vector<18x4x18xbf16> to vector<15x4x15xbf16>
    %c2 = arith.constant 2 : index
    %c0_10 = arith.constant 0 : index
    %c0_11 = arith.constant 0 : index
    %18 = vector.load %arg2[%c2, %c0_10, %c0_11] : memref<16x8x4xbf16, #tpu.memory_space<vmem>>, vector<1x8x4xbf16>
    %19 = vector.shape_cast %18 : vector<1x8x4xbf16> to vector<8x4xbf16>
    %20 = vector.shape_cast %19 : vector<8x4xbf16> to vector<1x8x4xbf16>
    %21 = vector.broadcast %20 : vector<1x8x4xbf16> to vector<15x8x4xbf16>
    %cst_12 = arith.constant dense<0.000000e+00> : vector<15x8x15xf32>
    %22 = tpu.matmul %21, %17, %cst_12 {dimension_numbers = #tpu.dot_dimension_numbers<[2], [1], [1], [2], [0, 0, 0, 1, 1, 2], [0], [0]>} : vector<15x8x4xbf16>, vector<15x4x15xbf16>, vector<15x8x15xf32> -> vector<15x8x15xf32>
    %23 = arith.addf %16, %22 : vector<15x8x15xf32>
    %24 = vector.extract_strided_slice %1 {offsets = [0, 0, 3], sizes = [15, 4, 15], strides = [1, 1, 1]} : vector<18x4x18xbf16> to vector<15x4x15xbf16>
    %c3 = arith.constant 3 : index
    %c0_13 = arith.constant 0 : index
    %c0_14 = arith.constant 0 : index
    %25 = vector.load %arg2[%c3, %c0_13, %c0_14] : memref<16x8x4xbf16, #tpu.memory_space<vmem>>, vector<1x8x4xbf16>
    %26 = vector.shape_cast %25 : vector<1x8x4xbf16> to vector<8x4xbf16>
    %27 = vector.shape_cast %26 : vector<8x4xbf16> to vector<1x8x4xbf16>
    %28 = vector.broadcast %27 : vector<1x8x4xbf16> to vector<15x8x4xbf16>
    %cst_15 = arith.constant dense<0.000000e+00> : vector<15x8x15xf32>
    %29 = tpu.matmul %28, %24, %cst_15 {dimension_numbers = #tpu.dot_dimension_numbers<[2], [1], [1], [2], [0, 0, 0, 1, 1, 2], [0], [0]>} : vector<15x8x4xbf16>, vector<15x4x15xbf16>, vector<15x8x15xf32> -> vector<15x8x15xf32>
    %30 = arith.addf %23, %29 : vector<15x8x15xf32>
    %31 = vector.extract_strided_slice %1 {offsets = [1, 0, 0], sizes = [15, 4, 15], strides = [1, 1, 1]} : vector<18x4x18xbf16> to vector<15x4x15xbf16>
    %c4 = arith.constant 4 : index
    %c0_16 = arith.constant 0 : index
    %c0_17 = arith.constant 0 : index
    %32 = vector.load %arg2[%c4, %c0_16, %c0_17] : memref<16x8x4xbf16, #tpu.memory_space<vmem>>, vector<1x8x4xbf16>
    %33 = vector.shape_cast %32 : vector<1x8x4xbf16> to vector<8x4xbf16>
    %34 = vector.shape_cast %33 : vector<8x4xbf16> to vector<1x8x4xbf16>
    %35 = vector.broadcast %34 : vector<1x8x4xbf16> to vector<15x8x4xbf16>
    %cst_18 = arith.constant dense<0.000000e+00> : vector<15x8x15xf32>
    %36 = tpu.matmul %35, %31, %cst_18 {dimension_numbers = #tpu.dot_dimension_numbers<[2], [1], [1], [2], [0, 0, 0, 1, 1, 2], [0], [0]>} : vector<15x8x4xbf16>, vector<15x4x15xbf16>, vector<15x8x15xf32> -> vector<15x8x15xf32>
    %37 = arith.addf %30, %36 : vector<15x8x15xf32>
    %38 = vector.extract_strided_slice %1 {offsets = [1, 0, 1], sizes = [15, 4, 15], strides = [1, 1, 1]} : vector<18x4x18xbf16> to vector<15x4x15xbf16>
    %c5 = arith.constant 5 : index
    %c0_19 = arith.constant 0 : index
    %c0_20 = arith.constant 0 : index
    %39 = vector.load %arg2[%c5, %c0_19, %c0_20] : memref<16x8x4xbf16, #tpu.memory_space<vmem>>, vector<1x8x4xbf16>
    %40 = vector.shape_cast %39 : vector<1x8x4xbf16> to vector<8x4xbf16>
    %41 = vector.shape_cast %40 : vector<8x4xbf16> to vector<1x8x4xbf16>
    %42 = vector.broadcast %41 : vector<1x8x4xbf16> to vector<15x8x4xbf16>
    %cst_21 = arith.constant dense<0.000000e+00> : vector<15x8x15xf32>
    %43 = tpu.matmul %42, %38, %cst_21 {dimension_numbers = #tpu.dot_dimension_numbers<[2], [1], [1], [2], [0, 0, 0, 1, 1, 2], [0], [0]>} : vector<15x8x4xbf16>, vector<15x4x15xbf16>, vector<15x8x15xf32> -> vector<15x8x15xf32>
    %44 = arith.addf %37, %43 : vector<15x8x15xf32>
    %45 = vector.extract_strided_slice %1 {offsets = [1, 0, 2], sizes = [15, 4, 15], strides = [1, 1, 1]} : vector<18x4x18xbf16> to vector<15x4x15xbf16>
    %c6 = arith.constant 6 : index
    %c0_22 = arith.constant 0 : index
    %c0_23 = arith.constant 0 : index
    %46 = vector.load %arg2[%c6, %c0_22, %c0_23] : memref<16x8x4xbf16, #tpu.memory_space<vmem>>, vector<1x8x4xbf16>
    %47 = vector.shape_cast %46 : vector<1x8x4xbf16> to vector<8x4xbf16>
    %48 = vector.shape_cast %47 : vector<8x4xbf16> to vector<1x8x4xbf16>
    %49 = vector.broadcast %48 : vector<1x8x4xbf16> to vector<15x8x4xbf16>
    %cst_24 = arith.constant dense<0.000000e+00> : vector<15x8x15xf32>
    %50 = tpu.matmul %49, %45, %cst_24 {dimension_numbers = #tpu.dot_dimension_numbers<[2], [1], [1], [2], [0, 0, 0, 1, 1, 2], [0], [0]>} : vector<15x8x4xbf16>, vector<15x4x15xbf16>, vector<15x8x15xf32> -> vector<15x8x15xf32>
    %51 = arith.addf %44, %50 : vector<15x8x15xf32>
    %52 = vector.extract_strided_slice %1 {offsets = [1, 0, 3], sizes = [15, 4, 15], strides = [1, 1, 1]} : vector<18x4x18xbf16> to vector<15x4x15xbf16>
    %c7 = arith.constant 7 : index
    %c0_25 = arith.constant 0 : index
    %c0_26 = arith.constant 0 : index
    %53 = vector.load %arg2[%c7, %c0_25, %c0_26] : memref<16x8x4xbf16, #tpu.memory_space<vmem>>, vector<1x8x4xbf16>
    %54 = vector.shape_cast %53 : vector<1x8x4xbf16> to vector<8x4xbf16>
    %55 = vector.shape_cast %54 : vector<8x4xbf16> to vector<1x8x4xbf16>
    %56 = vector.broadcast %55 : vector<1x8x4xbf16> to vector<15x8x4xbf16>
    %cst_27 = arith.constant dense<0.000000e+00> : vector<15x8x15xf32>
    %57 = tpu.matmul %56, %52, %cst_27 {dimension_numbers = #tpu.dot_dimension_numbers<[2], [1], [1], [2], [0, 0, 0, 1, 1, 2], [0], [0]>} : vector<15x8x4xbf16>, vector<15x4x15xbf16>, vector<15x8x15xf32> -> vector<15x8x15xf32>
    %58 = arith.addf %51, %57 : vector<15x8x15xf32>
    %59 = vector.extract_strided_slice %1 {offsets = [2, 0, 0], sizes = [15, 4, 15], strides = [1, 1, 1]} : vector<18x4x18xbf16> to vector<15x4x15xbf16>
    %c8 = arith.constant 8 : index
    %c0_28 = arith.constant 0 : index
    %c0_29 = arith.constant 0 : index
    %60 = vector.load %arg2[%c8, %c0_28, %c0_29] : memref<16x8x4xbf16, #tpu.memory_space<vmem>>, vector<1x8x4xbf16>
    %61 = vector.shape_cast %60 : vector<1x8x4xbf16> to vector<8x4xbf16>
    %62 = vector.shape_cast %61 : vector<8x4xbf16> to vector<1x8x4xbf16>
    %63 = vector.broadcast %62 : vector<1x8x4xbf16> to vector<15x8x4xbf16>
    %cst_30 = arith.constant dense<0.000000e+00> : vector<15x8x15xf32>
    %64 = tpu.matmul %63, %59, %cst_30 {dimension_numbers = #tpu.dot_dimension_numbers<[2], [1], [1], [2], [0, 0, 0, 1, 1, 2], [0], [0]>} : vector<15x8x4xbf16>, vector<15x4x15xbf16>, vector<15x8x15xf32> -> vector<15x8x15xf32>
    %65 = arith.addf %58, %64 : vector<15x8x15xf32>
    %66 = vector.extract_strided_slice %1 {offsets = [2, 0, 1], sizes = [15, 4, 15], strides = [1, 1, 1]} : vector<18x4x18xbf16> to vector<15x4x15xbf16>
    %c9 = arith.constant 9 : index
    %c0_31 = arith.constant 0 : index
    %c0_32 = arith.constant 0 : index
    %67 = vector.load %arg2[%c9, %c0_31, %c0_32] : memref<16x8x4xbf16, #tpu.memory_space<vmem>>, vector<1x8x4xbf16>
    %68 = vector.shape_cast %67 : vector<1x8x4xbf16> to vector<8x4xbf16>
    %69 = vector.shape_cast %68 : vector<8x4xbf16> to vector<1x8x4xbf16>
    %70 = vector.broadcast %69 : vector<1x8x4xbf16> to vector<15x8x4xbf16>
    %cst_33 = arith.constant dense<0.000000e+00> : vector<15x8x15xf32>
    %71 = tpu.matmul %70, %66, %cst_33 {dimension_numbers = #tpu.dot_dimension_numbers<[2], [1], [1], [2], [0, 0, 0, 1, 1, 2], [0], [0]>} : vector<15x8x4xbf16>, vector<15x4x15xbf16>, vector<15x8x15xf32> -> vector<15x8x15xf32>
    %72 = arith.addf %65, %71 : vector<15x8x15xf32>
    %73 = vector.extract_strided_slice %1 {offsets = [2, 0, 2], sizes = [15, 4, 15], strides = [1, 1, 1]} : vector<18x4x18xbf16> to vector<15x4x15xbf16>
    %c10 = arith.constant 10 : index
    %c0_34 = arith.constant 0 : index
    %c0_35 = arith.constant 0 : index
    %74 = vector.load %arg2[%c10, %c0_34, %c0_35] : memref<16x8x4xbf16, #tpu.memory_space<vmem>>, vector<1x8x4xbf16>
    %75 = vector.shape_cast %74 : vector<1x8x4xbf16> to vector<8x4xbf16>
    %76 = vector.shape_cast %75 : vector<8x4xbf16> to vector<1x8x4xbf16>
    %77 = vector.broadcast %76 : vector<1x8x4xbf16> to vector<15x8x4xbf16>
    %cst_36 = arith.constant dense<0.000000e+00> : vector<15x8x15xf32>
    %78 = tpu.matmul %77, %73, %cst_36 {dimension_numbers = #tpu.dot_dimension_numbers<[2], [1], [1], [2], [0, 0, 0, 1, 1, 2], [0], [0]>} : vector<15x8x4xbf16>, vector<15x4x15xbf16>, vector<15x8x15xf32> -> vector<15x8x15xf32>
    %79 = arith.addf %72, %78 : vector<15x8x15xf32>
    %80 = vector.extract_strided_slice %1 {offsets = [2, 0, 3], sizes = [15, 4, 15], strides = [1, 1, 1]} : vector<18x4x18xbf16> to vector<15x4x15xbf16>
    %c11 = arith.constant 11 : index
    %c0_37 = arith.constant 0 : index
    %c0_38 = arith.constant 0 : index
    %81 = vector.load %arg2[%c11, %c0_37, %c0_38] : memref<16x8x4xbf16, #tpu.memory_space<vmem>>, vector<1x8x4xbf16>
    %82 = vector.shape_cast %81 : vector<1x8x4xbf16> to vector<8x4xbf16>
    %83 = vector.shape_cast %82 : vector<8x4xbf16> to vector<1x8x4xbf16>
    %84 = vector.broadcast %83 : vector<1x8x4xbf16> to vector<15x8x4xbf16>
    %cst_39 = arith.constant dense<0.000000e+00> : vector<15x8x15xf32>
    %85 = tpu.matmul %84, %80, %cst_39 {dimension_numbers = #tpu.dot_dimension_numbers<[2], [1], [1], [2], [0, 0, 0, 1, 1, 2], [0], [0]>} : vector<15x8x4xbf16>, vector<15x4x15xbf16>, vector<15x8x15xf32> -> vector<15x8x15xf32>
    %86 = arith.addf %79, %85 : vector<15x8x15xf32>
    %87 = vector.extract_strided_slice %1 {offsets = [3, 0, 0], sizes = [15, 4, 15], strides = [1, 1, 1]} : vector<18x4x18xbf16> to vector<15x4x15xbf16>
    %c12 = arith.constant 12 : index
    %c0_40 = arith.constant 0 : index
    %c0_41 = arith.constant 0 : index
    %88 = vector.load %arg2[%c12, %c0_40, %c0_41] : memref<16x8x4xbf16, #tpu.memory_space<vmem>>, vector<1x8x4xbf16>
    %89 = vector.shape_cast %88 : vector<1x8x4xbf16> to vector<8x4xbf16>
    %90 = vector.shape_cast %89 : vector<8x4xbf16> to vector<1x8x4xbf16>
    %91 = vector.broadcast %90 : vector<1x8x4xbf16> to vector<15x8x4xbf16>
    %cst_42 = arith.constant dense<0.000000e+00> : vector<15x8x15xf32>
    %92 = tpu.matmul %91, %87, %cst_42 {dimension_numbers = #tpu.dot_dimension_numbers<[2], [1], [1], [2], [0, 0, 0, 1, 1, 2], [0], [0]>} : vector<15x8x4xbf16>, vector<15x4x15xbf16>, vector<15x8x15xf32> -> vector<15x8x15xf32>
    %93 = arith.addf %86, %92 : vector<15x8x15xf32>
    %94 = vector.extract_strided_slice %1 {offsets = [3, 0, 1], sizes = [15, 4, 15], strides = [1, 1, 1]} : vector<18x4x18xbf16> to vector<15x4x15xbf16>
    %c13 = arith.constant 13 : index
    %c0_43 = arith.constant 0 : index
    %c0_44 = arith.constant 0 : index
    %95 = vector.load %arg2[%c13, %c0_43, %c0_44] : memref<16x8x4xbf16, #tpu.memory_space<vmem>>, vector<1x8x4xbf16>
    %96 = vector.shape_cast %95 : vector<1x8x4xbf16> to vector<8x4xbf16>
    %97 = vector.shape_cast %96 : vector<8x4xbf16> to vector<1x8x4xbf16>
    %98 = vector.broadcast %97 : vector<1x8x4xbf16> to vector<15x8x4xbf16>
    %cst_45 = arith.constant dense<0.000000e+00> : vector<15x8x15xf32>
    %99 = tpu.matmul %98, %94, %cst_45 {dimension_numbers = #tpu.dot_dimension_numbers<[2], [1], [1], [2], [0, 0, 0, 1, 1, 2], [0], [0]>} : vector<15x8x4xbf16>, vector<15x4x15xbf16>, vector<15x8x15xf32> -> vector<15x8x15xf32>
    %100 = arith.addf %93, %99 : vector<15x8x15xf32>
    %101 = vector.extract_strided_slice %1 {offsets = [3, 0, 2], sizes = [15, 4, 15], strides = [1, 1, 1]} : vector<18x4x18xbf16> to vector<15x4x15xbf16>
    %c14 = arith.constant 14 : index
    %c0_46 = arith.constant 0 : index
    %c0_47 = arith.constant 0 : index
    %102 = vector.load %arg2[%c14, %c0_46, %c0_47] : memref<16x8x4xbf16, #tpu.memory_space<vmem>>, vector<1x8x4xbf16>
    %103 = vector.shape_cast %102 : vector<1x8x4xbf16> to vector<8x4xbf16>
    %104 = vector.shape_cast %103 : vector<8x4xbf16> to vector<1x8x4xbf16>
    %105 = vector.broadcast %104 : vector<1x8x4xbf16> to vector<15x8x4xbf16>
    %cst_48 = arith.constant dense<0.000000e+00> : vector<15x8x15xf32>
    %106 = tpu.matmul %105, %101, %cst_48 {dimension_numbers = #tpu.dot_dimension_numbers<[2], [1], [1], [2], [0, 0, 0, 1, 1, 2], [0], [0]>} : vector<15x8x4xbf16>, vector<15x4x15xbf16>, vector<15x8x15xf32> -> vector<15x8x15xf32>
    %107 = arith.addf %100, %106 : vector<15x8x15xf32>
    %108 = vector.extract_strided_slice %1 {offsets = [3, 0, 3], sizes = [15, 4, 15], strides = [1, 1, 1]} : vector<18x4x18xbf16> to vector<15x4x15xbf16>
    %c15 = arith.constant 15 : index
    %c0_49 = arith.constant 0 : index
    %c0_50 = arith.constant 0 : index
    %109 = vector.load %arg2[%c15, %c0_49, %c0_50] : memref<16x8x4xbf16, #tpu.memory_space<vmem>>, vector<1x8x4xbf16>
    %110 = vector.shape_cast %109 : vector<1x8x4xbf16> to vector<8x4xbf16>
    %111 = vector.shape_cast %110 : vector<8x4xbf16> to vector<1x8x4xbf16>
    %112 = vector.broadcast %111 : vector<1x8x4xbf16> to vector<15x8x4xbf16>
    %cst_51 = arith.constant dense<0.000000e+00> : vector<15x8x15xf32>
    %113 = tpu.matmul %112, %108, %cst_51 {dimension_numbers = #tpu.dot_dimension_numbers<[2], [1], [1], [2], [0, 0, 0, 1, 1, 2], [0], [0]>} : vector<15x8x4xbf16>, vector<15x4x15xbf16>, vector<15x8x15xf32> -> vector<15x8x15xf32>
    %114 = arith.addf %107, %113 : vector<15x8x15xf32>
    %cst_52 = arith.constant dense<0.000000e+00> : vector<15x8xf32>
    %115 = vector.multi_reduction <add>, %114, %cst_52 [2] : vector<15x8x15xf32> to vector<15x8xf32>
    %116 = vector.shape_cast %115 : vector<15x8xf32> to vector<15x8x1xf32>
    %cst_53 = arith.constant dense<0.000000e+00> : vector<8x1xf32>
    %117 = vector.multi_reduction <add>, %116, %cst_53 [0] : vector<15x8x1xf32> to vector<8x1xf32>
    %118 = vector.shape_cast %117 : vector<8x1xf32> to vector<1x8x1xf32>
    %cst_54 = arith.constant 0.00444444455 : f32
    %119 = vector.broadcast %cst_54 : f32 to vector<1x8x1xf32>
    %120 = arith.mulf %118, %119 : vector<1x8x1xf32>
    %121 = vector.broadcast %120 : vector<1x8x1xf32> to vector<15x8x15xf32>
    %122 = arith.subf %114, %121 : vector<15x8x15xf32>
    %123 = arith.mulf %122, %122 : vector<15x8x15xf32>
    %cst_55 = arith.constant dense<0.000000e+00> : vector<15x8xf32>
    %124 = vector.multi_reduction <add>, %123, %cst_55 [2] : vector<15x8x15xf32> to vector<15x8xf32>
    %125 = vector.shape_cast %124 : vector<15x8xf32> to vector<15x8x1xf32>
    %cst_56 = arith.constant dense<0.000000e+00> : vector<8x1xf32>
    %126 = vector.multi_reduction <add>, %125, %cst_56 [0] : vector<15x8x1xf32> to vector<8x1xf32>
    %127 = vector.shape_cast %126 : vector<8x1xf32> to vector<1x8x1xf32>
    %cst_57 = arith.constant 0.00444444455 : f32
    %128 = vector.broadcast %cst_57 : f32 to vector<1x8x1xf32>
    %129 = arith.mulf %127, %128 : vector<1x8x1xf32>
    %cst_58 = arith.constant 9.99999974E-6 : f32
    %130 = vector.broadcast %cst_58 : f32 to vector<1x8x1xf32>
    %131 = arith.addf %129, %130 : vector<1x8x1xf32>
    %132 = math.rsqrt %131 : vector<1x8x1xf32>
    %133 = vector.broadcast %132 : vector<1x8x1xf32> to vector<15x8x15xf32>
    %134 = arith.mulf %122, %133 : vector<15x8x15xf32>
    %cst_59 = arith.constant 0.000000e+00 : f32
    %135 = vector.broadcast %cst_59 : f32 to vector<15x8x15xf32>
    %136 = arith.cmpf oge, %134, %135 : vector<15x8x15xf32>
    %cst_60 = arith.constant 2.000000e-01 : f32
    %137 = vector.broadcast %cst_60 : f32 to vector<15x8x15xf32>
    %138 = arith.mulf %137, %134 : vector<15x8x15xf32>
    %139 = arith.select %136, %134, %138 : vector<15x8x15xi1>, vector<15x8x15xf32>
    %140 = vector.extract_strided_slice %139 {offsets = [1, 0, 0], sizes = [1, 8, 15], strides = [1, 1, 1]} : vector<15x8x15xf32> to vector<1x8x15xf32>
    %141 = vector.extract_strided_slice %139 {offsets = [13, 0, 0], sizes = [1, 8, 15], strides = [1, 1, 1]} : vector<15x8x15xf32> to vector<1x8x15xf32>
    %142 = vector.extract_strided_slice %139 {offsets = [12, 0, 0], sizes = [1, 8, 15], strides = [1, 1, 1]} : vector<15x8x15xf32> to vector<1x8x15xf32>
    %143 = tpu.concatenate %140, %139, %141, %142 in 0 : vector<1x8x15xf32>, vector<15x8x15xf32>, vector<1x8x15xf32>, vector<1x8x15xf32> -> vector<18x8x15xf32>
    %144 = vector.shape_cast %143 : vector<18x8x15xf32> to vector<9x2x8x15xf32>
    %145 = vector.extract_strided_slice %144 {offsets = [0, 0, 0, 0], sizes = [9, 1, 8, 15], strides = [1, 1, 1, 1]} : vector<9x2x8x15xf32> to vector<9x1x8x15xf32>
    %146 = vector.shape_cast %145 : vector<9x1x8x15xf32> to vector<9x8x15xf32>
    %147 = vector.extract_strided_slice %144 {offsets = [0, 1, 0, 0], sizes = [9, 1, 8, 15], strides = [1, 1, 1, 1]} : vector<9x2x8x15xf32> to vector<9x1x8x15xf32>
    %148 = vector.shape_cast %147 : vector<9x1x8x15xf32> to vector<9x8x15xf32>
    %149 = vector.extract_strided_slice %146 {offsets = [0, 0, 0], sizes = [8, 8, 15], strides = [1, 1, 1]} : vector<9x8x15xf32> to vector<8x8x15xf32>
    %cst_61 = arith.constant 1.250000e-01 : f32
    %150 = vector.broadcast %cst_61 : f32 to vector<8x8x15xf32>
    %151 = arith.mulf %150, %149 : vector<8x8x15xf32>
    %152 = vector.extract_strided_slice %148 {offsets = [0, 0, 0], sizes = [8, 8, 15], strides = [1, 1, 1]} : vector<9x8x15xf32> to vector<8x8x15xf32>
    %cst_62 = arith.constant 3.750000e-01 : f32
    %153 = vector.broadcast %cst_62 : f32 to vector<8x8x15xf32>
    %154 = arith.mulf %153, %152 : vector<8x8x15xf32>
    %155 = arith.addf %151, %154 : vector<8x8x15xf32>
    %156 = vector.extract_strided_slice %146 {offsets = [1, 0, 0], sizes = [8, 8, 15], strides = [1, 1, 1]} : vector<9x8x15xf32> to vector<8x8x15xf32>
    %cst_63 = arith.constant 3.750000e-01 : f32
    %157 = vector.broadcast %cst_63 : f32 to vector<8x8x15xf32>
    %158 = arith.mulf %157, %156 : vector<8x8x15xf32>
    %159 = arith.addf %155, %158 : vector<8x8x15xf32>
    %160 = vector.extract_strided_slice %148 {offsets = [1, 0, 0], sizes = [8, 8, 15], strides = [1, 1, 1]} : vector<9x8x15xf32> to vector<8x8x15xf32>
    %cst_64 = arith.constant 1.250000e-01 : f32
    %161 = vector.broadcast %cst_64 : f32 to vector<8x8x15xf32>
    %162 = arith.mulf %161, %160 : vector<8x8x15xf32>
    %163 = arith.addf %159, %162 : vector<8x8x15xf32>
    %c0_65 = arith.constant 0 : index
    %c0_66 = arith.constant 0 : index
    %164 = vector.load %arg3[%c0_65, %c0_66] : memref<15x8xf32, #tpu.memory_space<vmem>>, vector<15x8xf32>
    %165 = vector.shape_cast %164 : vector<15x8xf32> to vector<1x15x8xf32>
    %166 = vector.broadcast %165 : vector<1x15x8xf32> to vector<8x15x8xf32>
    %cst_67 = arith.constant dense<0.000000e+00> : vector<8x8x8xf32>
    %167 = tpu.matmul %163, %166, %cst_67 {dimension_numbers = #tpu.dot_dimension_numbers<[2], [1], [1], [2], [0, 0, 0, 1, 1, 2], [0], [0]>} : vector<8x8x15xf32>, vector<8x15x8xf32>, vector<8x8x8xf32> -> vector<8x8x8xf32>
    %c0_68 = arith.constant 0 : index
    %c0_69 = arith.constant 0 : index
    %c0_70 = arith.constant 0 : index
    %c0_71 = arith.constant 0 : index
    %168 = vector.load %arg4[%c0_68, %c0_69, %c0_70, %c0_71] : memref<1x8x8x8xf32, #tpu.memory_space<vmem>>, vector<1x8x8x8xf32>
    %169 = vector.shape_cast %168 : vector<1x8x8x8xf32> to vector<8x8x8xf32>
    %170 = vector.shape_cast %167 : vector<8x8x8xf32> to vector<1x8x8x8xf32>
    tpu.vector_store %arg4[%c0_68, %c0_69, %c0_70, %c0_71], %170 {strides = array<i32>} : memref<1x8x8x8xf32, #tpu.memory_space<vmem>>, vector<1x8x8x8xf32>,
    return
  }
  func.func @transform_0(%arg0: i32) -> (i32, i32, i32, i32) {
    %c0_i32 = arith.constant 0 : i32
    %c0_i32_0 = arith.constant 0 : i32
    %c0_i32_1 = arith.constant 0 : i32
    %c0_i32_2 = arith.constant 0 : i32
    return %arg0, %c0_i32, %c0_i32_0, %c0_i32_1 : i32, i32, i32, i32
  }
  func.func @transform_1(%arg0: i32) -> (i32, i32, i32) {
    %c0_i32 = arith.constant 0 : i32
    %c0_i32_0 = arith.constant 0 : i32
    %c0_i32_1 = arith.constant 0 : i32
    %c0_i32_2 = arith.constant 0 : i32
    return %c0_i32, %c0_i32_0, %c0_i32_1 : i32, i32, i32
  }
  func.func @transform_2(%arg0: i32) -> (i32, i32) {
    %c0_i32 = arith.constant 0 : i32
    %c0_i32_0 = arith.constant 0 : i32
    %c0_i32_1 = arith.constant 0 : i32
    return %c0_i32, %c0_i32_0 : i32, i32
  }
  func.func @transform_3(%arg0: i32) -> (i32, i32, i32, i32) {
    %c0_i32 = arith.constant 0 : i32
    %c0_i32_0 = arith.constant 0 : i32
    %c0_i32_1 = arith.constant 0 : i32
    %c0_i32_2 = arith.constant 0 : i32
    return %arg0, %c0_i32, %c0_i32_0, %c0_i32_1 : i32, i32, i32, i32
  }
}

</mosaic_0001>

<bundles_post_ra>
// kernel: unet_down.1
= control target key start
LH: loop header
LB: loop body
LE: loop exit
PB: predicated region body
PF: predicated region fallthrough
CT: control target
= control target key end

     0   :  { %s5951_s12 = smov 0   ;;  %s8136_s0 = inlined_call_operand.vmem [shape: bf16[2,18,4,18], index: 0, kind: input, shape index: {}]   ;;  %s8137_s1 = inlined_call_operand.vmem [shape: bf16[16,8,4], index: 1, kind: input, shape index: {}]   ;;  %s8138_s2 = inlined_call_operand.vmem [shape: f32[15,8], index: 2, kind: input, shape index: {}]   ;;  %s8139_s3 = inlined_call_operand.vmem [shape: f32[2,8,8,8], index: 3, kind: output, shape index: {}]  }
   0x1 LB: > { %s5624_s13 = sadd.s32 4294967295, %s5926_s12   ;;  %p5628_p0 = scmp.ge.s32.totalorder %s5926_s12, 1  ;;  %s5926_s12 = sphi %s5951_s12, %s13_s12  }
   0x2   : > { %p137_p1 = scmp.lt.s32.totalorder %s5926_s12, 3 }
   0x4   : > { %p138_p2 = pnand %p5628_p0, %p137_p1 }
   0x5   : > { %p161_p3 = scmp.lt.s32.totalorder (!%p138_p2), %s5624_s13, 1  ;;  %s5928_s18 = smov (!%p138_p2), 127  }
   0x6   : > { %141 = sbr.rel (%p138_p2) target bundleno = 2179 (0x883), region = 32  ;;  %s5929_s19 = smov (!%p138_p2), 126  }
   0x7   : > { %s5930_s24 = smov (!%p138_p2), 125  }
   0xb   : > { %s8141_s13 = smov (!%p161_p3, %s5624_s13), 1  ;;  %vm203_vm0 = vcmask 1041408   ;;  %v6051_v34 = vld [vmem:[%s8137_s1 + $0x4] sm:$0xf]  ;;  %vm199_vm1 = vcmask 31744   ;;  %vm5095_vm2 = vcmask 121856  }
   0xc   : > { %s5906_s14 = smul.u32 36, %s8141_s13  ;;  %vm5375_vm3 = vcmask 1046528   ;;  %s5905_s5 = sshll.u32 %s8141_s13, 6 }
   0xd   : > { %s170_s8 = scalar_lea.vmem %s8139_s3, %s5905_s5 }
   0xe   : > { %s5965_s17 = scalar_lea.vmem %s8136_s0, %s5906_s14 }
   0xf   : > { %v5968_v0 = vld [vmem:[%s5965_s17] sm:$0x3]  ;;  %v5972_v1 = vld [vmem:[%s5965_s17 + $0x2] sm:$0x3]  ;;  %v5976_v3 = vld [vmem:[%s5965_s17 + $0x4] sm:$0x3] }
  0x10   : > { %194 = vst [vmem:[#allocation1] ss:$4 sm:$0xff] %v5968_v0  ;;  %v5980_v5 = vld [vmem:[%s5965_s17 + $0x6] sm:$0x3]  ;;  %v5985_v7 = vld [vmem:[%s5965_s17 + $0x8] sm:$0x3] }
  0x11   : > { %v5991_v9 = vld [vmem:[%s5965_s17 + $0xa] sm:$0x3]  ;;  %v5996_v11 = vld [vmem:[%s5965_s17 + $0xc] sm:$0x3]  ;;  %v6001_v13 = vld [vmem:[%s5965_s17 + $0xe] sm:$0x3] }
  0x12   : > { %v6006_v15 = vld [vmem:[%s5965_s17 + $0x10] sm:$0x3]  ;;  %v6012_v17 = vld [vmem:[%s5965_s17 + $0x12] sm:$0x3]  ;;  %v6017_v19 = vld [vmem:[%s5965_s17 + $0x14] sm:$0x3] }
  0x13   : > { %v6021_v21 = vld [vmem:[%s5965_s17 + $0x16] sm:$0x3]  ;;  %v6026_v23 = vld [vmem:[%s5965_s17 + $0x18] sm:$0x3]  ;;  %v6032_v25 = vld [vmem:[%s5965_s17 + $0x1a] sm:$0x3] }
  0x14   : > { %v6037_v27 = vld [vmem:[%s5965_s17 + $0x1c] sm:$0x3] }
  0x17   : > { %v195_v2 = vld.sshfl [vmem:[#allocation1] sm:$0xff pattern:$0x73625140] }
  0x18   : > { %221 = vst [vmem:[#allocation1] ss:$4 sm:$0xff] %v5972_v1 }
  0x1f   : > { %v222_v4 = vld.sshfl [vmem:[#allocation1] sm:$0xff pattern:$0x73625140] }
  0x20   : > { %243 = vst [vmem:[#allocation1] ss:$4 sm:$0xff] %v5976_v3 }
  0x27   : > { %v244_v6 = vld.sshfl [vmem:[#allocation1] sm:$0xff pattern:$0x73625140] }
  0x28   : > { %246 = vrot.lane.b32.xlu0 %v244_v6, %s5928_s18  ;;  %265 = vst [vmem:[#allocation1] ss:$4 sm:$0xff] %v5980_v5 }
  0x2f   : > { %v266_v8 = vld.sshfl [vmem:[#allocation1] sm:$0xff pattern:$0x73625140] }
  0x30   : > { %268 = vrot.lane.b32.xlu1 %v266_v8, %s5928_s18  ;;  %197 = vrot.lane.b32.xlu0 %v195_v2, %s5928_s18  ;;  %287 = vst [vmem:[#allocation1] ss:$4 sm:$0xff] %v5985_v7  ;;  %v531_v8 = vsel %vm203_vm0, %v5968_v0, 0 }
  0x37   : > { %v288_v10 = vld.sshfl [vmem:[#allocation1] sm:$0xff pattern:$0x73625140] }
  0x38   : > { %224 = vrot.lane.b32.xlu1 %v222_v4, %s5928_s18  ;;  %309 = vst [vmem:[#allocation1] ss:$4 sm:$0xff] %v5991_v9 }
  0x3f   : > { %v310_v12 = vld.sshfl [vmem:[#allocation1] sm:$0xff pattern:$0x73625140] }
  0x40   : > { %312 = vrot.lane.b32.xlu1 %v310_v12, %s5928_s18  ;;  %331 = vst [vmem:[#allocation1] ss:$4 sm:$0xff] %v5996_v11 }
  0x47   : > { %v332_v14 = vld.sshfl [vmem:[#allocation1] sm:$0xff pattern:$0x73625140] }
  0x48   : > { %353 = vst [vmem:[#allocation1] ss:$4 sm:$0xff] %v6001_v13  ;;  %334 = vrot.lane.b32.xlu2 %v332_v14, %s5928_s18  ;;  %v6114_v14 = vsel %vm203_vm0, %v5976_v3, 0 }
  0x4f   : > { %v354_v16 = vld.sshfl [vmem:[#allocation1] sm:$0xff pattern:$0x73625140] }
  0x50   : > { %356 = vrot.lane.b32.xlu0 %v354_v16, %s5928_s18  ;;  %375 = vst [vmem:[#allocation1] ss:$4 sm:$0xff] %v6006_v15  ;;  %290 = vrot.lane.b32.xlu2 %v288_v10, %s5928_s18 }
  0x57   : > { %v376_v18 = vld.sshfl [vmem:[#allocation1] sm:$0xff pattern:$0x73625140] }
  0x58   : > { %378 = vrot.lane.b32.xlu0 %v376_v18, %s5928_s18  ;;  %397 = vst [vmem:[#allocation1] ss:$4 sm:$0xff] %v6012_v17  ;;  %v6119_v18 = vsel %vm203_vm0, %v5972_v1, 0 }
  0x5f   : > { %v398_v20 = vld.sshfl [vmem:[#allocation1] sm:$0xff pattern:$0x73625140] }
  0x60   : > { %419 = vst [vmem:[#allocation1] ss:$4 sm:$0xff] %v6017_v19 }
  0x67   : > { %v420_v22 = vld.sshfl [vmem:[#allocation1] sm:$0xff pattern:$0x73625140] }
  0x68   : > { %441 = vst [vmem:[#allocation1] ss:$4 sm:$0xff] %v6021_v21  ;;  %422 = vrot.lane.b32.xlu2 %v420_v22, %s5928_s18  ;;  %v6126_v22 = vld [vmem:[%s8137_s1] sm:$0xf] }
  0x6f   : > { %v442_v24 = vld.sshfl [vmem:[#allocation1] sm:$0xff pattern:$0x73625140] }
  0x70   : > { %444 = vrot.lane.b32.xlu1 %v442_v24, %s5928_s18  ;;  %463 = vst [vmem:[#allocation1] ss:$4 sm:$0xff] %v6026_v23  ;;  %400 = vrot.lane.b32.xlu2 %v398_v20, %s5928_s18 }
  0x77   : > { %v464_v26 = vld.sshfl [vmem:[#allocation1] sm:$0xff pattern:$0x73625140] }
  0x78   : > { %466 = vrot.lane.b32.xlu1 %v464_v26, %s5928_s18  ;;  %485 = vst [vmem:[#allocation1] ss:$4 sm:$0xff] %v6032_v25 }
  0x7f   : > { %v486_v28 = vld.sshfl [vmem:[#allocation1] sm:$0xff pattern:$0x73625140] }
  0x80   : > { %507 = vst [vmem:[#allocation1] ss:$4 sm:$0xff] %v6037_v27  ;;  %488 = vrot.lane.b32.xlu2 %v486_v28, %s5928_s18 }
  0x87   : > { %v508_v29 = vld.sshfl [vmem:[#allocation1] sm:$0xff pattern:$0x73625140] }
  0x88   : > { %510 = vrot.lane.b32.xlu0 %v508_v29, %s5928_s18  ;;  %758 = vst [vmem:[#allocation1] ss:$4 sm:$0xff] %v5968_v0  ;;  %v6141_v29 = vsel %vm203_vm0, %v5980_v5, 0 }
  0x8f   : > { %v759_v30 = vld.sshfl [vmem:[#allocation1] sm:$0xff pattern:$0x73625140] }
  0x90   : > { %761 = vrot.lane.b32.xlu0 %v759_v30, %s5929_s19  ;;  %782 = vst [vmem:[#allocation1] ss:$4 sm:$0xff] %v5972_v1 }
  0x97   : > { %v783_v31 = vld.sshfl [vmem:[#allocation1] sm:$0xff pattern:$0x73625140] }
  0x98   : > { %785 = vrot.lane.b32.xlu1 %v783_v31, %s5929_s19  ;;  %803 = vst [vmem:[#allocation1] ss:$4 sm:$0xff] %v5976_v3 }
  0x9a   : > { %v247_v32 = vpop.permute.xlu0 %246 }
  0x9b   : > { %v249_v33 = vsel %vm203_vm0, %v247_v32, 0 }
  0x9c   : > { %258 = vmatpush.bf16.msra.mxu2 %v249_v33 }
  0x9f   : > { %5635 = vmatmul.msk.bf16.vlgmr.msra.gmra.mxu2 %vm199_vm1, %v6051_v34  ;;  %v804_v35 = vld.sshfl [vmem:[#allocation1] sm:$0xff pattern:$0x73625140] }
  0xa0   : > { %806 = vrot.lane.b32.xlu0 %v804_v35, %s5929_s19  ;;  %824 = vst [vmem:[#allocation1] ss:$4 sm:$0xff] %v5980_v5  ;;  %v6164_v35 = vsel %vm203_vm0, %v5991_v9, 0 }
  0xa2   : > { %v269_v36 = vpop.permute.xlu1 %268  ;;  %v198_v37 = vpop.permute.xlu0 %197 }
  0xa3   : > { %v205_v38 = vsel %vm203_vm0, %v198_v37, 0  ;;  %v335_v39 = vpop.permute.xlu2 %334  ;;  %v271_v40 = vsel %vm203_vm0, %v269_v36, 0  ;;  %v6168_v36 = vsel %vm203_vm0, %v5996_v11, 0  ;;  %v6172_v37 = vsel %vm203_vm0, %v6001_v13, 0 }
  0xa4   : > { %214 = vmatpush.bf16.msra.mxu0 %v205_v38  ;;  %280 = vmatpush.bf16.msra.mxu3 %v271_v40  ;;  %v337_v41 = vsel %vm203_vm0, %v335_v39, 0 }
  0xa5   : > { %346 = vmatpush.bf16.msrb.mxu2 %v337_v41  ;;  %v6194_v41 = vsel %vm203_vm0, %v6006_v15, 0 }
  0xa7   : > { %5633 = vmatmul.msk.bf16.vlgmr.msra.gmra.mxu0 %vm199_vm1, %v6051_v34  ;;  %5636 = vmatmul.msk.bf16.vlgmr.msra.gmra.mxu3 %vm199_vm1, %v6051_v34  ;;  %v825_v42 = vld.sshfl [vmem:[#allocation1] sm:$0xff pattern:$0x73625140] }
  0xa8   : > { %845 = vst [vmem:[#allocation1] ss:$4 sm:$0xff] %v5985_v7 }
  0xaa   : > { %v225_v43 = vpop.permute.xlu1 %224 }
  0xab   : > { %v227_v44 = vsel %vm203_vm0, %v225_v43, 0  ;;  %v291_v45 = vpop.permute.xlu2 %290  ;;  %v6203_v43 = vsel %vm203_vm0, %v6012_v17, 0 }
  0xac   : > { %236 = vmatpush.bf16.msra.mxu1 %v227_v44  ;;  %v293_v46 = vsel %vm203_vm0, %v291_v45, 0  ;;  %v6207_v44 = vsel %vm203_vm0, %v6017_v19, 0  ;;  %v6211_v45 = vsel %vm203_vm0, %v6021_v21, 0 }
  0xad   : > { %302 = vmatpush.bf16.msrb.mxu0 %v293_v46  ;;  %v6215_v46 = vsel %vm203_vm0, %v6026_v23, 0 }
  0xaf   : > { %5634 = vmatmul.msk.bf16.vlgmr.msra.gmra.mxu1 %vm199_vm1, %v6051_v34  ;;  %v846_v47 = vld.sshfl [vmem:[#allocation1] sm:$0xff pattern:$0x73625140]  ;;  %5639 = vmatmul.msk.bf16.vlgmr.msrb.gmra.mxu2 %vm199_vm1, %v6051_v34 }
  0xb0   : > { %866 = vst [vmem:[#allocation1] ss:$4 sm:$0xff] %v5991_v9  ;;  %848 = vrot.lane.b32.xlu2 %v846_v47, %s5929_s19 }
  0xb2   : > { %v313_v48 = vpop.permute.xlu1 %312 }
  0xb3   : > { %v315_v49 = vsel %vm203_vm0, %v313_v48, 0 }
  0xb4   : > { %324 = vmatpush.bf16.msrb.mxu1 %v315_v49  ;;  %v6235_v49 = vsel %vm203_vm0, %v6032_v25, 0 }
  0xb7   : > { %5637 = vmatmul.msk.bf16.vlgmr.msrb.gmra.mxu0 %vm199_vm1, %v6051_v34  ;;  %v867_v50 = vld.sshfl [vmem:[#allocation1] sm:$0xff pattern:$0x73625140] }
  0xb8   : > { %869 = vrot.lane.b32.xlu1 %v867_v50, %s5929_s19  ;;  %887 = vst [vmem:[#allocation1] ss:$4 sm:$0xff] %v5996_v11  ;;  %827 = vrot.lane.b32.xlu2 %v825_v42, %s5929_s19  ;;  %v6239_v50 = vsel %vm203_vm0, %v6037_v27, 0 }
  0xbf   : > { %5638 = vmatmul.msk.bf16.vlgmr.msrb.gmra.mxu1 %vm199_vm1, %v6051_v34  ;;  %v888_v51 = vld.sshfl [vmem:[#allocation1] sm:$0xff pattern:$0x73625140] }
  0xc0   : > { %908 = vst [vmem:[#allocation1] ss:$4 sm:$0xff] %v6001_v13  ;;  %890 = vrot.lane.b32.xlu1 %v888_v51, %s5929_s19 }
  0xc2   : > { %v357_v52 = vpop.permute.xlu0 %356  ;;  %v423_v53 = vpop.permute.xlu2 %422 }
  0xc3   : > { %v359_v54 = vsel %vm203_vm0, %v357_v52, 0  ;;  %v425_v55 = vsel %vm203_vm0, %v423_v53, 0 }
  0xc4   : > { %368 = vmatpush.bf16.msrb.mxu3 %v359_v54  ;;  %434 = vmatpush.bf16.msra.mxu2 %v425_v55 }
  0xc7   : > { %v909_v56 = vld.sshfl [vmem:[#allocation1] sm:$0xff pattern:$0x73625140]  ;;  %5640 = vmatmul.msk.bf16.vlgmr.msrb.gmra.mxu3 %vm199_vm1, %v6051_v34  ;;  %5643 = vmatmul.msk.bf16.vlgmr.msra.gmra.mxu2 %vm199_vm1, %v6051_v34 }
  0xc8   : > { %929 = vst [vmem:[#allocation1] ss:$4 sm:$0xff] %v6006_v15 }
  0xca   : > { %v379_v57 = vpop.permute.xlu0 %378  ;;  %v401_v58 = vpop.permute.xlu2 %400 }
  0xcb   : > { %v381_v59 = vsel %vm203_vm0, %v379_v57, 0  ;;  %v403_v60 = vsel %vm203_vm0, %v401_v58, 0 }
  0xcc   : > { %390 = vmatpush.bf16.msra.mxu0 %v381_v59  ;;  %412 = vmatpush.bf16.msra.mxu1 %v403_v60 }
  0xcf   : > { %v930_v61 = vld.sshfl [vmem:[#allocation1] sm:$0xff pattern:$0x73625140]  ;;  %5641 = vmatmul.msk.bf16.vlgmr.msra.gmra.mxu0 %vm199_vm1, %v6051_v34  ;;  %5642 = vmatmul.msk.bf16.vlgmr.msra.gmra.mxu1 %vm199_vm1, %v6051_v34 }
  0xd0   : > { %932 = vrot.lane.b32.xlu0 %v930_v61, %s5929_s19  ;;  %950 = vst [vmem:[#allocation1] ss:$4 sm:$0xff] %v6012_v17 }
  0xd7   : > { %v951_v62 = vld.sshfl [vmem:[#allocation1] sm:$0xff pattern:$0x73625140] }
  0xd8   : > { %971 = vst [vmem:[#allocation1] ss:$4 sm:$0xff] %v6017_v19  ;;  %911 = vrot.lane.b32.xlu0 %v909_v56, %s5929_s19  ;;  %953 = vrot.lane.b32.xlu2 %v951_v62, %s5929_s19  ;;  %v6256_v56 = vld [vmem:[%s8137_s1 + $0x8] sm:$0xf] }
  0xda   : > { %v489_v63 = vpop.permute.xlu2 %488 }
  0xdb   : > { %v491_v2 = vsel %vm203_vm0, %v489_v63, 0 }
  0xdc   : > { %500 = vmatpush.bf16.msrb.mxu1 %v491_v2 }
  0xdf   : > { %v972_v4 = vld.sshfl [vmem:[#allocation1] sm:$0xff pattern:$0x73625140]  ;;  %5646 = vmatmul.msk.bf16.vlgmr.msrb.gmra.mxu1 %vm199_vm1, %v6051_v34 }
  0xe0   : > { %992 = vst [vmem:[#allocation1] ss:$4 sm:$0xff] %v6021_v21  ;;  %974 = vrot.lane.b32.xlu2 %v972_v4, %s5929_s19  ;;  %570 = vmatpush.bf16.msra.mxu1 %v6114_v14 }
  0xe2   : > { %v445_v6 = vpop.permute.xlu1 %444 }
  0xe3   : > { %v447_v10 = vsel %vm203_vm0, %v445_v6, 0 }
  0xe4   : > { %456 = vmatpush.bf16.msra.mxu3 %v447_v10  ;;  %630 = vmatpush.bf16.msrb.mxu1 %v6168_v36 }
  0xe7   : > { %v993_v12 = vld.sshfl [vmem:[#allocation1] sm:$0xff pattern:$0x73625140]  ;;  %5644 = vmatmul.msk.bf16.vlgmr.msra.gmra.mxu3 %vm199_vm1, %v6051_v34 }
  0xe8   : > { %540 = vmatpush.bf16.msrb.mxu3 %v531_v8  ;;  %1013 = vst [vmem:[#allocation1] ss:$4 sm:$0xff] %v6026_v23 }
  0xea   : > { %v467_v16 = vpop.permute.xlu1 %466 }
  0xeb   : > { %v469_v20 = vsel %vm203_vm0, %v467_v16, 0 }
  0xec   : > { %478 = vmatpush.bf16.msrb.mxu0 %v469_v20 }
  0xef   : > { %v1014_v24 = vld.sshfl [vmem:[#allocation1] sm:$0xff pattern:$0x73625140]  ;;  %5645 = vmatmul.msk.bf16.vlgmr.msrb.gmra.mxu0 %vm199_vm1, %v6051_v34  ;;  %5650 = vmatmul.msk.bf16.vlgmr.msra.gmra.mxu1 %vm199_vm1, %v6126_v22 }
  0xf0   : > { %555 = vmatpush.bf16.msra.mxu0 %v6119_v18  ;;  %1016 = vrot.lane.b32.xlu1 %v1014_v24, %s5929_s19  ;;  %1034 = vst [vmem:[#allocation1] ss:$4 sm:$0xff] %v6032_v25 }
  0xf1   : > { %690 = vmatpush.bf16.msra.mxu1 %v6207_v44 }
  0xf4   : > { %615 = vmatpush.bf16.msrb.mxu0 %v6164_v35 }
  0xf7   : > { %v1035_v26 = vld.sshfl [vmem:[#allocation1] sm:$0xff pattern:$0x73625140]  ;;  %5648 = vmatmul.msk.bf16.vlgmr.msrb.gmra.mxu3 %vm199_vm1, %v6126_v22 }
  0xf8   : > { %995 = vrot.lane.b32.xlu1 %v993_v12, %s5929_s19  ;;  %1037 = vrot.lane.b32.xlu0 %v1035_v26, %s5929_s19  ;;  %1055 = vst [vmem:[#allocation1] ss:$4 sm:$0xff] %v6037_v27 }
  0xfa   : > { %v511_v28 = vpop.permute.xlu0 %510 }
  0xfb   : > { %v513_v30 = vsel %vm203_vm0, %v511_v28, 0 }
  0xfc   : > { %522 = vmatpush.bf16.msrb.mxu2 %v513_v30 }
  0xff   : > { %5647 = vmatmul.msk.bf16.vlgmr.msrb.gmra.mxu2 %vm199_vm1, %v6051_v34  ;;  %v1056_v31 = vld.sshfl [vmem:[#allocation1] sm:$0xff pattern:$0x73625140]  ;;  %5649 = vmatmul.msk.bf16.vlgmr.msra.gmra.mxu0 %vm199_vm1, %v6126_v22 }
 0x100   : > { %585 = vmatpush.bf16.msra.mxu2 %v6141_v29  ;;  %1058 = vrot.lane.b32.xlu0 %v1056_v31, %s5929_s19  ;;  %1093 = vst [vmem:[#allocation1] ss:$4 sm:$0xff] %v5968_v0  ;;  %v6160_v0 = vsel %vm203_vm0, %v5985_v7, 0 }
 0x101   : > { %600 = vmatpush.bf16.msra.mxu3 %v6160_v0  ;;  %5654 = vmatmul.msk.bf16.vlgmr.msrb.gmra.mxu1 %vm199_vm1, %v6126_v22 }
 0x102   : > { %675 = vmatpush.bf16.msra.mxu0 %v6203_v43  ;;  %v762_v51 = vpop.permute.xlu0 %761  ;;  %750 = vmatpush.bf16.msrb.mxu1 %v6239_v50 }
 0x103   : > { %v767_v52 = vsel %vm203_vm0, %v762_v51, 0 }
 0x104   : > { %645 = vmatpush.bf16.msrb.mxu2 %v6172_v37 }
 0x105   : > { %660 = vmatpush.bf16.msrb.mxu3 %v6194_v41 }
 0x107   : > { %v1094_v32 = vld.sshfl [vmem:[#allocation1] sm:$0xff pattern:$0x73625140]  ;;  %5652 = vmatmul.msk.bf16.vlgmr.msra.gmra.mxu3 %vm199_vm1, %v6126_v22 }
 0x108   : > { %1117 = vst [vmem:[#allocation1] ss:$4 sm:$0xff] %v5972_v1 }
 0x109   : > { %720 = vmatpush.bf16.msra.mxu3 %v6215_v46 }
 0x10a   : > { %v786_v55 = vpop.permute.xlu1 %785  ;;  %v849_v57 = vpop.permute.xlu2 %848 }
 0x10b   : > { %v788_v58 = vsel %vm203_vm0, %v786_v55, 0  ;;  %v851_v59 = vsel %vm203_vm0, %v849_v57, 0 }
 0x10f   : > { %v1118_v33 = vld.sshfl [vmem:[#allocation1] sm:$0xff pattern:$0x73625140]  ;;  %5651 = vmatmul.msk.bf16.vlgmr.msra.gmra.mxu2 %vm199_vm1, %v6126_v22  ;;  %5653 = vmatmul.msk.bf16.vlgmr.msrb.gmra.mxu0 %vm199_vm1, %v6126_v22 }
 0x110   : > { %1138 = vst [vmem:[#allocation1] ss:$4 sm:$0xff] %v5976_v3  ;;  %1120 = vrot.lane.b32.xlu2 %v1118_v33, %s5930_s24  ;;  %705 = vmatpush.bf16.msra.mxu2 %v6211_v45 }
 0x111   : > { %5658 = vmatmul.msk.bf16.vlgmr.msra.gmra.mxu1 %vm199_vm1, %v6126_v22  ;;  %735 = vmatpush.bf16.msrb.mxu0 %v6235_v49 }
 0x112   : > { %v807_v60 = vpop.permute.xlu0 %806  ;;  %v828_v8 = vpop.permute.xlu2 %827 }
 0x113   : > { %v809_v62 = vsel %vm203_vm0, %v807_v60, 0  ;;  %v830_v12 = vsel %vm203_vm0, %v828_v8, 0 }
 0x114   : > { %839 = vmatpush.bf16.msra.mxu1 %v830_v12 }
 0x117   : > { %v1139_v34 = vld.sshfl [vmem:[#allocation1] sm:$0xff pattern:$0x73625140]  ;;  %5656 = vmatmul.msk.bf16.vlgmr.msrb.gmra.mxu3 %vm199_vm1, %v6126_v22 }
 0x118   : > { %1141 = vrot.lane.b32.xlu1 %v1139_v34, %s5930_s24  ;;  %1159 = vst [vmem:[#allocation1] ss:$4 sm:$0xff] %v5980_v5  ;;  %1096 = vrot.lane.b32.xlu2 %v1094_v32, %s5930_s24 }
 0x119   : > { %797 = vmatpush.bf16.msrb.mxu3 %v788_v58 }
 0x11f   : > { %v1160_v38 = vld.sshfl [vmem:[#allocation1] sm:$0xff pattern:$0x73625140]  ;;  %5655 = vmatmul.msk.bf16.vlgmr.msrb.gmra.mxu2 %vm199_vm1, %v6126_v22  ;;  %5657 = vmatmul.msk.bf16.vlgmr.msra.gmra.mxu0 %vm199_vm1, %v6126_v22 }
 0x120   : > { %1180 = vst [vmem:[#allocation1] ss:$4 sm:$0xff] %v5985_v7  ;;  %1162 = vrot.lane.b32.xlu1 %v1160_v38, %s5930_s24  ;;  %776 = vmatpush.bf16.msrb.mxu2 %v767_v52 }
 0x121   : > { %5662 = vmatmul.msk.bf16.vlgmr.msrb.gmra.mxu1 %vm199_vm1, %v6126_v22  ;;  %818 = vmatpush.bf16.msra.mxu0 %v809_v62 }
 0x122   : > { %v6267_v2 = vpop.f32.mrf.mxu2 }
 0x124   : > { %v6262_v61 = vpop.f32.mrf.mxu0 }
 0x127   : > { %v1181_v39 = vld.sshfl [vmem:[#allocation1] sm:$0xff pattern:$0x73625140]  ;;  %5660 = vmatmul.msk.bf16.vlgmr.msra.gmra.mxu3 %vm199_vm1, %v6126_v22 }
 0x128   : > { %1201 = vst [vmem:[#allocation1] ss:$4 sm:$0xff] %v5991_v9 }
 0x12a   : > { %v6269_v4 = vpop.f32.mrf.mxu3  ;;  %v870_v10 = vpop.permute.xlu1 %869 }
 0x12b   : > { %v872_v16 = vsel %vm203_vm0, %v870_v10, 0  ;;  %v262_v28 = vpop.f32.mrf.mxu2 }
 0x12c   : > { %v6265_v63 = vpop.f32.mrf.mxu1  ;;  %v218_v20 = vpop.f32.mrf.mxu0  ;;  %881 = vmatpush.bf16.msra.mxu3 %v872_v16 }
 0x12f   : > { %v1202_v40 = vld.sshfl [vmem:[#allocation1] sm:$0xff pattern:$0x73625140]  ;;  %5659 = vmatmul.msk.bf16.vlgmr.msra.gmra.mxu2 %vm199_vm1, %v6126_v22  ;;  %5661 = vmatmul.msk.bf16.vlgmr.msrb.gmra.mxu0 %vm199_vm1, %v6126_v22 }
 0x130   : > { %1204 = vrot.lane.b32.xlu0 %v1202_v40, %s5930_s24  ;;  %1222 = vst [vmem:[#allocation1] ss:$4 sm:$0xff] %v5996_v11  ;;  %860 = vmatpush.bf16.msra.mxu2 %v851_v59 }
 0x131   : > { %5667 = vmatmul.msk.bf16.vlgmr.msra.gmra.mxu1 %vm199_vm1, %v6256_v56 }
 0x132   : > { %v284_v30 = vpop.f32.mrf.mxu3  ;;  %v891_v32 = vpop.permute.xlu1 %890 }
 0x133   : > { %v954_v33 = vpop.permute.xlu2 %953  ;;  %v893_v34 = vsel %vm203_vm0, %v891_v32, 0 }
 0x134   : > { %v240_v26 = vpop.f32.mrf.mxu1  ;;  %v6286_v38 = vpop.f32.mrf.mxu0  ;;  %v956_v40 = vsel %vm203_vm0, %v954_v33, 0  ;;  %902 = vmatpush.bf16.msrb.mxu0 %v893_v34 }
 0x137   : > { %v1223_v42 = vld.sshfl [vmem:[#allocation1] sm:$0xff pattern:$0x73625140]  ;;  %5665 = vmatmul.msk.bf16.vlgmr.msrb.gmra.mxu3 %vm199_vm1, %v6256_v56 }
 0x138   : > { %1243 = vst [vmem:[#allocation1] ss:$4 sm:$0xff] %v6001_v13  ;;  %1183 = vrot.lane.b32.xlu0 %v1181_v39, %s5930_s24  ;;  %1225 = vrot.lane.b32.xlu2 %v1223_v42, %s5930_s24 }
 0x139   : > { %965 = vmatpush.bf16.msrb.mxu3 %v956_v40 }
 0x13c   : > { %v306_v55 = vpop.f32.mrf.mxu0 }
 0x13f   : > { %v1244_v47 = vld.sshfl [vmem:[#allocation1] sm:$0xff pattern:$0x73625140]  ;;  %5664 = vmatmul.msk.bf16.vlgmr.msrb.gmra.mxu2 %vm199_vm1, %v6256_v56  ;;  %5666 = vmatmul.msk.bf16.vlgmr.msra.gmra.mxu0 %vm199_vm1, %v6256_v56 }
 0x140   : > { %1264 = vst [vmem:[#allocation1] ss:$4 sm:$0xff] %v6006_v15  ;;  %1246 = vrot.lane.b32.xlu2 %v1244_v47, %s5930_s24  ;;  %v6290_v47 = vpop.f32.mrf.mxu1 }
 0x142   : > { %v933_v22 = vpop.permute.xlu0 %932 }
 0x143   : > { %v935_v24 = vsel %vm203_vm0, %v933_v22, 0 }
 0x144   : > { %944 = vmatpush.bf16.msrb.mxu2 %v935_v24 }
 0x147   : > { %v1265_v48 = vld.sshfl [vmem:[#allocation1] sm:$0xff pattern:$0x73625140]  ;;  %5669 = vmatmul.msk.bf16.vlgmr.msra.gmra.mxu3 %vm199_vm1, %v6256_v56 }
 0x148   : > { %1285 = vst [vmem:[#allocation1] ss:$4 sm:$0xff] %v6012_v17  ;;  %v328_v60 = vpop.f32.mrf.mxu1 }
 0x14a   : > { %v912_v39 = vpop.permute.xlu0 %911  ;;  %v6294_v51 = vpop.f32.mrf.mxu3 }
 0x14b   : > { %v914_v42 = vsel %vm203_vm0, %v912_v39, 0 }
 0x14c   : > { %923 = vmatpush.bf16.msrb.mxu1 %v914_v42  ;;  %v6312_v20 = vpop.f32.mrf.mxu0 }
 0x14f   : > { %v1286_v53 = vld.sshfl [vmem:[#allocation1] sm:$0xff pattern:$0x73625140]  ;;  %5668 = vmatmul.msk.bf16.vlgmr.msra.gmra.mxu2 %vm199_vm1, %v6256_v56  ;;  %5670 = vmatmul.msk.bf16.vlgmr.msrb.gmra.mxu0 %vm199_vm1, %v6256_v56 }
 0x150   : > { %1288 = vrot.lane.b32.xlu1 %v1286_v53, %s5930_s24  ;;  %1306 = vst [vmem:[#allocation1] ss:$4 sm:$0xff] %v6017_v19  ;;  %5671 = vmatmul.msk.bf16.vlgmr.msrb.gmra.mxu1 %vm199_vm1, %v6256_v56  ;;  %v6316_v28 = vpop.f32.mrf.mxu1 }
 0x152   : > { %v372_v8 = vpop.f32.mrf.mxu3 }
 0x154   : > { %v394_v39 = vpop.f32.mrf.mxu0 }
 0x157   : > { %v1307_v54 = vld.sshfl [vmem:[#allocation1] sm:$0xff pattern:$0x73625140]  ;;  %5673 = vmatmul.msk.bf16.vlgmr.msrb.gmra.mxu3 %vm199_vm1, %v6256_v56 }
 0x158   : > { %1267 = vrot.lane.b32.xlu1 %v1265_v48, %s5930_s24  ;;  %1309 = vrot.lane.b32.xlu0 %v1307_v54, %s5930_s24  ;;  %1327 = vst [vmem:[#allocation1] ss:$4 sm:$0xff] %v6021_v21  ;;  %v6292_v48 = vpop.f32.mrf.mxu2  ;;  %v975_v54 = vpop.permute.xlu2 %974 }
 0x159   : > { %v977_v58 = vsel %vm203_vm0, %v975_v54, 0  ;;  %v416_v42 = vpop.f32.mrf.mxu1 }
 0x15a   : > { %986 = vmatpush.bf16.msra.mxu0 %v977_v58 }
 0x15f   : > { %v1328_v6 = vld.sshfl [vmem:[#allocation1] sm:$0xff pattern:$0x73625140]  ;;  %5672 = vmatmul.msk.bf16.vlgmr.msrb.gmra.mxu2 %vm199_vm1, %v6256_v56  ;;  %5674 = vmatmul.msk.bf16.vlgmr.msra.gmra.mxu0 %vm199_vm1, %v6256_v56 }
 0x160   : > { %1330 = vrot.lane.b32.xlu0 %v1328_v6, %s5930_s24  ;;  %1348 = vst [vmem:[#allocation1] ss:$4 sm:$0xff] %v6026_v23  ;;  %v350_v62 = vpop.f32.mrf.mxu2 }
 0x162   : > { %v1017_v53 = vpop.permute.xlu1 %1016 }
 0x163   : > { %v1019_v57 = vsel %vm203_vm0, %v1017_v53, 0 }
 0x164   : > { %1028 = vmatpush.bf16.msra.mxu2 %v1019_v57  ;;  %v6338_v57 = vpop.f32.mrf.mxu1 }
 0x167   : > { %v1349_v31 = vld.sshfl [vmem:[#allocation1] sm:$0xff pattern:$0x73625140] }
 0x168   : > { %1369 = vst [vmem:[#allocation1] ss:$4 sm:$0xff] %v6032_v25  ;;  %v6318_v30 = vpop.f32.mrf.mxu2 }
 0x16a   : > { %v1038_v59 = vpop.permute.xlu0 %1037  ;;  %v996_v12 = vpop.permute.xlu1 %995 }
 0x16b   : > { %v1040_v6 = vsel %vm203_vm0, %v1038_v59, 0  ;;  %v1121_v16 = vpop.permute.xlu2 %1120  ;;  %v998_v22 = vsel %vm203_vm0, %v996_v12, 0  ;;  %v6354_v12 = vld [vmem:[%s8137_s1 + $0xc] sm:$0xf] }
 0x16c   : > { %1049 = vmatpush.bf16.msra.mxu3 %v1040_v6  ;;  %v1123_v24 = vsel %vm203_vm0, %v1121_v16, 0  ;;  %1007 = vmatpush.bf16.msra.mxu1 %v998_v22  ;;  %v6336_v55 = vpop.f32.mrf.mxu0  ;;  %v504_v16 = vpop.f32.mrf.mxu1 }
 0x16d   : > { %1132 = vmatpush.bf16.msrb.mxu2 %v1123_v24 }
 0x16f   : > { %v1370_v52 = vld.sshfl [vmem:[#allocation1] sm:$0xff pattern:$0x73625140]  ;;  %5675 = vmatmul.msk.bf16.vlgmr.msra.gmra.mxu1 %vm199_vm1, %v6256_v56  ;;  %5676 = vmatmul.msk.bf16.vlgmr.msra.gmra.mxu2 %vm199_vm1, %v6256_v56 }
 0x170   : > { %1390 = vst [vmem:[#allocation1] ss:$4 sm:$0xff] %v6037_v27  ;;  %1372 = vrot.lane.b32.xlu2 %v1370_v52, %s5930_s24  ;;  %v438_v52 = vpop.f32.mrf.mxu2  ;;  %5677 = vmatmul.msk.bf16.vlgmr.msra.gmra.mxu3 %vm199_vm1, %v6256_v56 }
 0x172   : > { %v1059_v26 = vpop.permute.xlu0 %1058 }
 0x173   : > { %v1061_v32 = vsel %vm203_vm0, %v1059_v26, 0  ;;  %v1097_v34 = vpop.permute.xlu2 %1096 }
 0x174   : > { %1070 = vmatpush.bf16.msrb.mxu0 %v1061_v32  ;;  %v1102_v40 = vsel %vm203_vm0, %v1097_v34, 0 }
 0x175   : > { %1111 = vmatpush.bf16.msrb.mxu1 %v1102_v40  ;;  %v572_v40 = vpop.f32.mrf.mxu1 }
 0x176   : > { %v6368_v42 = vadd.f32 %v572_v40, %v6267_v2 }
 0x177   : > { %v1391_v10 = vld.sshfl [vmem:[#allocation1] sm:$0xff pattern:$0x73625140]  ;;  %5678 = vmatmul.msk.bf16.vlgmr.msrb.gmra.mxu0 %vm199_vm1, %v6256_v56 }
 0x178   : > { %1393 = vrot.lane.b32.xlu1 %v1391_v10, %s5930_s24  ;;  %1646 = vst [vmem:[#allocation1] ss:$4 sm:$0xff] %v5972_v1  ;;  %1351 = vrot.lane.b32.xlu2 %v1349_v31, %s5930_s24  ;;  %v6321_v31 = vpop.f32.mrf.mxu3  ;;  %v482_v10 = vpop.f32.mrf.mxu0 }
 0x17f   : > { %v1647_v33 = vld.sshfl [vmem:[#allocation1] sm:$0xff pattern:$0x73625140]  ;;  %5680 = vmatmul.msk.bf16.vlgmr.msrb.gmra.mxu1 %vm199_vm1, %v6354_v12  ;;  %5681 = vmatmul.msk.bf16.vlgmr.msrb.gmra.mxu2 %vm199_vm1, %v6354_v12 }
 0x180   : > { %1649 = vrot.lane.b32.xlu0 %v1647_v33, %s5928_s18  ;;  %1670 = vst [vmem:[#allocation1] ss:$4 sm:$0xff] %v5976_v3  ;;  %v460_v53 = vpop.f32.mrf.mxu3  ;;  %v557_v34 = vpop.f32.mrf.mxu0 }
 0x181   : > { %v6365_v39 = vadd.f32 %v557_v34, %v6265_v63 }
 0x182   : > { %v6341_v60 = vpop.f32.mrf.mxu2 }
 0x187   : > { %v1671_v54 = vld.sshfl [vmem:[#allocation1] sm:$0xff pattern:$0x73625140] }
 0x188   : > { %1691 = vst [vmem:[#allocation1] ss:$4 sm:$0xff] %v5980_v5  ;;  %1673 = vrot.lane.b32.xlu2 %v1671_v54, %s5928_s18  ;;  %v542_v62 = vpop.f32.mrf.mxu3  ;;  %v559_v53 = vpop.f32.mrf.mxu0 }
 0x189   : > { %v6344_v6 = vadd.f32 %v542_v62, %v6262_v61  ;;  %v574_v54 = vpop.f32.mrf.mxu1 }
 0x18a   : > { %v1142_v58 = vpop.permute.xlu1 %1141  ;;  %v526_v24 = vpop.f32.mrf.mxu2 }
 0x18b   : > { %v1144_v59 = vsel %vm203_vm0, %v1142_v58, 0 }
 0x18c   : > { %1153 = vmatpush.bf16.msrb.mxu3 %v1144_v59 }
 0x18f   : > { %v1692_v8 = vld.sshfl [vmem:[#allocation1] sm:$0xff pattern:$0x73625140]  ;;  %5682 = vmatmul.msk.bf16.vlgmr.msrb.gmra.mxu3 %vm199_vm1, %v6354_v12 }
 0x190   : > { %1712 = vst [vmem:[#allocation1] ss:$4 sm:$0xff] %v5985_v7  ;;  %v544_v26 = vpop.f32.mrf.mxu3 }
 0x192   : > { %v1163_v22 = vpop.permute.xlu1 %1162  ;;  %v1226_v32 = vpop.permute.xlu2 %1225 }
 0x193   : > { %v1165_v61 = vsel %vm203_vm0, %v1163_v22, 0  ;;  %v1228_v56 = vsel %vm203_vm0, %v1226_v32, 0  ;;  %v6378_v2 = vpop.f32.mrf.mxu2  ;;  %v617_v22 = vpop.f32.mrf.mxu0 }
 0x194   : > { %1174 = vmatpush.bf16.msra.mxu0 %v1165_v61  ;;  %1237 = vmatpush.bf16.msra.mxu3 %v1228_v56  ;;  %v6389_v24 = vadd.f32 %v617_v22, %v6290_v47  ;;  %v632_v32 = vpop.f32.mrf.mxu1 }
 0x195   : > { %v6393_v56 = vadd.f32 %v632_v32, %v6292_v48 }
 0x197   : > { %v1713_v33 = vld.sshfl [vmem:[#allocation1] sm:$0xff pattern:$0x73625140]  ;;  %5683 = vmatmul.msk.bf16.vlgmr.msra.gmra.mxu0 %vm199_vm1, %v6354_v12 }
 0x198   : > { %1715 = vrot.lane.b32.xlu1 %v1713_v33, %s5928_s18  ;;  %1733 = vst [vmem:[#allocation1] ss:$4 sm:$0xff] %v5991_v9  ;;  %v602_v59 = vpop.f32.mrf.mxu3 }
 0x199   : > { %v6381_v62 = vadd.f32 %v602_v59, %v6286_v38 }
 0x19a   : > { %v1247_v10 = vpop.permute.xlu2 %1246 }
 0x19b   : > { %v1249_v16 = vsel %vm203_vm0, %v1247_v10, 0  ;;  %v589_v26 = vpop.f32.mrf.mxu2  ;;  %v619_v34 = vpop.f32.mrf.mxu0 }
 0x19c   : > { %1258 = vmatpush.bf16.msrb.mxu0 %v1249_v16  ;;  %v634_v40 = vpop.f32.mrf.mxu1 }
 0x19f   : > { %v1734_v52 = vld.sshfl [vmem:[#allocation1] sm:$0xff pattern:$0x73625140]  ;;  %5686 = vmatmul.msk.bf16.vlgmr.msra.gmra.mxu3 %vm199_vm1, %v6354_v12 }
 0x1a0   : > { %1694 = vrot.lane.b32.xlu1 %v1692_v8, %s5928_s18  ;;  %1736 = vrot.lane.b32.xlu0 %v1734_v52, %s5928_s18  ;;  %1754 = vst [vmem:[#allocation1] ss:$4 sm:$0xff] %v5996_v11  ;;  %v604_v33 = vpop.f32.mrf.mxu3 }
 0x1a2   : > { %v1205_v63 = vpop.permute.xlu0 %1204 }
 0x1a3   : > { %v1207_v58 = vsel %vm203_vm0, %v1205_v63, 0  ;;  %v6406_v53 = vpop.f32.mrf.mxu2 }
 0x1a4   : > { %1216 = vmatpush.bf16.msra.mxu2 %v1207_v58  ;;  %v677_v58 = vpop.f32.mrf.mxu0  ;;  %v692_v59 = vpop.f32.mrf.mxu1 }
 0x1a5   : > { %v6413_v16 = vadd.f32 %v677_v58, %v6316_v28 }
 0x1a7   : > { %v1755_v8 = vld.sshfl [vmem:[#allocation1] sm:$0xff pattern:$0x73625140]  ;;  %5685 = vmatmul.msk.bf16.vlgmr.msra.gmra.mxu2 %vm199_vm1, %v6354_v12  ;;  %5687 = vmatmul.msk.bf16.vlgmr.msrb.gmra.mxu0 %vm199_vm1, %v6354_v12 }
 0x1a8   : > { %1757 = vrot.lane.b32.xlu0 %v1755_v8, %s5928_s18  ;;  %1775 = vst [vmem:[#allocation1] ss:$4 sm:$0xff] %v6001_v13  ;;  %v662_v63 = vpop.f32.mrf.mxu3  ;;  %v6416_v8 = vadd.f32 %v692_v59, %v6318_v30 }
 0x1a9   : > { %v6410_v54 = vadd.f32 %v662_v63, %v6312_v20 }
 0x1aa   : > { %v1184_v61 = vpop.permute.xlu0 %1183 }
 0x1ab   : > { %v1186_v38 = vsel %vm203_vm0, %v1184_v61, 0  ;;  %v649_v20 = vpop.f32.mrf.mxu2 }
 0x1ac   : > { %1195 = vmatpush.bf16.msra.mxu1 %v1186_v38  ;;  %v679_v26 = vpop.f32.mrf.mxu0  ;;  %v694_v32 = vpop.f32.mrf.mxu1 }
 0x1af   : > { %5684 = vmatmul.msk.bf16.vlgmr.msra.gmra.mxu1 %vm199_vm1, %v6354_v12  ;;  %v1776_v47 = vld.sshfl [vmem:[#allocation1] sm:$0xff pattern:$0x73625140] }
 0x1b0   : > { %1796 = vst [vmem:[#allocation1] ss:$4 sm:$0xff] %v6006_v15  ;;  %v664_v38 = vpop.f32.mrf.mxu3 }
 0x1b4   : > { %v6452_v20 = vpop.f32.mrf.mxu0  ;;  %v6455_v26 = vpop.f32.mrf.mxu1 }
 0x1b7   : > { %v1797_v52 = vld.sshfl [vmem:[#allocation1] sm:$0xff pattern:$0x73625140] }
 0x1b8   : > { %1817 = vst [vmem:[#allocation1] ss:$4 sm:$0xff] %v6012_v17  ;;  %1799 = vrot.lane.b32.xlu2 %v1797_v52, %s5928_s18 }
 0x1bf   : > { %v1818_v48 = vld.sshfl [vmem:[#allocation1] sm:$0xff pattern:$0x73625140] }
 0x1c0   : > { %1820 = vrot.lane.b32.xlu1 %v1818_v48, %s5928_s18  ;;  %1838 = vst [vmem:[#allocation1] ss:$4 sm:$0xff] %v6017_v19  ;;  %1778 = vrot.lane.b32.xlu2 %v1776_v47, %s5928_s18 }
 0x1c2   : > { %v1289_v10 = vpop.permute.xlu1 %1288 }
 0x1c3   : > { %v1291_v22 = vsel %vm203_vm0, %v1289_v10, 0 }
 0x1c4   : > { %1300 = vmatpush.bf16.msrb.mxu2 %v1291_v22  ;;  %v6442_v22 = vpop.f32.mrf.mxu2 }
 0x1c7   : > { %v1839_v61 = vld.sshfl [vmem:[#allocation1] sm:$0xff pattern:$0x73625140]  ;;  %5689 = vmatmul.msk.bf16.vlgmr.msrb.gmra.mxu2 %vm199_vm1, %v6354_v12 }
 0x1c8   : > { %1859 = vst [vmem:[#allocation1] ss:$4 sm:$0xff] %v6021_v21  ;;  %1841 = vrot.lane.b32.xlu1 %v1839_v61, %s5928_s18  ;;  %v6444_v61 = vpop.f32.mrf.mxu3 }
 0x1ca   : > { %v1268_v28 = vpop.permute.xlu1 %1267  ;;  %v1310_v33 = vpop.permute.xlu0 %1309 }
 0x1cb   : > { %v1270_v30 = vsel %vm203_vm0, %v1268_v28, 0  ;;  %v1312_v47 = vsel %vm203_vm0, %v1310_v33, 0  ;;  %v1373_v34 = vpop.permute.xlu2 %1372  ;;  %v6461_v28 = vld [vmem:[%s8137_s1 + $0x10] sm:$0xf]  ;;  %v6464_v33 = vld [vmem:[%s5965_s17 + $0x1e] sm:$0x3] }
 0x1cc   : > { %1279 = vmatpush.bf16.msrb.mxu1 %v1270_v30  ;;  %1321 = vmatpush.bf16.msrb.mxu3 %v1312_v47  ;;  %v1375_v40 = vsel %vm203_vm0, %v1373_v34, 0  ;;  %v709_v38 = vpop.f32.mrf.mxu2  ;;  %v739_v47 = vpop.f32.mrf.mxu0 }
 0x1cd   : > { %1384 = vmatpush.bf16.msra.mxu2 %v1375_v40  ;;  %v754_v40 = vpop.f32.mrf.mxu1 }
 0x1cf   : > { %5688 = vmatmul.msk.bf16.vlgmr.msrb.gmra.mxu1 %vm199_vm1, %v6354_v12  ;;  %v1860_v52 = vld.sshfl [vmem:[#allocation1] sm:$0xff pattern:$0x73625140]  ;;  %5690 = vmatmul.msk.bf16.vlgmr.msrb.gmra.mxu3 %vm199_vm1, %v6354_v12 }
 0x1d0   : > { %1880 = vst [vmem:[#allocation1] ss:$4 sm:$0xff] %v6026_v23  ;;  %v724_v32 = vpop.f32.mrf.mxu3 }
 0x1d1   : > { %1464 = vmatpush.bf16.msrb.mxu2 %v6141_v29 }
 0x1d2   : > { %v1331_v48 = vpop.permute.xlu0 %1330 }
 0x1d3   : > { %v1333_v63 = vsel %vm203_vm0, %v1331_v48, 0  ;;  %v1352_v58 = vpop.permute.xlu2 %1351 }
 0x1d4   : > { %1342 = vmatpush.bf16.msra.mxu0 %v1333_v63  ;;  %v1354_v59 = vsel %vm203_vm0, %v1352_v58, 0  ;;  %v778_v34 = vpop.f32.mrf.mxu2  ;;  %v588_v58 = vadd.f32 %v6378_v2, %v6269_v4 }
 0x1d5   : > { %1363 = vmatpush.bf16.msra.mxu1 %v1354_v59  ;;  %v841_v38 = vpop.f32.mrf.mxu1 }
 0x1d7   : > { %v1881_v10 = vld.sshfl [vmem:[#allocation1] sm:$0xff pattern:$0x73625140]  ;;  %5691 = vmatmul.msk.bf16.vlgmr.msra.gmra.mxu0 %vm199_vm1, %v6354_v12  ;;  %5693 = vmatmul.msk.bf16.vlgmr.msra.gmra.mxu2 %vm199_vm1, %v6354_v12 }
 0x1d8   : > { %1438 = vmatpush.bf16.msrb.mxu0 %v6119_v18  ;;  %1883 = vrot.lane.b32.xlu0 %v1881_v10, %s5928_s18  ;;  %1901 = vst [vmem:[#allocation1] ss:$4 sm:$0xff] %v6032_v25  ;;  %v820_v10 = vpop.f32.mrf.mxu0 }
 0x1d9   : > { %1451 = vmatpush.bf16.msrb.mxu1 %v6114_v14  ;;  %1516 = vmatpush.bf16.msra.mxu2 %v6172_v37  ;;  %v6492_v4 = vadd.f32 %v820_v10, %v6368_v42 }
 0x1dc   : > { %1490 = vmatpush.bf16.msra.mxu0 %v6164_v35  ;;  %v780_v2 = vpop.f32.mrf.mxu2 }
 0x1dd   : > { %v843_v42 = vpop.f32.mrf.mxu1 }
 0x1df   : > { %v1902_v18 = vld.sshfl [vmem:[#allocation1] sm:$0xff pattern:$0x73625140]  ;;  %5692 = vmatmul.msk.bf16.vlgmr.msra.gmra.mxu1 %vm199_vm1, %v6354_v12 }
 0x1e0   : > { %1922 = vst [vmem:[#allocation1] ss:$4 sm:$0xff] %v6037_v27  ;;  %1862 = vrot.lane.b32.xlu0 %v1860_v52, %s5928_s18  ;;  %1904 = vrot.lane.b32.xlu2 %v1902_v18, %s5928_s18  ;;  %v6474_v52 = vadd.f32 %v778_v34, %v6344_v6  ;;  %v799_v6 = vpop.f32.mrf.mxu3 }
 0x1e1   : > { %1503 = vmatpush.bf16.msra.mxu1 %v6168_v36  ;;  %v6489_v18 = vadd.f32 %v799_v6, %v6365_v39 }
 0x1e4   : > { %v862_v47 = vpop.f32.mrf.mxu2 }
 0x1e5   : > { %v6511_v40 = vadd.f32 %v862_v47, %v6381_v62  ;;  %v925_v10 = vpop.f32.mrf.mxu1 }
 0x1e7   : > { %v1923_v30 = vld.sshfl [vmem:[#allocation1] sm:$0xff pattern:$0x73625140]  ;;  %5696 = vmatmul.msk.bf16.vlgmr.msrb.gmra.mxu0 %vm199_vm1, %v6461_v28  ;;  %5698 = vmatmul.msk.bf16.vlgmr.msrb.gmra.mxu2 %vm199_vm1, %v6461_v28 }
 0x1e8   : > { %1943 = vst [vmem:[#allocation1] ss:$4 sm:$0xff] %v6464_v33  ;;  %1925 = vrot.lane.b32.xlu2 %v1923_v30, %s5928_s18  ;;  %1542 = vmatpush.bf16.msrb.mxu0 %v6203_v43  ;;  %v801_v39 = vpop.f32.mrf.mxu3  ;;  %v822_v30 = vpop.f32.mrf.mxu0 }
 0x1e9   : > { %1568 = vmatpush.bf16.msrb.mxu2 %v6211_v45 }
 0x1ea   : > { %v1394_v48 = vpop.permute.xlu1 %1393 }
 0x1eb   : > { %v1396_v63 = vsel %vm203_vm0, %v1394_v48, 0 }
 0x1ec   : > { %1405 = vmatpush.bf16.msra.mxu3 %v1396_v63  ;;  %v864_v6 = vpop.f32.mrf.mxu2 }
 0x1ef   : > { %v1944_v59 = vld.sshfl [vmem:[#allocation1] sm:$0xff pattern:$0x73625140]  ;;  %5694 = vmatmul.msk.bf16.vlgmr.msra.gmra.mxu3 %vm199_vm1, %v6354_v12  ;;  %5697 = vmatmul.msk.bf16.vlgmr.msrb.gmra.mxu1 %vm199_vm1, %v6461_v28  ;;  %v6494_v12 = vadd.f32 %v841_v38, %v588_v58  ;;  %v648_v58 = vadd.f32 %v6406_v53, %v6294_v51 }
 0x1f0   : > { %1477 = vmatpush.bf16.msrb.mxu3 %v6160_v0  ;;  %1981 = vst [vmem:[#allocation1] ss:$4 sm:$0xff] %v5972_v1  ;;  %1555 = vmatpush.bf16.msrb.mxu1 %v6207_v44  ;;  %v883_v48 = vpop.f32.mrf.mxu3  ;;  %v904_v63 = vpop.f32.mrf.mxu0 }
 0x1f1   : > { %v6524_v62 = vadd.f32 %v883_v48, %v6389_v24  ;;  %v6529_v51 = vadd.f32 %v925_v10, %v648_v58 }
 0x1f4   : > { %1529 = vmatpush.bf16.msra.mxu3 %v6194_v41  ;;  %v946_v39 = vpop.f32.mrf.mxu2 }
 0x1f7   : > { %v1982_v32 = vld.sshfl [vmem:[#allocation1] sm:$0xff pattern:$0x73625140]  ;;  %5700 = vmatmul.msk.bf16.vlgmr.msra.gmra.mxu0 %vm199_vm1, %v6461_v28  ;;  %5702 = vmatmul.msk.bf16.vlgmr.msra.gmra.mxu2 %vm199_vm1, %v6461_v28 }
 0x1f8   : > { %1984 = vrot.lane.b32.xlu1 %v1982_v32, %s5929_s19  ;;  %2005 = vst [vmem:[#allocation1] ss:$4 sm:$0xff] %v5976_v3  ;;  %1594 = vmatpush.bf16.msra.mxu0 %v6235_v49  ;;  %v885_v53 = vpop.f32.mrf.mxu3  ;;  %v906_v38 = vpop.f32.mrf.mxu0 }
 0x1f9   : > { %v927_v32 = vpop.f32.mrf.mxu1 }
 0x1fc   : > { %v948_v47 = vpop.f32.mrf.mxu2 }
 0x1ff   : > { %v2006_v34 = vld.sshfl [vmem:[#allocation1] sm:$0xff pattern:$0x73625140]  ;;  %5699 = vmatmul.msk.bf16.vlgmr.msrb.gmra.mxu3 %vm199_vm1, %v6461_v28  ;;  %5701 = vmatmul.msk.bf16.vlgmr.msra.gmra.mxu1 %vm199_vm1, %v6461_v28 }
 0x200   : > { %1946 = vrot.lane.b32.xlu1 %v1944_v59, %s5928_s18  ;;  %2008 = vrot.lane.b32.xlu0 %v2006_v34, %s5929_s19  ;;  %2026 = vst [vmem:[#allocation1] ss:$4 sm:$0xff] %v5980_v5  ;;  %v6527_v59 = vadd.f32 %v904_v63, %v6393_v56  ;;  %v967_v24 = vpop.f32.mrf.mxu3  ;;  %v988_v42 = vpop.f32.mrf.mxu0  ;;  %v6538_v34 = vsel %vm203_vm0, %v6464_v33, 0  ;;  %v6546_v63 = vadd.f32 %v946_v39, %v6410_v54 }
 0x201   : > { %1581 = vmatpush.bf16.msrb.mxu3 %v6215_v46  ;;  %1607 = vmatpush.bf16.msra.mxu1 %v6239_v50  ;;  %v1009_v56 = vpop.f32.mrf.mxu1  ;;  %v6549_v58 = vadd.f32 %v967_v24, %v6413_v16  ;;  %v6552_v6 = vadd.f32 %v988_v42, %v6416_v8  ;;  %v708_v54 = vadd.f32 %v6442_v22, %v6321_v31  ;;  %v1674_v22 = vpop.permute.xlu2 %1673 }
 0x202   : > { %1623 = vmatpush.bf16.msra.mxu2 %v6538_v34  ;;  %v723_v16 = vadd.f32 %v6444_v61, %v6336_v55  ;;  %v738_v8 = vadd.f32 %v6452_v20, %v6338_v57  ;;  %v753_v42 = vadd.f32 %v6455_v26, %v6341_v60  ;;  %v1676_v20 = vsel %vm203_vm0, %v1674_v22, 0 }
 0x203   : > { %v6572_v31 = vadd.f32 %v1009_v56, %v708_v54 }
 0x204   : > { %v1030_v24 = vpop.f32.mrf.mxu2 }
 0x205   : > { %v6575_v57 = vadd.f32 %v1030_v24, %v723_v16 }
 0x207   : > { %v2027_v2 = vld.sshfl [vmem:[#allocation1] sm:$0xff pattern:$0x73625140]  ;;  %5704 = vmatmul.msk.bf16.vlgmr.msrb.gmra.mxu0 %vm199_vm1, %v6461_v28  ;;  %5706 = vmatmul.msk.bf16.vlgmr.msrb.gmra.mxu2 %vm199_vm1, %v6461_v28 }
 0x208   : > { %2029 = vrot.lane.b32.xlu0 %v2027_v2, %s5929_s19  ;;  %2047 = vst [vmem:[#allocation1] ss:$4 sm:$0xff] %v5985_v7  ;;  %v969_v10 = vpop.f32.mrf.mxu3  ;;  %v1650_v2 = vpop.permute.xlu0 %1649  ;;  %1685 = vmatpush.bf16.msrb.mxu0 %v1676_v20 }
 0x209   : > { %v1655_v53 = vsel %vm203_vm0, %v1650_v2, 0  ;;  %v990_v38 = vpop.f32.mrf.mxu0  ;;  %v1011_v39 = vpop.f32.mrf.mxu1 }
 0x20a   : > { %v1716_v32 = vpop.permute.xlu1 %1715 }
 0x20b   : > { %v1718_v55 = vsel %vm203_vm0, %v1716_v32, 0 }
 0x20c   : > { %1727 = vmatpush.bf16.msrb.mxu2 %v1718_v55  ;;  %v1032_v56 = vpop.f32.mrf.mxu2 }
 0x20f   : > { %v2048_v30 = vld.sshfl [vmem:[#allocation1] sm:$0xff pattern:$0x73625140]  ;;  %5703 = vmatmul.msk.bf16.vlgmr.msra.gmra.mxu3 %vm199_vm1, %v6461_v28  ;;  %5705 = vmatmul.msk.bf16.vlgmr.msrb.gmra.mxu1 %vm199_vm1, %v6461_v28 }
 0x210   : > { %2068 = vst [vmem:[#allocation1] ss:$4 sm:$0xff] %v5991_v9  ;;  %1664 = vmatpush.bf16.msra.mxu3 %v1655_v53  ;;  %v1051_v60 = vpop.f32.mrf.mxu3  ;;  %v6589_v53 = vld [vmem:[%s8137_s1 + $0x14] sm:$0xf] }
 0x211   : > { %v6577_v61 = vadd.f32 %v1051_v60, %v738_v8  ;;  %v1072_v26 = vpop.f32.mrf.mxu0  ;;  %v1113_v10 = vpop.f32.mrf.mxu1 }
 0x212   : > { %v6584_v2 = vadd.f32 %v1113_v10, %v6474_v52  ;;  %v1737_v54 = vpop.permute.xlu0 %1736  ;;  %v1800_v52 = vpop.permute.xlu2 %1799 }
 0x213   : > { %v1739_v16 = vsel %vm203_vm0, %v1737_v54, 0  ;;  %v1802_v24 = vsel %vm203_vm0, %v1800_v52, 0 }
 0x217   : > { %v2069_v48 = vld.sshfl [vmem:[#allocation1] sm:$0xff pattern:$0x73625140]  ;;  %5708 = vmatmul.msk.bf16.vlgmr.msra.gmra.mxu0 %vm199_vm1, %v6461_v28  ;;  %5710 = vmatmul.msk.bf16.vlgmr.msra.gmra.mxu2 %vm199_vm1, %v6461_v28 }
 0x218   : > { %2089 = vst [vmem:[#allocation1] ss:$4 sm:$0xff] %v5996_v11  ;;  %2071 = vrot.lane.b32.xlu2 %v2069_v48, %s5929_s19  ;;  %v6580_v48 = vadd.f32 %v1072_v26, %v753_v42  ;;  %v1053_v32 = vpop.f32.mrf.mxu3  ;;  %1811 = vmatpush.bf16.msra.mxu2 %v1802_v24  ;;  %v1134_v42 = vpop.f32.mrf.mxu2 }
 0x219   : > { %v1074_v39 = vpop.f32.mrf.mxu0  ;;  %v1115_v8 = vpop.f32.mrf.mxu1 }
 0x21a   : > { %v1758_v60 = vpop.permute.xlu0 %1757  ;;  %v1779_v26 = vpop.permute.xlu2 %1778 }
 0x21b   : > { %v1760_v22 = vsel %vm203_vm0, %v1758_v60, 0 }
 0x21c   : > { %1769 = vmatpush.bf16.msra.mxu0 %v1760_v22 }
 0x21f   : > { %v2090_v47 = vld.sshfl [vmem:[#allocation1] sm:$0xff pattern:$0x73625140]  ;;  %5707 = vmatmul.msk.bf16.vlgmr.msrb.gmra.mxu3 %vm199_vm1, %v6461_v28  ;;  %5709 = vmatmul.msk.bf16.vlgmr.msra.gmra.mxu1 %vm199_vm1, %v6461_v28  ;;  %v1695_v28 = vpop.permute.xlu1 %1694 }
 0x220   : > { %2092 = vrot.lane.b32.xlu1 %v2090_v47, %s5929_s19  ;;  %2110 = vst [vmem:[#allocation1] ss:$4 sm:$0xff] %v6001_v13  ;;  %2050 = vrot.lane.b32.xlu2 %v2048_v30, %s5929_s19  ;;  %v1697_v30 = vsel %vm203_vm0, %v1695_v28, 0  ;;  %v1155_v55 = vpop.f32.mrf.mxu3  ;;  %v1781_v28 = vsel %vm203_vm0, %v1779_v26, 0 }
 0x221   : > { %1706 = vmatpush.bf16.msrb.mxu1 %v1697_v30  ;;  %1748 = vmatpush.bf16.msrb.mxu3 %v1739_v16  ;;  %v1176_v20 = vpop.f32.mrf.mxu0  ;;  %v1136_v30 = vpop.f32.mrf.mxu2  ;;  %v6614_v32 = vadd.f32 %v1155_v55, %v6492_v4 }
 0x222   : > { %v6617_v54 = vadd.f32 %v1176_v20, %v6494_v12 }
 0x225   : > { %1790 = vmatpush.bf16.msra.mxu1 %v1781_v28 }
 0x227   : > { %v2111_v38 = vld.sshfl [vmem:[#allocation1] sm:$0xff pattern:$0x73625140]  ;;  %5713 = vmatmul.msk.bf16.vlgmr.msrb.gmra.mxu0 %vm199_vm1, %v6589_v53  ;;  %5715 = vmatmul.msk.bf16.vlgmr.msrb.gmra.mxu2 %vm199_vm1, %v6589_v53 }
 0x228   : > { %2113 = vrot.lane.b32.xlu1 %v2111_v38, %s5929_s19  ;;  %2131 = vst [vmem:[#allocation1] ss:$4 sm:$0xff] %v6006_v15  ;;  %v6611_v38 = vadd.f32 %v1134_v42, %v6489_v18  ;;  %v1157_v16 = vpop.f32.mrf.mxu3 }
 0x229   : > { %v1178_v24 = vpop.f32.mrf.mxu0 }
 0x22a   : > { %v1218_v60 = vpop.f32.mrf.mxu2 }
 0x22c   : > { %v1197_v56 = vpop.f32.mrf.mxu1 }
 0x22d   : > { %v6630_v18 = vadd.f32 %v1197_v56, %v6511_v40 }
 0x22f   : > { %v2132_v47 = vld.sshfl [vmem:[#allocation1] sm:$0xff pattern:$0x73625140]  ;;  %5712 = vmatmul.msk.bf16.vlgmr.msra.gmra.mxu3 %vm199_vm1, %v6589_v53  ;;  %5714 = vmatmul.msk.bf16.vlgmr.msrb.gmra.mxu1 %vm199_vm1, %v6589_v53 }
 0x230   : > { %2152 = vst [vmem:[#allocation1] ss:$4 sm:$0xff] %v6012_v17  ;;  %v1239_v4 = vpop.f32.mrf.mxu3 }
 0x231   : > { %v1260_v55 = vpop.f32.mrf.mxu0  ;;  %v6641_v40 = vadd.f32 %v1239_v4, %v6527_v59 }
 0x232   : > { %v1821_v52 = vpop.permute.xlu1 %1820  ;;  %v1220_v20 = vpop.f32.mrf.mxu2  ;;  %v6644_v28 = vadd.f32 %v1260_v55, %v6529_v51 }
 0x233   : > { %v1823_v39 = vsel %vm203_vm0, %v1821_v52, 0 }
 0x234   : > { %1832 = vmatpush.bf16.msra.mxu3 %v1823_v39  ;;  %v1199_v8 = vpop.f32.mrf.mxu1 }
 0x237   : > { %v2153_v10 = vld.sshfl [vmem:[#allocation1] sm:$0xff pattern:$0x73625140]  ;;  %5717 = vmatmul.msk.bf16.vlgmr.msra.gmra.mxu0 %vm199_vm1, %v6589_v53  ;;  %5719 = vmatmul.msk.bf16.vlgmr.msra.gmra.mxu2 %vm199_vm1, %v6589_v53 }
 0x238   : > { %2155 = vrot.lane.b32.xlu0 %v2153_v10, %s5929_s19  ;;  %2173 = vst [vmem:[#allocation1] ss:$4 sm:$0xff] %v6017_v19  ;;  %v1241_v30 = vpop.f32.mrf.mxu3 }
 0x239   : > { %v1262_v52 = vpop.f32.mrf.mxu0 }
 0x23a   : > { %v1842_v12 = vpop.permute.xlu1 %1841  ;;  %v1905_v56 = vpop.permute.xlu2 %1904 }
 0x23b   : > { %v1844_v42 = vsel %vm203_vm0, %v1842_v12, 0  ;;  %v1907_v10 = vsel %vm203_vm0, %v1905_v56, 0 }
 0x23c   : > { %1853 = vmatpush.bf16.msrb.mxu0 %v1844_v42 }
 0x23f   : > { %v2174_v22 = vld.sshfl [vmem:[#allocation1] sm:$0xff pattern:$0x73625140]  ;;  %5716 = vmatmul.msk.bf16.vlgmr.msrb.gmra.mxu3 %vm199_vm1, %v6589_v53  ;;  %5718 = vmatmul.msk.bf16.vlgmr.msra.gmra.mxu1 %vm199_vm1, %v6589_v53 }
 0x240   : > { %2134 = vrot.lane.b32.xlu0 %v2132_v47, %s5929_s19  ;;  %2176 = vrot.lane.b32.xlu2 %v2174_v22, %s5929_s19  ;;  %2194 = vst [vmem:[#allocation1] ss:$4 sm:$0xff] %v6021_v21  ;;  %v6638_v47 = vadd.f32 %v1218_v60, %v6524_v62 }
 0x241   : > { %1916 = vmatpush.bf16.msrb.mxu3 %v1907_v10 }
 0x242   : > { %v1926_v60 = vpop.permute.xlu2 %1925 }
 0x243   : > { %v1928_v22 = vsel %vm203_vm0, %v1926_v60, 0 }
 0x244   : > { %1937 = vmatpush.bf16.msra.mxu0 %v1928_v22 }
 0x247   : > { %v2195_v26 = vld.sshfl [vmem:[#allocation1] sm:$0xff pattern:$0x73625140]  ;;  %5721 = vmatmul.msk.bf16.vlgmr.msrb.gmra.mxu0 %vm199_vm1, %v6589_v53 }
 0x248   : > { %2197 = vrot.lane.b32.xlu2 %v2195_v26, %s5929_s19  ;;  %2215 = vst [vmem:[#allocation1] ss:$4 sm:$0xff] %v6026_v23 }
 0x24a   : > { %v1884_v16 = vpop.permute.xlu0 %1883  ;;  %v1302_v8 = vpop.f32.mrf.mxu2 }
 0x24b   : > { %v1886_v39 = vsel %vm203_vm0, %v1884_v16, 0  ;;  %v6652_v59 = vadd.f32 %v1302_v8, %v6549_v58 }
 0x24c   : > { %v1281_v24 = vpop.f32.mrf.mxu1  ;;  %1895 = vmatpush.bf16.msrb.mxu2 %v1886_v39 }
 0x24d   : > { %v6649_v62 = vadd.f32 %v1281_v24, %v6546_v63 }
 0x24f   : > { %v2216_v51 = vld.sshfl [vmem:[#allocation1] sm:$0xff pattern:$0x73625140]  ;;  %5720 = vmatmul.msk.bf16.vlgmr.msra.gmra.mxu3 %vm199_vm1, %v6589_v53  ;;  %5723 = vmatmul.msk.bf16.vlgmr.msrb.gmra.mxu2 %vm199_vm1, %v6589_v53 }
 0x250   : > { %2236 = vst [vmem:[#allocation1] ss:$4 sm:$0xff] %v6032_v25 }
 0x252   : > { %v1863_v4 = vpop.permute.xlu0 %1862  ;;  %v1323_v12 = vpop.f32.mrf.mxu3 }
 0x253   : > { %v1865_v63 = vsel %vm203_vm0, %v1863_v4, 0  ;;  %v6662_v58 = vadd.f32 %v1323_v12, %v6552_v6  ;;  %v1304_v26 = vpop.f32.mrf.mxu2 }
 0x254   : > { %1874 = vmatpush.bf16.msrb.mxu1 %v1865_v63  ;;  %v1283_v42 = vpop.f32.mrf.mxu1  ;;  %v1344_v55 = vpop.f32.mrf.mxu0 }
 0x255   : > { %v6665_v20 = vadd.f32 %v1344_v55, %v6572_v31 }
 0x257   : > { %v2237_v30 = vld.sshfl [vmem:[#allocation1] sm:$0xff pattern:$0x73625140]  ;;  %5722 = vmatmul.msk.bf16.vlgmr.msrb.gmra.mxu1 %vm199_vm1, %v6589_v53  ;;  %5725 = vmatmul.msk.bf16.vlgmr.msra.gmra.mxu0 %vm199_vm1, %v6589_v53 }
 0x258   : > { %2239 = vrot.lane.b32.xlu1 %v2237_v30, %s5929_s19  ;;  %2257 = vst [vmem:[#allocation1] ss:$4 sm:$0xff] %v6037_v27 }
 0x25a   : > { %v1325_v6 = vpop.f32.mrf.mxu3 }
 0x25b   : > { %v1386_v16 = vpop.f32.mrf.mxu2 }
 0x25c   : > { %v1365_v56 = vpop.f32.mrf.mxu1  ;;  %v1346_v10 = vpop.f32.mrf.mxu0  ;;  %v6684_v22 = vadd.f32 %v1386_v16, %v6577_v61 }
 0x25d   : > { %v6679_v31 = vadd.f32 %v1365_v56, %v6575_v57  ;;  %v6693_v57 = vld [vmem:[%s8137_s1 + $0x18] sm:$0xf] }
 0x25f   : > { %v2258_v52 = vld.sshfl [vmem:[#allocation1] sm:$0xff pattern:$0x73625140]  ;;  %5724 = vmatmul.msk.bf16.vlgmr.msrb.gmra.mxu3 %vm199_vm1, %v6589_v53 }
 0x260   : > { %2218 = vrot.lane.b32.xlu1 %v2216_v51, %s5929_s19  ;;  %2260 = vrot.lane.b32.xlu0 %v2258_v52, %s5929_s19  ;;  %2278 = vst [vmem:[#allocation1] ss:$4 sm:$0xff] %v6464_v33 }
 0x263   : > { %v1388_v8 = vpop.f32.mrf.mxu2 }
 0x264   : > { %v1367_v39 = vpop.f32.mrf.mxu1  ;;  %v1440_v24 = vpop.f32.mrf.mxu0 }
 0x265   : > { %v6687_v51 = vadd.f32 %v1440_v24, %v6584_v2 }
 0x267   : > { %v2279_v60 = vld.sshfl [vmem:[#allocation1] sm:$0xff pattern:$0x73625140] }
 0x268   : > { %2281 = vrot.lane.b32.xlu0 %v2279_v60, %s5929_s19  ;;  %2316 = vst [vmem:[#allocation1] ss:$4 sm:$0xff] %v5972_v1 }
 0x26a   : > { %v1985_v4 = vpop.permute.xlu1 %1984 }
 0x26b   : > { %v1990_v12 = vsel %vm203_vm0, %v1985_v4, 0  ;;  %v1466_v1 = vpop.f32.mrf.mxu2 }
 0x26c   : > { %1999 = vmatpush.bf16.msra.mxu2 %v1990_v12  ;;  %v1453_v63 = vpop.f32.mrf.mxu1  ;;  %v1442_v42 = vpop.f32.mrf.mxu0  ;;  %v6714_v60 = vadd.f32 %v1466_v1, %v6614_v32 }
 0x26d   : > { %v6696_v55 = vadd.f32 %v1453_v63, %v6611_v38 }
 0x26f   : > { %v2317_v61 = vld.sshfl [vmem:[#allocation1] sm:$0xff pattern:$0x73625140]  ;;  %5728 = vmatmul.msk.bf16.vlgmr.msra.gmra.mxu2 %vm199_vm1, %v6693_v57 }
 0x270   : > { %2340 = vst [vmem:[#allocation1] ss:$4 sm:$0xff] %v5976_v3 }
 0x272   : > { %v1947_v2 = vpop.permute.xlu1 %1946  ;;  %v2009_v26 = vpop.permute.xlu0 %2008 }
 0x273   : > { %v1949_v30 = vsel %vm203_vm0, %v1947_v2, 0  ;;  %v2011_v6 = vsel %vm203_vm0, %v2009_v26, 0  ;;  %v2072_v56 = vpop.permute.xlu2 %2071  ;;  %v1407_v10 = vpop.f32.mrf.mxu3 }
 0x274   : > { %1958 = vmatpush.bf16.msra.mxu1 %v1949_v30  ;;  %2020 = vmatpush.bf16.msra.mxu3 %v2011_v6  ;;  %v2074_v38 = vsel %vm203_vm0, %v2072_v56, 0  ;;  %v6705_v16 = vadd.f32 %v1407_v10, %v6580_v48  ;;  %v1455_v52 = vpop.f32.mrf.mxu1  ;;  %v1492_v39 = vpop.f32.mrf.mxu0 }
 0x275   : > { %2083 = vmatpush.bf16.msrb.mxu2 %v2074_v38  ;;  %v1468_v24 = vpop.f32.mrf.mxu2  ;;  %v6718_v42 = vadd.f32 %v1492_v39, %v6630_v18 }
 0x277   : > { %v2341_v8 = vld.sshfl [vmem:[#allocation1] sm:$0xff pattern:$0x73625140]  ;;  %5726 = vmatmul.msk.bf16.vlgmr.msra.gmra.mxu1 %vm199_vm1, %v6589_v53  ;;  %5729 = vmatmul.msk.bf16.vlgmr.msra.gmra.mxu3 %vm199_vm1, %v6693_v57 }
 0x278   : > { %2343 = vrot.lane.b32.xlu2 %v2341_v8, %s5930_s24  ;;  %2361 = vst [vmem:[#allocation1] ss:$4 sm:$0xff] %v5980_v5 }
 0x27a   : > { %v2030_v48 = vpop.permute.xlu0 %2029 }
 0x27b   : > { %v2032_v4 = vsel %vm203_vm0, %v2030_v48, 0  ;;  %v2051_v12 = vpop.permute.xlu2 %2050  ;;  %v1409_v63 = vpop.f32.mrf.mxu3 }
 0x27c   : > { %2041 = vmatpush.bf16.msrb.mxu0 %v2032_v4  ;;  %v2053_v53 = vsel %vm203_vm0, %v2051_v12, 0  ;;  %v1505_v2 = vpop.f32.mrf.mxu1  ;;  %v1494_v26 = vpop.f32.mrf.mxu0 }
 0x27d   : > { %2062 = vmatpush.bf16.msrb.mxu1 %v2053_v53  ;;  %v1518_v30 = vpop.f32.mrf.mxu2  ;;  %v6729_v32 = vadd.f32 %v1505_v2, %v6638_v47 }
 0x27e   : > { %v6732_v18 = vadd.f32 %v1518_v30, %v6641_v40 }
 0x27f   : > { %v2362_v6 = vld.sshfl [vmem:[#allocation1] sm:$0xff pattern:$0x73625140]  ;;  %5730 = vmatmul.msk.bf16.vlgmr.msrb.gmra.mxu0 %vm199_vm1, %v6693_v57  ;;  %5732 = vmatmul.msk.bf16.vlgmr.msrb.gmra.mxu2 %vm199_vm1, %v6693_v57 }
 0x280   : > { %2364 = vrot.lane.b32.xlu1 %v2362_v6, %s5930_s24  ;;  %2382 = vst [vmem:[#allocation1] ss:$4 sm:$0xff] %v5985_v7  ;;  %2319 = vrot.lane.b32.xlu2 %v2317_v61, %s5930_s24 }
 0x283   : > { %v1479_v1 = vpop.f32.mrf.mxu3 }
 0x284   : > { %v6735_v56 = vadd.f32 %v1479_v1, %v6617_v54  ;;  %v1507_v10 = vpop.f32.mrf.mxu1  ;;  %v1544_v38 = vpop.f32.mrf.mxu0 }
 0x285   : > { %v1520_v52 = vpop.f32.mrf.mxu2  ;;  %v6742_v61 = vadd.f32 %v1544_v38, %v6649_v62 }
 0x287   : > { %v2383_v39 = vld.sshfl [vmem:[#allocation1] sm:$0xff pattern:$0x73625140]  ;;  %5731 = vmatmul.msk.bf16.vlgmr.msrb.gmra.mxu1 %vm199_vm1, %v6693_v57 }
 0x288   : > { %2385 = vrot.lane.b32.xlu1 %v2383_v39, %s5930_s24  ;;  %2403 = vst [vmem:[#allocation1] ss:$4 sm:$0xff] %v5991_v9 }
 0x28b   : > { %v1481_v47 = vpop.f32.mrf.mxu3 }
 0x28c   : > { %v1557_v40 = vpop.f32.mrf.mxu1  ;;  %v1546_v24 = vpop.f32.mrf.mxu0 }
 0x28d   : > { %v1570_v8 = vpop.f32.mrf.mxu2  ;;  %v6745_v48 = vadd.f32 %v1557_v40, %v6652_v59 }
 0x28e   : > { %v6757_v59 = vadd.f32 %v1570_v8, %v6662_v58 }
 0x28f   : > { %v2404_v54 = vld.sshfl [vmem:[#allocation1] sm:$0xff pattern:$0x73625140] }
 0x290   : > { %2424 = vst [vmem:[#allocation1] ss:$4 sm:$0xff] %v5996_v11 }
 0x292   : > { %v2093_v4 = vpop.permute.xlu1 %2092 }
 0x293   : > { %v2095_v12 = vsel %vm203_vm0, %v2093_v4, 0  ;;  %v1531_v63 = vpop.f32.mrf.mxu3 }
 0x294   : > { %2104 = vmatpush.bf16.msrb.mxu3 %v2095_v12  ;;  %v6750_v53 = vadd.f32 %v1531_v63, %v6644_v28  ;;  %v1559_v2 = vpop.f32.mrf.mxu1  ;;  %v1596_v62 = vpop.f32.mrf.mxu0 }
 0x295   : > { %v1572_v26 = vpop.f32.mrf.mxu2  ;;  %v6760_v6 = vadd.f32 %v1596_v62, %v6679_v31 }
 0x297   : > { %v2425_v30 = vld.sshfl [vmem:[#allocation1] sm:$0xff pattern:$0x73625140]  ;;  %5733 = vmatmul.msk.bf16.vlgmr.msrb.gmra.mxu3 %vm199_vm1, %v6693_v57 }
 0x298   : > { %2427 = vrot.lane.b32.xlu0 %v2425_v30, %s5930_s24  ;;  %2445 = vst [vmem:[#allocation1] ss:$4 sm:$0xff] %v6001_v13 }
 0x29a   : > { %v2114_v1 = vpop.permute.xlu1 %2113  ;;  %v2177_v28 = vpop.permute.xlu2 %2176 }
 0x29b   : > { %v2116_v10 = vsel %vm203_vm0, %v2114_v1, 0  ;;  %v2179_v38 = vsel %vm203_vm0, %v2177_v28, 0  ;;  %v1533_v52 = vpop.f32.mrf.mxu3 }
 0x29c   : > { %2125 = vmatpush.bf16.msra.mxu0 %v2116_v10  ;;  %2188 = vmatpush.bf16.msra.mxu3 %v2179_v38  ;;  %v1609_v39 = vpop.f32.mrf.mxu1  ;;  %v1598_v47 = vpop.f32.mrf.mxu0 }
 0x29d   : > { %v1625_v40 = vpop.f32.mrf.mxu2  ;;  %v6770_v31 = vadd.f32 %v1609_v39, %v6684_v22 }
 0x29e   : > { %v6781_v22 = vadd.f32 %v1625_v40, %v6705_v16 }
 0x29f   : > { %5734 = vmatmul.msk.bf16.vlgmr.msra.gmra.mxu0 %vm199_vm1, %v6693_v57  ;;  %v2446_v58 = vld.sshfl [vmem:[#allocation1] sm:$0xff pattern:$0x73625140] }
 0x2a0   : > { %2406 = vrot.lane.b32.xlu0 %v2404_v54, %s5930_s24  ;;  %2448 = vrot.lane.b32.xlu2 %v2446_v58, %s5930_s24  ;;  %2466 = vst [vmem:[#allocation1] ss:$4 sm:$0xff] %v6006_v15 }
 0x2a2   : > { %v2198_v24 = vpop.permute.xlu2 %2197 }
 0x2a3   : > { %v2200_v8 = vsel %vm203_vm0, %v2198_v24, 0  ;;  %v1583_v4 = vpop.f32.mrf.mxu3 }
 0x2a4   : > { %2209 = vmatpush.bf16.msrb.mxu0 %v2200_v8  ;;  %v6774_v12 = vadd.f32 %v1583_v4, %v6665_v20  ;;  %v1611_v63 = vpop.f32.mrf.mxu1  ;;  %v1687_v2 = vpop.f32.mrf.mxu0 }
 0x2a5   : > { %v1627_v62 = vpop.f32.mrf.mxu2  ;;  %v6785_v20 = vadd.f32 %v1687_v2, %v6696_v55 }
 0x2a7   : > { %5737 = vmatmul.msk.bf16.vlgmr.msra.gmra.mxu3 %vm199_vm1, %v6693_v57  ;;  %v2467_v54 = vld.sshfl [vmem:[#allocation1] sm:$0xff pattern:$0x73625140] }
 0x2a8   : > { %2469 = vrot.lane.b32.xlu2 %v2467_v54, %s5930_s24  ;;  %2487 = vst [vmem:[#allocation1] ss:$4 sm:$0xff] %v6012_v17 }
 0x2aa   : > { %v2156_v26 = vpop.permute.xlu0 %2155 }
 0x2ab   : > { %v2158_v30 = vsel %vm203_vm0, %v2156_v26, 0  ;;  %v1585_v1 = vpop.f32.mrf.mxu3 }
 0x2ac   : > { %2167 = vmatpush.bf16.msra.mxu2 %v2158_v30  ;;  %v1708_v28 = vpop.f32.mrf.mxu1  ;;  %v1689_v10 = vpop.f32.mrf.mxu0 }
 0x2ad   : > { %v1729_v38 = vpop.f32.mrf.mxu2  ;;  %v6792_v16 = vadd.f32 %v1708_v28, %v6714_v60 }
 0x2ae   : > { %v6802_v60 = vadd.f32 %v1729_v38, %v6735_v56 }
 0x2af   : > { %5736 = vmatmul.msk.bf16.vlgmr.msra.gmra.mxu2 %vm199_vm1, %v6693_v57  ;;  %5738 = vmatmul.msk.bf16.vlgmr.msrb.gmra.mxu0 %vm199_vm1, %v6693_v57  ;;  %v2488_v52 = vld.sshfl [vmem:[#allocation1] sm:$0xff pattern:$0x73625140] }
 0x2b0   : > { %2508 = vst [vmem:[#allocation1] ss:$4 sm:$0xff] %v6017_v19 }
 0x2b2   : > { %v2135_v39 = vpop.permute.xlu0 %2134 }
 0x2b3   : > { %v2137_v47 = vsel %vm203_vm0, %v2135_v39, 0  ;;  %v1666_v55 = vpop.f32.mrf.mxu3 }
 0x2b4   : > { %2146 = vmatpush.bf16.msra.mxu1 %v2137_v47  ;;  %v6797_v40 = vadd.f32 %v1666_v55, %v6687_v51  ;;  %v1710_v58 = vpop.f32.mrf.mxu1  ;;  %v1771_v24 = vpop.f32.mrf.mxu0 }
 0x2b5   : > { %v1731_v8 = vpop.f32.mrf.mxu2  ;;  %v6807_v2 = vadd.f32 %v1771_v24, %v6729_v32 }
 0x2b7   : > { %5735 = vmatmul.msk.bf16.vlgmr.msra.gmra.mxu1 %vm199_vm1, %v6693_v57  ;;  %v2509_v4 = vld.sshfl [vmem:[#allocation1] sm:$0xff pattern:$0x73625140] }
 0x2b8   : > { %2511 = vrot.lane.b32.xlu1 %v2509_v4, %s5930_s24  ;;  %2529 = vst [vmem:[#allocation1] ss:$4 sm:$0xff] %v6021_v21 }
 0x2bb   : > { %v1668_v63 = vpop.f32.mrf.mxu3 }
 0x2bc   : > { %v1792_v51 = vpop.f32.mrf.mxu1  ;;  %v1773_v62 = vpop.f32.mrf.mxu0 }
 0x2bd   : > { %v1813_v54 = vpop.f32.mrf.mxu2  ;;  %v6813_v56 = vadd.f32 %v1792_v51, %v6732_v18 }
 0x2be   : > { %v6819_v39 = vadd.f32 %v1813_v54, %v6750_v53 }
 0x2bf   : > { %v2530_v26 = vld.sshfl [vmem:[#allocation1] sm:$0xff pattern:$0x73625140] }
 0x2c0   : > { %2490 = vrot.lane.b32.xlu1 %v2488_v52, %s5930_s24  ;;  %2532 = vrot.lane.b32.xlu0 %v2530_v26, %s5930_s24  ;;  %2550 = vst [vmem:[#allocation1] ss:$4 sm:$0xff] %v6026_v23 }
 0x2c3   : > { %v1750_v30 = vpop.f32.mrf.mxu3 }
 0x2c4   : > { %v6816_v1 = vadd.f32 %v1750_v30, %v6718_v42  ;;  %v1794_v28 = vpop.f32.mrf.mxu1  ;;  %v1855_v32 = vpop.f32.mrf.mxu0 }
 0x2c5   : > { %v1815_v10 = vpop.f32.mrf.mxu2  ;;  %v6822_v52 = vadd.f32 %v1855_v32, %v6745_v48 }
 0x2c7   : > { %v2551_v38 = vld.sshfl [vmem:[#allocation1] sm:$0xff pattern:$0x73625140] }
 0x2c8   : > { %2553 = vrot.lane.b32.xlu0 %v2551_v38, %s5930_s24  ;;  %2571 = vst [vmem:[#allocation1] ss:$4 sm:$0xff] %v6032_v25 }
 0x2ca   : > { %v2240_v18 = vpop.permute.xlu1 %2239 }
 0x2cb   : > { %v2242_v47 = vsel %vm203_vm0, %v2240_v18, 0  ;;  %v1752_v55 = vpop.f32.mrf.mxu3 }
 0x2cc   : > { %2251 = vmatpush.bf16.msrb.mxu2 %v2242_v47  ;;  %v1857_v42 = vpop.f32.mrf.mxu0  ;;  %v6852_v47 = vld [vmem:[%s8137_s1 + $0x1c] sm:$0xf] }
 0x2cf   : > { %5740 = vmatmul.msk.bf16.vlgmr.msrb.gmra.mxu2 %vm199_vm1, %v6693_v57  ;;  %v2572_v58 = vld.sshfl [vmem:[#allocation1] sm:$0xff pattern:$0x73625140] }
 0x2d0   : > { %2592 = vst [vmem:[#allocation1] ss:$4 sm:$0xff] %v6037_v27 }
 0x2d2   : > { %v2219_v53 = vpop.permute.xlu1 %2218  ;;  %v2261_v24 = vpop.permute.xlu0 %2260 }
 0x2d3   : > { %v2221_v48 = vsel %vm203_vm0, %v2219_v53, 0  ;;  %v2263_v8 = vsel %vm203_vm0, %v2261_v24, 0  ;;  %v2344_v4 = vpop.permute.xlu2 %2343  ;;  %v1834_v63 = vpop.f32.mrf.mxu3 }
 0x2d4   : > { %2230 = vmatpush.bf16.msrb.mxu1 %v2221_v48  ;;  %2272 = vmatpush.bf16.msrb.mxu3 %v2263_v8  ;;  %v2346_v51 = vsel %vm203_vm0, %v2344_v4, 0  ;;  %v6834_v62 = vadd.f32 %v1834_v63, %v6742_v61  ;;  %v1876_v54 = vpop.f32.mrf.mxu1  ;;  %v1897_v26 = vpop.f32.mrf.mxu2 }
 0x2d5   : > { %2355 = vmatpush.bf16.msra.mxu2 %v2346_v51  ;;  %v6837_v30 = vadd.f32 %v1876_v54, %v6757_v59  ;;  %v1939_v28 = vpop.f32.mrf.mxu0  ;;  %v6844_v10 = vadd.f32 %v1897_v26, %v6774_v12 }
 0x2d6   : > { %v6856_v12 = vadd.f32 %v1939_v28, %v6770_v31 }
 0x2d7   : > { %5739 = vmatmul.msk.bf16.vlgmr.msrb.gmra.mxu1 %vm199_vm1, %v6693_v57  ;;  %5741 = vmatmul.msk.bf16.vlgmr.msrb.gmra.mxu3 %vm199_vm1, %v6693_v57  ;;  %v2593_v32 = vld.sshfl [vmem:[#allocation1] sm:$0xff pattern:$0x73625140] }
 0x2d8   : > { %2595 = vrot.lane.b32.xlu2 %v2593_v32, %s5930_s24  ;;  %2613 = vst [vmem:[#allocation1] ss:$4 sm:$0xff] %v6464_v33 }
 0x2da   : > { %v2282_v61 = vpop.permute.xlu0 %2281 }
 0x2db   : > { %v2284_v38 = vsel %vm203_vm0, %v2282_v61, 0  ;;  %v2320_v59 = vpop.permute.xlu2 %2319  ;;  %v1836_v18 = vpop.f32.mrf.mxu3 }
 0x2dc   : > { %2293 = vmatpush.bf16.msra.mxu0 %v2284_v38  ;;  %v2325_v55 = vsel %vm203_vm0, %v2320_v59, 0  ;;  %v1878_v42 = vpop.f32.mrf.mxu1  ;;  %v1899_v53 = vpop.f32.mrf.mxu2 }
 0x2dd   : > { %2334 = vmatpush.bf16.msra.mxu1 %v2325_v55  ;;  %v1941_v24 = vpop.f32.mrf.mxu0 }
 0x2df   : > { %5742 = vmatmul.msk.bf16.vlgmr.msra.gmra.mxu0 %vm199_vm1, %v6693_v57  ;;  %5745 = vmatmul.msk.bf16.vlgmr.msra.gmra.mxu2 %vm199_vm1, %v6852_v47  ;;  %v2614_v48 = vld.sshfl [vmem:[#allocation1] sm:$0xff pattern:$0x73625140] }
 0x2e0   : > { %2616 = vrot.lane.b32.xlu1 %v2614_v48, %s5930_s24  ;;  %2869 = vst [vmem:[#allocation1] ss:$4 sm:$0xff] %v5976_v3  ;;  %2574 = vrot.lane.b32.xlu2 %v2572_v58, %s5930_s24 }
 0x2e3   : > { %v1918_v8 = vpop.f32.mrf.mxu3 }
 0x2e4   : > { %v6866_v31 = vadd.f32 %v1918_v8, %v6760_v6 }
 0x2e7   : > { %5744 = vmatmul.msk.bf16.vlgmr.msra.gmra.mxu1 %vm199_vm1, %v6852_v47  ;;  %v2870_v4 = vld.sshfl [vmem:[#allocation1] sm:$0xff pattern:$0x73625140] }
 0x2e8   : > { %2872 = vrot.lane.b32.xlu0 %v2870_v4, %s5928_s18  ;;  %2893 = vst [vmem:[#allocation1] ss:$4 sm:$0xff] %v5980_v5 }
 0x2eb   : > { %v1920_v57 = vpop.f32.mrf.mxu3 }
 0x2ef   : > { %v2894_v63 = vld.sshfl [vmem:[#allocation1] sm:$0xff pattern:$0x73625140] }
 0x2f0   : > { %2914 = vst [vmem:[#allocation1] ss:$4 sm:$0xff] %v5985_v7  ;;  %2896 = vrot.lane.b32.xlu2 %v2894_v63, %s5928_s18 }
 0x2f2   : > { %v2365_v51 = vpop.permute.xlu1 %2364  ;;  %v2001_v58 = vpop.f32.mrf.mxu2 }
 0x2f3   : > { %v2367_v54 = vsel %vm203_vm0, %v2365_v51, 0  ;;  %v6876_v6 = vadd.f32 %v2001_v58, %v6797_v40 }
 0x2f4   : > { %2376 = vmatpush.bf16.msra.mxu3 %v2367_v54  ;;  %v1960_v26 = vpop.f32.mrf.mxu1 }
 0x2f5   : > { %v6879_v28 = vadd.f32 %v1960_v26, %v6781_v22 }
 0x2f7   : > { %5746 = vmatmul.msk.bf16.vlgmr.msra.gmra.mxu3 %vm199_vm1, %v6852_v47  ;;  %v2915_v32 = vld.sshfl [vmem:[#allocation1] sm:$0xff pattern:$0x73625140] }
 0x2f8   : > { %2935 = vst [vmem:[#allocation1] ss:$4 sm:$0xff] %v5991_v9 }
 0x2fa   : > { %v2386_v61 = vpop.permute.xlu1 %2385  ;;  %v2449_v38 = vpop.permute.xlu2 %2448 }
 0x2fb   : > { %v2388_v59 = vsel %vm203_vm0, %v2386_v61, 0  ;;  %v2451_v18 = vsel %vm203_vm0, %v2449_v38, 0  ;;  %v2022_v55 = vpop.f32.mrf.mxu3  ;;  %v2003_v40 = vpop.f32.mrf.mxu2 }
 0x2fc   : > { %2397 = vmatpush.bf16.msrb.mxu0 %v2388_v59  ;;  %2460 = vmatpush.bf16.msrb.mxu3 %v2451_v18  ;;  %v1962_v42 = vpop.f32.mrf.mxu1  ;;  %v6887_v22 = vadd.f32 %v2022_v55, %v6785_v20  ;;  %v2043_v53 = vpop.f32.mrf.mxu0 }
 0x2fd   : > { %v6890_v24 = vadd.f32 %v2043_v53, %v6792_v16 }
 0x2ff   : > { %5747 = vmatmul.msk.bf16.vlgmr.msrb.gmra.mxu0 %vm199_vm1, %v6852_v47  ;;  %v2936_v48 = vld.sshfl [vmem:[#allocation1] sm:$0xff pattern:$0x73625140] }
 0x300   : > { %2938 = vrot.lane.b32.xlu1 %v2936_v48, %s5928_s18  ;;  %2956 = vst [vmem:[#allocation1] ss:$4 sm:$0xff] %v5996_v11 }
 0x302   : > { %v2470_v8 = vpop.permute.xlu2 %2469 }
 0x303   : > { %v2472_v4 = vsel %vm203_vm0, %v2470_v8, 0  ;;  %v2024_v57 = vpop.f32.mrf.mxu3  ;;  %v2085_v63 = vpop.f32.mrf.mxu2 }
 0x304   : > { %2481 = vmatpush.bf16.msra.mxu0 %v2472_v4  ;;  %v2064_v20 = vpop.f32.mrf.mxu1  ;;  %v2045_v51 = vpop.f32.mrf.mxu0  ;;  %v6898_v58 = vadd.f32 %v2085_v63, %v6816_v1 }
 0x305   : > { %v6901_v16 = vadd.f32 %v2064_v20, %v6802_v60 }
 0x307   : > { %5750 = vmatmul.msk.bf16.vlgmr.msrb.gmra.mxu3 %vm199_vm1, %v6852_v47  ;;  %v2957_v54 = vld.sshfl [vmem:[#allocation1] sm:$0xff pattern:$0x73625140] }
 0x308   : > { %2917 = vrot.lane.b32.xlu1 %v2915_v32, %s5928_s18  ;;  %2959 = vrot.lane.b32.xlu0 %v2957_v54, %s5928_s18  ;;  %2977 = vst [vmem:[#allocation1] ss:$4 sm:$0xff] %v6001_v13 }
 0x30a   : > { %v2428_v26 = vpop.permute.xlu0 %2427 }
 0x30b   : > { %v2430_v61 = vsel %vm203_vm0, %v2428_v26, 0  ;;  %v2087_v38 = vpop.f32.mrf.mxu2 }
 0x30c   : > { %2439 = vmatpush.bf16.msrb.mxu2 %v2430_v61  ;;  %v2066_v1 = vpop.f32.mrf.mxu1 }
 0x30f   : > { %5749 = vmatmul.msk.bf16.vlgmr.msrb.gmra.mxu2 %vm199_vm1, %v6852_v47  ;;  %5751 = vmatmul.msk.bf16.vlgmr.msra.gmra.mxu0 %vm199_vm1, %v6852_v47  ;;  %v2978_v60 = vld.sshfl [vmem:[#allocation1] sm:$0xff pattern:$0x73625140] }
 0x310   : > { %2980 = vrot.lane.b32.xlu0 %v2978_v60, %s5928_s18  ;;  %2998 = vst [vmem:[#allocation1] ss:$4 sm:$0xff] %v6006_v15 }
 0x312   : > { %v2407_v32 = vpop.permute.xlu0 %2406 }
 0x313   : > { %v2409_v59 = vsel %vm203_vm0, %v2407_v32, 0 }
 0x314   : > { %2418 = vmatpush.bf16.msrb.mxu1 %v2409_v59 }
 0x317   : > { %5748 = vmatmul.msk.bf16.vlgmr.msrb.gmra.mxu1 %vm199_vm1, %v6852_v47  ;;  %v2999_v18 = vld.sshfl [vmem:[#allocation1] sm:$0xff pattern:$0x73625140] }
 0x318   : > { %3019 = vst [vmem:[#allocation1] ss:$4 sm:$0xff] %v6012_v17 }
 0x31a   : > { %v2106_v55 = vpop.f32.mrf.mxu3 }
 0x31b   : > { %v6920_v40 = vadd.f32 %v2106_v55, %v6807_v2 }
 0x31c   : > { %v2127_v42 = vpop.f32.mrf.mxu0 }
 0x31d   : > { %v6923_v53 = vadd.f32 %v2127_v42, %v6813_v56 }
 0x31f   : > { %v3020_v48 = vld.sshfl [vmem:[#allocation1] sm:$0xff pattern:$0x73625140] }
 0x320   : > { %3040 = vst [vmem:[#allocation1] ss:$4 sm:$0xff] %v6017_v19  ;;  %3022 = vrot.lane.b32.xlu2 %v3020_v48, %s5928_s18 }
 0x322   : > { %v2108_v8 = vpop.f32.mrf.mxu3 }
 0x324   : > { %v2129_v4 = vpop.f32.mrf.mxu0 }
 0x327   : > { %v3041_v57 = vld.sshfl [vmem:[#allocation1] sm:$0xff pattern:$0x73625140] }
 0x328   : > { %3043 = vrot.lane.b32.xlu1 %v3041_v57, %s5928_s18  ;;  %3061 = vst [vmem:[#allocation1] ss:$4 sm:$0xff] %v6021_v21  ;;  %3001 = vrot.lane.b32.xlu2 %v2999_v18, %s5928_s18 }
 0x32a   : > { %v2512_v2 = vpop.permute.xlu1 %2511  ;;  %v2190_v63 = vpop.f32.mrf.mxu3 }
 0x32b   : > { %v2514_v20 = vsel %vm203_vm0, %v2512_v2, 0  ;;  %v6932_v56 = vadd.f32 %v2190_v63, %v6822_v52 }
 0x32c   : > { %2523 = vmatpush.bf16.msra.mxu2 %v2514_v20  ;;  %v2211_v51 = vpop.f32.mrf.mxu0 }
 0x32d   : > { %v6935_v54 = vadd.f32 %v2211_v51, %v6837_v30  ;;  %v6977_v51 = vld [vmem:[%s8137_s1 + $0x20] sm:$0xf] }
 0x32f   : > { %5753 = vmatmul.msk.bf16.vlgmr.msra.gmra.mxu2 %vm199_vm1, %v6852_v47  ;;  %v3062_v26 = vld.sshfl [vmem:[#allocation1] sm:$0xff pattern:$0x73625140] }
 0x330   : > { %3064 = vrot.lane.b32.xlu1 %v3062_v26, %s5928_s18  ;;  %3082 = vst [vmem:[#allocation1] ss:$4 sm:$0xff] %v6026_v23  ;;  %v6980_v26 = vld [vmem:[%s5965_s17 + $0x20] sm:$0x3] }
 0x332   : > { %v2169_v61 = vpop.f32.mrf.mxu2  ;;  %v2491_v38 = vpop.permute.xlu1 %2490 }
 0x333   : > { %v6942_v1 = vadd.f32 %v2169_v61, %v6834_v62  ;;  %v2493_v52 = vsel %vm203_vm0, %v2491_v38, 0  ;;  %v2533_v60 = vpop.permute.xlu0 %2532  ;;  %v2596_v32 = vpop.permute.xlu2 %2595 }
 0x334   : > { %v2535_v30 = vsel %vm203_vm0, %v2533_v60, 0  ;;  %v2148_v59 = vpop.f32.mrf.mxu1  ;;  %2502 = vmatpush.bf16.msra.mxu1 %v2493_v52  ;;  %v2598_v18 = vsel %vm203_vm0, %v2596_v32, 0  ;;  %v2192_v55 = vpop.f32.mrf.mxu3 }
 0x335   : > { %v6948_v42 = vadd.f32 %v2148_v59, %v6819_v39  ;;  %2544 = vmatpush.bf16.msra.mxu3 %v2535_v30  ;;  %2607 = vmatpush.bf16.msrb.mxu2 %v2598_v18  ;;  %v2213_v48 = vpop.f32.mrf.mxu0 }
 0x337   : > { %5752 = vmatmul.msk.bf16.vlgmr.msra.gmra.mxu1 %vm199_vm1, %v6852_v47  ;;  %v3083_v62 = vld.sshfl [vmem:[#allocation1] sm:$0xff pattern:$0x73625140] }
 0x338   : > { %5754 = vmatmul.msk.bf16.vlgmr.msra.gmra.mxu3 %vm199_vm1, %v6852_v47  ;;  %3103 = vst [vmem:[#allocation1] ss:$4 sm:$0xff] %v6032_v25 }
 0x339   : > { %2687 = vmatpush.bf16.msra.mxu2 %v6160_v0 }
 0x33a   : > { %v2171_v8 = vpop.f32.mrf.mxu2 }
 0x33b   : > { %v2554_v4 = vpop.permute.xlu0 %2553  ;;  %v2575_v57 = vpop.permute.xlu2 %2574 }
 0x33c   : > { %v2556_v39 = vsel %vm203_vm0, %v2554_v4, 0  ;;  %v2577_v2 = vsel %vm203_vm0, %v2575_v57, 0  ;;  %v2150_v63 = vpop.f32.mrf.mxu1 }
 0x33d   : > { %2565 = vmatpush.bf16.msrb.mxu0 %v2556_v39  ;;  %2586 = vmatpush.bf16.msrb.mxu1 %v2577_v2 }
 0x33f   : > { %5757 = vmatmul.msk.bf16.vlgmr.msrb.gmra.mxu2 %vm199_vm1, %v6852_v47  ;;  %v3104_v20 = vld.sshfl [vmem:[#allocation1] sm:$0xff pattern:$0x73625140] }
 0x340   : > { %5755 = vmatmul.msk.bf16.vlgmr.msrb.gmra.mxu0 %vm199_vm1, %v6852_v47  ;;  %3106 = vrot.lane.b32.xlu0 %v3104_v20, %s5928_s18  ;;  %3124 = vst [vmem:[#allocation1] ss:$4 sm:$0xff] %v6037_v27 }
 0x341   : > { %2661 = vmatpush.bf16.msra.mxu0 %v6114_v14  ;;  %2674 = vmatpush.bf16.msra.mxu1 %v6141_v29 }
 0x342   : > { %2739 = vmatpush.bf16.msrb.mxu2 %v6194_v41 }
 0x345   : > { %2713 = vmatpush.bf16.msrb.mxu0 %v6168_v36 }
 0x347   : > { %5756 = vmatmul.msk.bf16.vlgmr.msrb.gmra.mxu1 %vm199_vm1, %v6852_v47  ;;  %v3125_v14 = vld.sshfl [vmem:[#allocation1] sm:$0xff pattern:$0x73625140] }
 0x348   : > { %3085 = vrot.lane.b32.xlu0 %v3083_v62, %s5928_s18  ;;  %3127 = vrot.lane.b32.xlu2 %v3125_v14, %s5928_s18  ;;  %3145 = vst [vmem:[#allocation1] ss:$4 sm:$0xff] %v6464_v33 }
 0x349   : > { %2726 = vmatpush.bf16.msrb.mxu1 %v6172_v37 }
 0x34f   : > { %5762 = vmatmul.msk.bf16.vlgmr.msra.gmra.mxu2 %vm199_vm1, %v6977_v51  ;;  %v3146_v61 = vld.sshfl [vmem:[#allocation1] sm:$0xff pattern:$0x73625140] }
 0x350   : > { %5760 = vmatmul.msk.bf16.vlgmr.msra.gmra.mxu0 %vm199_vm1, %v6977_v51  ;;  %3148 = vrot.lane.b32.xlu2 %v3146_v61, %s5928_s18  ;;  %3166 = vst [vmem:[#allocation1] ss:$4 sm:$0xff] %v6980_v26 }
 0x351   : > { %2765 = vmatpush.bf16.msra.mxu0 %v6207_v44  ;;  %2791 = vmatpush.bf16.msra.mxu2 %v6215_v46 }
 0x352   : > { %v2253_v38 = vpop.f32.mrf.mxu2  ;;  %v2617_v52 = vpop.permute.xlu1 %2616 }
 0x353   : > { %v6991_v60 = vadd.f32 %v2253_v38, %v6866_v31  ;;  %v2619_v32 = vsel %vm203_vm0, %v2617_v52, 0 }
 0x354   : > { %v2232_v30 = vpop.f32.mrf.mxu1  ;;  %2628 = vmatpush.bf16.msrb.mxu3 %v2619_v32 }
 0x355   : > { %v6995_v59 = vadd.f32 %v2232_v30, %v6844_v10 }
 0x357   : > { %5758 = vmatmul.msk.bf16.vlgmr.msrb.gmra.mxu3 %vm199_vm1, %v6852_v47  ;;  %5761 = vmatmul.msk.bf16.vlgmr.msra.gmra.mxu1 %vm199_vm1, %v6977_v51  ;;  %v3167_v18 = vld.sshfl [vmem:[#allocation1] sm:$0xff pattern:$0x73625140]  ;;  %v7013_v47 = vsel %vm203_vm0, %v6980_v26, 0 }
 0x358   : > { %2700 = vmatpush.bf16.msra.mxu3 %v6164_v35  ;;  %3204 = vst [vmem:[#allocation1] ss:$4 sm:$0xff] %v5976_v3  ;;  %2778 = vmatpush.bf16.msra.mxu1 %v6211_v45 }
 0x35a   : > { %v2255_v31 = vpop.f32.mrf.mxu2  ;;  %v2274_v55 = vpop.f32.mrf.mxu3 }
 0x35b   : > { %v7006_v10 = vadd.f32 %v2274_v55, %v6856_v12  ;;  %v2873_v52 = vpop.permute.xlu0 %2872 }
 0x35c   : > { %2752 = vmatpush.bf16.msrb.mxu3 %v6203_v43  ;;  %v2234_v48 = vpop.f32.mrf.mxu1  ;;  %v2295_v62 = vpop.f32.mrf.mxu0 }
 0x35d   : > { %v7009_v8 = vadd.f32 %v2295_v62, %v6879_v28 }
 0x35f   : > { %5766 = vmatmul.msk.bf16.vlgmr.msrb.gmra.mxu2 %vm199_vm1, %v6977_v51  ;;  %v3205_v4 = vld.sshfl [vmem:[#allocation1] sm:$0xff pattern:$0x73625140] }
 0x360   : > { %5764 = vmatmul.msk.bf16.vlgmr.msrb.gmra.mxu0 %vm199_vm1, %v6977_v51  ;;  %3207 = vrot.lane.b32.xlu1 %v3205_v4, %s5929_s19  ;;  %3228 = vst [vmem:[#allocation1] ss:$4 sm:$0xff] %v5980_v5 }
 0x361   : > { %2817 = vmatpush.bf16.msrb.mxu0 %v6239_v50  ;;  %2846 = vmatpush.bf16.msrb.mxu2 %v7013_v47 }
 0x362   : > { %v2357_v12 = vpop.f32.mrf.mxu2  ;;  %v2276_v28 = vpop.f32.mrf.mxu3 }
 0x363   : > { %v7024_v57 = vadd.f32 %v2357_v12, %v6887_v22 }
 0x364   : > { %v2336_v39 = vpop.f32.mrf.mxu1  ;;  %v2297_v2 = vpop.f32.mrf.mxu0 }
 0x365   : > { %v7027_v63 = vadd.f32 %v2336_v39, %v6876_v6  ;;  %v2897_v6 = vpop.permute.xlu2 %2896 }
 0x366   : > { %v2899_v61 = vsel %vm203_vm0, %v2897_v6, 0 }
 0x367   : > { %5763 = vmatmul.msk.bf16.vlgmr.msra.gmra.mxu3 %vm199_vm1, %v6977_v51  ;;  %5765 = vmatmul.msk.bf16.vlgmr.msrb.gmra.mxu1 %vm199_vm1, %v6977_v51  ;;  %v3229_v20 = vld.sshfl [vmem:[#allocation1] sm:$0xff pattern:$0x73625140] }
 0x368   : > { %3169 = vrot.lane.b32.xlu1 %v3167_v18, %s5928_s18  ;;  %3231 = vrot.lane.b32.xlu0 %v3229_v20, %s5929_s19  ;;  %3249 = vst [vmem:[#allocation1] ss:$4 sm:$0xff] %v5985_v7  ;;  %v2878_v18 = vsel %vm203_vm0, %v2873_v52, 0 }
 0x369   : > { %2804 = vmatpush.bf16.msra.mxu3 %v6235_v49  ;;  %2830 = vmatpush.bf16.msrb.mxu1 %v6538_v34 }
 0x36a   : > { %v2359_v22 = vpop.f32.mrf.mxu2 }
 0x36c   : > { %v2338_v14 = vpop.f32.mrf.mxu1 }
 0x36f   : > { %5770 = vmatmul.msk.bf16.vlgmr.msra.gmra.mxu2 %vm199_vm1, %v6977_v51  ;;  %v3250_v38 = vld.sshfl [vmem:[#allocation1] sm:$0xff pattern:$0x73625140] }
 0x370   : > { %5768 = vmatmul.msk.bf16.vlgmr.msra.gmra.mxu0 %vm199_vm1, %v6977_v51  ;;  %3252 = vrot.lane.b32.xlu0 %v3250_v38, %s5929_s19  ;;  %3270 = vst [vmem:[#allocation1] ss:$4 sm:$0xff] %v5991_v9 }
 0x371   : > { %2908 = vmatpush.bf16.msra.mxu0 %v2899_v61 }
 0x372   : > { %v2939_v32 = vpop.permute.xlu1 %2938 }
 0x373   : > { %v2941_v30 = vsel %vm203_vm0, %v2939_v32, 0 }
 0x374   : > { %2950 = vmatpush.bf16.msra.mxu2 %v2941_v30 }
 0x377   : > { %5767 = vmatmul.msk.bf16.vlgmr.msrb.gmra.mxu3 %vm199_vm1, %v6977_v51  ;;  %5769 = vmatmul.msk.bf16.vlgmr.msra.gmra.mxu1 %vm199_vm1, %v6977_v51  ;;  %v3271_v31 = vld.sshfl [vmem:[#allocation1] sm:$0xff pattern:$0x73625140] }
 0x378   : > { %3291 = vst [vmem:[#allocation1] ss:$4 sm:$0xff] %v5996_v11  ;;  %2887 = vmatpush.bf16.msrb.mxu3 %v2878_v18 }
 0x37a   : > { %v2378_v55 = vpop.f32.mrf.mxu3  ;;  %v2918_v48 = vpop.permute.xlu1 %2917 }
 0x37b   : > { %v7053_v62 = vadd.f32 %v2378_v55, %v6890_v24  ;;  %v2920_v4 = vsel %vm203_vm0, %v2918_v48, 0  ;;  %v2960_v12 = vpop.permute.xlu0 %2959  ;;  %v3023_v28 = vpop.permute.xlu2 %3022  ;;  %v7082_v48 = vld [vmem:[%s8137_s1 + $0x24] sm:$0xf] }
 0x37c   : > { %v2399_v39 = vpop.f32.mrf.mxu0  ;;  %2929 = vmatpush.bf16.msra.mxu1 %v2920_v4  ;;  %v3025_v20 = vsel %vm203_vm0, %v3023_v28, 0  ;;  %v2962_v38 = vsel %vm203_vm0, %v2960_v12, 0 }
 0x37d   : > { %v7057_v2 = vadd.f32 %v2399_v39, %v6901_v16 }
 0x37f   : > { %5774 = vmatmul.msk.bf16.vlgmr.msrb.gmra.mxu2 %vm199_vm1, %v6977_v51  ;;  %v3292_v22 = vld.sshfl [vmem:[#allocation1] sm:$0xff pattern:$0x73625140] }
 0x380   : > { %5772 = vmatmul.msk.bf16.vlgmr.msrb.gmra.mxu0 %vm199_vm1, %v6977_v51  ;;  %3294 = vrot.lane.b32.xlu2 %v3292_v22, %s5929_s19  ;;  %3312 = vst [vmem:[#allocation1] ss:$4 sm:$0xff] %v6001_v13 }
 0x381   : > { %3034 = vmatpush.bf16.msrb.mxu2 %v3025_v20 }
 0x382   : > { %v2380_v24 = vpop.f32.mrf.mxu3 }
 0x383   : > { %v2981_v6 = vpop.permute.xlu0 %2980  ;;  %v3002_v14 = vpop.permute.xlu2 %3001 }
 0x384   : > { %v2401_v61 = vpop.f32.mrf.mxu0  ;;  %v2983_v16 = vsel %vm203_vm0, %v2981_v6, 0  ;;  %v3004_v52 = vsel %vm203_vm0, %v3002_v14, 0 }
 0x385   : > { %2992 = vmatpush.bf16.msrb.mxu0 %v2983_v16 }
 0x387   : > { %5771 = vmatmul.msk.bf16.vlgmr.msra.gmra.mxu3 %vm199_vm1, %v6977_v51  ;;  %5773 = vmatmul.msk.bf16.vlgmr.msrb.gmra.mxu1 %vm199_vm1, %v6977_v51  ;;  %v3313_v32 = vld.sshfl [vmem:[#allocation1] sm:$0xff pattern:$0x73625140] }
 0x388   : > { %3315 = vrot.lane.b32.xlu1 %v3313_v32, %s5929_s19  ;;  %3333 = vst [vmem:[#allocation1] ss:$4 sm:$0xff] %v6006_v15  ;;  %3273 = vrot.lane.b32.xlu2 %v3271_v31, %s5929_s19 }
 0x389   : > { %2971 = vmatpush.bf16.msra.mxu3 %v2962_v38  ;;  %3013 = vmatpush.bf16.msrb.mxu1 %v3004_v52 }
 0x38a   : > { %v2462_v30 = vpop.f32.mrf.mxu3 }
 0x38b   : > { %v7077_v18 = vadd.f32 %v2462_v30, %v6923_v53 }
 0x38c   : > { %v2483_v55 = vpop.f32.mrf.mxu0 }
 0x38d   : > { %v7085_v51 = vadd.f32 %v2483_v55, %v6948_v42 }
 0x38f   : > { %5779 = vmatmul.msk.bf16.vlgmr.msra.gmra.mxu2 %vm199_vm1, %v7082_v48  ;;  %v3334_v4 = vld.sshfl [vmem:[#allocation1] sm:$0xff pattern:$0x73625140] }
 0x390   : > { %5777 = vmatmul.msk.bf16.vlgmr.msra.gmra.mxu0 %vm199_vm1, %v7082_v48  ;;  %3336 = vrot.lane.b32.xlu1 %v3334_v4, %s5929_s19  ;;  %3354 = vst [vmem:[#allocation1] ss:$4 sm:$0xff] %v6012_v17 }
 0x392   : > { %v2441_v53 = vpop.f32.mrf.mxu2  ;;  %v2464_v31 = vpop.f32.mrf.mxu3 }
 0x393   : > { %v7094_v12 = vadd.f32 %v2441_v53, %v6920_v40 }
 0x394   : > { %v2420_v28 = vpop.f32.mrf.mxu1  ;;  %v2485_v39 = vpop.f32.mrf.mxu0 }
 0x395   : > { %v7097_v42 = vadd.f32 %v2420_v28, %v6898_v58 }
 0x397   : > { %5776 = vmatmul.msk.bf16.vlgmr.msrb.gmra.mxu3 %vm199_vm1, %v7082_v48  ;;  %5778 = vmatmul.msk.bf16.vlgmr.msra.gmra.mxu1 %vm199_vm1, %v7082_v48  ;;  %v3355_v20 = vld.sshfl [vmem:[#allocation1] sm:$0xff pattern:$0x73625140] }
 0x398   : > { %3375 = vst [vmem:[#allocation1] ss:$4 sm:$0xff] %v6017_v19 }
 0x39a   : > { %v3044_v22 = vpop.permute.xlu1 %3043  ;;  %v2443_v24 = vpop.f32.mrf.mxu2 }
 0x39b   : > { %v3046_v6 = vsel %vm203_vm0, %v3044_v22, 0 }
 0x39c   : > { %v2422_v40 = vpop.f32.mrf.mxu1  ;;  %3055 = vmatpush.bf16.msrb.mxu3 %v3046_v6 }
 0x39f   : > { %5783 = vmatmul.msk.bf16.vlgmr.msrb.gmra.mxu2 %vm199_vm1, %v7082_v48  ;;  %v3376_v58 = vld.sshfl [vmem:[#allocation1] sm:$0xff pattern:$0x73625140] }
 0x3a0   : > { %5781 = vmatmul.msk.bf16.vlgmr.msrb.gmra.mxu0 %vm199_vm1, %v7082_v48  ;;  %3378 = vrot.lane.b32.xlu0 %v3376_v58, %s5929_s19  ;;  %3396 = vst [vmem:[#allocation1] ss:$4 sm:$0xff] %v6021_v21 }
 0x3a2   : > { %v3065_v14 = vpop.permute.xlu1 %3064  ;;  %v3128_v61 = vpop.permute.xlu2 %3127 }
 0x3a3   : > { %v3067_v16 = vsel %vm203_vm0, %v3065_v14, 0  ;;  %v3130_v38 = vsel %vm203_vm0, %v3128_v61, 0 }
 0x3a4   : > { %3076 = vmatpush.bf16.msra.mxu0 %v3067_v16 }
 0x3a7   : > { %5780 = vmatmul.msk.bf16.vlgmr.msra.gmra.mxu3 %vm199_vm1, %v7082_v48  ;;  %5782 = vmatmul.msk.bf16.vlgmr.msrb.gmra.mxu1 %vm199_vm1, %v7082_v48  ;;  %v3397_v52 = vld.sshfl [vmem:[#allocation1] sm:$0xff pattern:$0x73625140] }
 0x3a8   : > { %3357 = vrot.lane.b32.xlu0 %v3355_v20, %s5929_s19  ;;  %3399 = vrot.lane.b32.xlu2 %v3397_v52, %s5929_s19  ;;  %3417 = vst [vmem:[#allocation1] ss:$4 sm:$0xff] %v6026_v23 }
 0x3a9   : > { %3139 = vmatpush.bf16.msra.mxu3 %v3130_v38 }
 0x3aa   : > { %v3149_v32 = vpop.permute.xlu2 %3148 }
 0x3ab   : > { %v3151_v30 = vsel %vm203_vm0, %v3149_v32, 0 }
 0x3ac   : > { %3160 = vmatpush.bf16.msrb.mxu0 %v3151_v30 }
 0x3af   : > { %v3418_v55 = vld.sshfl [vmem:[#allocation1] sm:$0xff pattern:$0x73625140] }
 0x3b0   : > { %5785 = vmatmul.msk.bf16.vlgmr.msra.gmra.mxu0 %vm199_vm1, %v7082_v48  ;;  %3420 = vrot.lane.b32.xlu2 %v3418_v55, %s5929_s19  ;;  %3438 = vst [vmem:[#allocation1] ss:$4 sm:$0xff] %v6032_v25 }
 0x3b2   : > { %v2525_v4 = vpop.f32.mrf.mxu2  ;;  %v3107_v53 = vpop.permute.xlu0 %3106 }
 0x3b3   : > { %v7126_v31 = vadd.f32 %v2525_v4, %v6932_v56  ;;  %v3109_v28 = vsel %vm203_vm0, %v3107_v53, 0 }
 0x3b4   : > { %v2504_v39 = vpop.f32.mrf.mxu1  ;;  %3118 = vmatpush.bf16.msra.mxu2 %v3109_v28 }
 0x3b5   : > { %v7130_v20 = vadd.f32 %v2504_v39, %v6942_v1 }
 0x3b7   : > { %5784 = vmatmul.msk.bf16.vlgmr.msrb.gmra.mxu3 %vm199_vm1, %v7082_v48  ;;  %5787 = vmatmul.msk.bf16.vlgmr.msra.gmra.mxu2 %vm199_vm1, %v7082_v48  ;;  %v3439_v22 = vld.sshfl [vmem:[#allocation1] sm:$0xff pattern:$0x73625140] }
 0x3b8   : > { %3459 = vst [vmem:[#allocation1] ss:$4 sm:$0xff] %v6037_v27 }
 0x3ba   : > { %v2527_v24 = vpop.f32.mrf.mxu2  ;;  %v3086_v6 = vpop.permute.xlu0 %3085 }
 0x3bb   : > { %v2546_v56 = vpop.f32.mrf.mxu3  ;;  %v3088_v40 = vsel %vm203_vm0, %v3086_v6, 0 }
 0x3bc   : > { %v7139_v58 = vadd.f32 %v2546_v56, %v6935_v54  ;;  %v2506_v14 = vpop.f32.mrf.mxu1  ;;  %3097 = vmatpush.bf16.msra.mxu1 %v3088_v40  ;;  %v7173_v40 = vld [vmem:[%s8137_s1 + $0x28] sm:$0xf] }
 0x3bd   : > { %v2567_v1 = vpop.f32.mrf.mxu0 }
 0x3be   : > { %v7142_v61 = vadd.f32 %v2567_v1, %v6995_v59 }
 0x3bf   : > { %5786 = vmatmul.msk.bf16.vlgmr.msra.gmra.mxu1 %vm199_vm1, %v7082_v48  ;;  %v3460_v16 = vld.sshfl [vmem:[#allocation1] sm:$0xff pattern:$0x73625140] }
 0x3c0   : > { %5789 = vmatmul.msk.bf16.vlgmr.msrb.gmra.mxu0 %vm199_vm1, %v7082_v48  ;;  %3462 = vrot.lane.b32.xlu1 %v3460_v16, %s5929_s19  ;;  %3480 = vst [vmem:[#allocation1] ss:$4 sm:$0xff] %v6464_v33 }
 0x3c2   : > { %v2609_v38 = vpop.f32.mrf.mxu2 }
 0x3c3   : > { %v7151_v54 = vadd.f32 %v2609_v38, %v7006_v10  ;;  %v2548_v52 = vpop.f32.mrf.mxu3 }
 0x3c4   : > { %v2588_v32 = vpop.f32.mrf.mxu1 }
 0x3c5   : > { %v2569_v30 = vpop.f32.mrf.mxu0  ;;  %v7154_v59 = vadd.f32 %v2588_v32, %v6991_v60 }
 0x3c7   : > { %5788 = vmatmul.msk.bf16.vlgmr.msra.gmra.mxu3 %vm199_vm1, %v7082_v48  ;;  %v3481_v55 = vld.sshfl [vmem:[#allocation1] sm:$0xff pattern:$0x73625140] }
 0x3c8   : > { %3441 = vrot.lane.b32.xlu1 %v3439_v22, %s5929_s19  ;;  %3483 = vrot.lane.b32.xlu0 %v3481_v55, %s5929_s19  ;;  %3501 = vst [vmem:[#allocation1] ss:$4 sm:$0xff] %v6980_v26 }
 0x3ca   : > { %v2611_v4 = vpop.f32.mrf.mxu2 }
 0x3cc   : > { %v2590_v53 = vpop.f32.mrf.mxu1 }
 0x3cd   : > { %v2663_v10 = vpop.f32.mrf.mxu0 }
 0x3ce   : > { %v7162_v28 = vadd.f32 %v2663_v10, %v7027_v63 }
 0x3cf   : > { %v3502_v39 = vld.sshfl [vmem:[#allocation1] sm:$0xff pattern:$0x73625140] }
 0x3d0   : > { %3504 = vrot.lane.b32.xlu0 %v3502_v39, %s5929_s19  ;;  %3539 = vst [vmem:[#allocation1] ss:$4 sm:$0xff] %v5976_v3 }
 0x3d2   : > { %v2689_v60 = vpop.f32.mrf.mxu2  ;;  %v3208_v24 = vpop.permute.xlu1 %3207 }
 0x3d3   : > { %v7167_v6 = vadd.f32 %v2689_v60, %v7053_v62  ;;  %v3213_v22 = vsel %vm203_vm0, %v3208_v24, 0 }
 0x3d4   : > { %v2676_v56 = vpop.f32.mrf.mxu1  ;;  %3222 = vmatpush.bf16.msrb.mxu2 %v3213_v22 }
 0x3d5   : > { %v2665_v63 = vpop.f32.mrf.mxu0  ;;  %v7176_v14 = vadd.f32 %v2676_v56, %v7024_v57 }
 0x3d7   : > { %5792 = vmatmul.msk.bf16.vlgmr.msrb.gmra.mxu2 %vm199_vm1, %v7173_v40  ;;  %v3540_v3 = vld.sshfl [vmem:[#allocation1] sm:$0xff pattern:$0x73625140] }
 0x3d8   : > { %3563 = vst [vmem:[#allocation1] ss:$4 sm:$0xff] %v5980_v5 }
 0x3da   : > { %v2630_v62 = vpop.f32.mrf.mxu3  ;;  %v2691_v1 = vpop.f32.mrf.mxu2 }
 0x3db   : > { %v7182_v16 = vadd.f32 %v2630_v62, %v7009_v8  ;;  %v3170_v38 = vpop.permute.xlu1 %3169  ;;  %v3232_v52 = vpop.permute.xlu0 %3231 }
 0x3dc   : > { %v3172_v32 = vsel %vm203_vm0, %v3170_v38, 0  ;;  %v3234_v30 = vsel %vm203_vm0, %v3232_v52, 0  ;;  %v2678_v55 = vpop.f32.mrf.mxu1  ;;  %v3295_v57 = vpop.permute.xlu2 %3294 }
 0x3dd   : > { %v2715_v4 = vpop.f32.mrf.mxu0  ;;  %3181 = vmatpush.bf16.msrb.mxu1 %v3172_v32  ;;  %3243 = vmatpush.bf16.msrb.mxu3 %v3234_v30  ;;  %v3297_v53 = vsel %vm203_vm0, %v3295_v57, 0 }
 0x3de   : > { %v7188_v10 = vadd.f32 %v2715_v4, %v7097_v42  ;;  %3306 = vmatpush.bf16.msra.mxu2 %v3297_v53 }
 0x3df   : > { %v3564_v39 = vld.sshfl [vmem:[#allocation1] sm:$0xff pattern:$0x73625140] }
 0x3e0   : > { %5790 = vmatmul.msk.bf16.vlgmr.msrb.gmra.mxu1 %vm199_vm1, %v7082_v48  ;;  %5793 = vmatmul.msk.bf16.vlgmr.msrb.gmra.mxu3 %vm199_vm1, %v7173_v40  ;;  %3584 = vst [vmem:[#allocation1] ss:$4 sm:$0xff] %v5985_v7 }
 0x3e1   : > { %3566 = vrot.lane.b32.xlu2 %v3564_v39, %s5930_s24 }
 0x3e2   : > { %v2632_v8 = vpop.f32.mrf.mxu3  ;;  %v2741_v60 = vpop.f32.mrf.mxu2 }
 0x3e3   : > { %v7197_v24 = vadd.f32 %v2741_v60, %v7077_v18  ;;  %v3253_v22 = vpop.permute.xlu0 %3252 }
 0x3e4   : > { %v3255_v42 = vsel %vm203_vm0, %v3253_v22, 0  ;;  %v2728_v56 = vpop.f32.mrf.mxu1  ;;  %v3274_v63 = vpop.permute.xlu2 %3273 }
 0x3e5   : > { %v2717_v62 = vpop.f32.mrf.mxu0  ;;  %v7201_v48 = vadd.f32 %v2728_v56, %v7094_v12  ;;  %3264 = vmatpush.bf16.msra.mxu0 %v3255_v42  ;;  %v3276_v1 = vsel %vm203_vm0, %v3274_v63, 0 }
 0x3e6   : > { %3285 = vmatpush.bf16.msra.mxu1 %v3276_v1 }
 0x3e7   : > { %5796 = vmatmul.msk.bf16.vlgmr.msra.gmra.mxu2 %vm199_vm1, %v7173_v40  ;;  %v3585_v38 = vld.sshfl [vmem:[#allocation1] sm:$0xff pattern:$0x73625140] }
 0x3e8   : > { %5794 = vmatmul.msk.bf16.vlgmr.msra.gmra.mxu0 %vm199_vm1, %v7173_v40  ;;  %3587 = vrot.lane.b32.xlu1 %v3585_v38, %s5930_s24  ;;  %3605 = vst [vmem:[#allocation1] ss:$4 sm:$0xff] %v5991_v9 }
 0x3e9   : > { %3542 = vrot.lane.b32.xlu2 %v3540_v3, %s5930_s24 }
 0x3ea   : > { %v2702_v18 = vpop.f32.mrf.mxu3  ;;  %v2743_v12 = vpop.f32.mrf.mxu2 }
 0x3eb   : > { %v2855_v52 = vadd.f32 %v2702_v18, %v7057_v2 }
 0x3ec   : > { %v2730_v32 = vpop.f32.mrf.mxu1 }
 0x3ed   : > { %v2767_v30 = vpop.f32.mrf.mxu0 }
 0x3ee   : > { %v7213_v55 = vadd.f32 %v2767_v30, %v7130_v20 }
 0x3ef   : > { %v3606_v57 = vld.sshfl [vmem:[#allocation1] sm:$0xff pattern:$0x73625140] }
 0x3f0   : > { %5795 = vmatmul.msk.bf16.vlgmr.msra.gmra.mxu1 %vm199_vm1, %v7173_v40  ;;  %3608 = vrot.lane.b32.xlu1 %v3606_v57, %s5930_s24  ;;  %3626 = vst [vmem:[#allocation1] ss:$4 sm:$0xff] %v5996_v11 }
 0x3f2   : > { %v2704_v4 = vpop.f32.mrf.mxu3  ;;  %v2793_v53 = vpop.f32.mrf.mxu2 }
 0x3f3   : > { %v7220_v3 = vadd.f32 %v2793_v53, %v7139_v58 }
 0x3f4   : > { %v2780_v39 = vpop.f32.mrf.mxu1 }
 0x3f5   : > { %v2769_v2 = vpop.f32.mrf.mxu0  ;;  %v7223_v8 = vadd.f32 %v2780_v39, %v7126_v31 }
 0x3f7   : > { %v3627_v20 = vld.sshfl [vmem:[#allocation1] sm:$0xff pattern:$0x73625140] }
 0x3f8   : > { %3647 = vst [vmem:[#allocation1] ss:$4 sm:$0xff] %v6001_v13 }
 0x3fa   : > { %v2754_v60 = vpop.f32.mrf.mxu3  ;;  %v2795_v22 = vpop.f32.mrf.mxu2 }
 0x3fb   : > { %v7227_v42 = vadd.f32 %v2754_v60, %v7085_v51  ;;  %v3316_v56 = vpop.permute.xlu1 %3315 }
 0x3fc   : > { %v3318_v63 = vsel %vm203_vm0, %v3316_v56, 0  ;;  %v2782_v62 = vpop.f32.mrf.mxu1 }
 0x3fd   : > { %v2819_v1 = vpop.f32.mrf.mxu0  ;;  %3327 = vmatpush.bf16.msra.mxu3 %v3318_v63 }
 0x3fe   : > { %v7231_v58 = vadd.f32 %v2819_v1, %v7154_v59 }
 0x3ff   : > { %v3648_v38 = vld.sshfl [vmem:[#allocation1] sm:$0xff pattern:$0x73625140] }
 0x400   : > { %5797 = vmatmul.msk.bf16.vlgmr.msra.gmra.mxu3 %vm199_vm1, %v7173_v40  ;;  %3650 = vrot.lane.b32.xlu0 %v3648_v38, %s5930_s24  ;;  %3668 = vst [vmem:[#allocation1] ss:$4 sm:$0xff] %v6006_v15 }
 0x402   : > { %v2756_v31 = vpop.f32.mrf.mxu3  ;;  %v2848_v51 = vpop.f32.mrf.mxu2 }
 0x403   : > { %v7238_v18 = vadd.f32 %v2848_v51, %v7182_v16  ;;  %v3337_v12 = vpop.permute.xlu1 %3336  ;;  %v3400_v32 = vpop.permute.xlu2 %3399 }
 0x404   : > { %v3339_v30 = vsel %vm203_vm0, %v3337_v12, 0  ;;  %v2832_v57 = vpop.f32.mrf.mxu1  ;;  %v3402_v59 = vsel %vm203_vm0, %v3400_v32, 0 }
 0x405   : > { %v2821_v4 = vpop.f32.mrf.mxu0  ;;  %v7243_v53 = vadd.f32 %v2832_v57, %v7151_v54  ;;  %3348 = vmatpush.bf16.msrb.mxu0 %v3339_v30  ;;  %3411 = vmatpush.bf16.msrb.mxu3 %v3402_v59 }
 0x407   : > { %v3669_v39 = vld.sshfl [vmem:[#allocation1] sm:$0xff pattern:$0x73625140] }
 0x408   : > { %5798 = vmatmul.msk.bf16.vlgmr.msrb.gmra.mxu0 %vm199_vm1, %v7173_v40  ;;  %3629 = vrot.lane.b32.xlu0 %v3627_v20, %s5930_s24  ;;  %3689 = vst [vmem:[#allocation1] ss:$4 sm:$0xff] %v6012_v17 }
 0x409   : > { %3671 = vrot.lane.b32.xlu2 %v3669_v39, %s5930_s24 }
 0x40a   : > { %v2806_v16 = vpop.f32.mrf.mxu3  ;;  %v2850_v2 = vpop.f32.mrf.mxu2 }
 0x40b   : > { %v7251_v60 = vadd.f32 %v2806_v16, %v7142_v61  ;;  %v3421_v22 = vpop.permute.xlu2 %3420 }
 0x40c   : > { %v2834_v54 = vpop.f32.mrf.mxu1  ;;  %v3423_v56 = vsel %vm203_vm0, %v3421_v22, 0 }
 0x40d   : > { %v2910_v63 = vpop.f32.mrf.mxu0  ;;  %3432 = vmatpush.bf16.msra.mxu0 %v3423_v56 }
 0x40e   : > { %v7255_v62 = vadd.f32 %v2910_v63, %v7176_v14 }
 0x40f   : > { %v3690_v1 = vld.sshfl [vmem:[#allocation1] sm:$0xff pattern:$0x73625140] }
 0x410   : > { %5801 = vmatmul.msk.bf16.vlgmr.msrb.gmra.mxu3 %vm199_vm1, %v7173_v40  ;;  %3710 = vst [vmem:[#allocation1] ss:$4 sm:$0xff] %v6017_v19 }
 0x411   : > { %3692 = vrot.lane.b32.xlu2 %v3690_v1, %s5930_s24 }
 0x412   : > { %v2808_v20 = vpop.f32.mrf.mxu3  ;;  %v2952_v61 = vpop.f32.mrf.mxu2 }
 0x413   : > { %v7261_v38 = vadd.f32 %v2952_v61, %v2855_v52  ;;  %v3379_v31 = vpop.permute.xlu0 %3378 }
 0x414   : > { %v3381_v51 = vsel %vm203_vm0, %v3379_v31, 0  ;;  %v2931_v12 = vpop.f32.mrf.mxu1 }
 0x415   : > { %v2912_v32 = vpop.f32.mrf.mxu0  ;;  %v7265_v14 = vadd.f32 %v2931_v12, %v7167_v6  ;;  %3390 = vmatpush.bf16.msrb.mxu2 %v3381_v51 }
 0x417   : > { %v3711_v30 = vld.sshfl [vmem:[#allocation1] sm:$0xff pattern:$0x73625140] }
 0x418   : > { %5800 = vmatmul.msk.bf16.vlgmr.msrb.gmra.mxu2 %vm199_vm1, %v7173_v40  ;;  %5802 = vmatmul.msk.bf16.vlgmr.msra.gmra.mxu0 %vm199_vm1, %v7173_v40  ;;  %3731 = vst [vmem:[#allocation1] ss:$4 sm:$0xff] %v6021_v21 }
 0x41a   : > { %v2889_v52 = vpop.f32.mrf.mxu3  ;;  %v2954_v57 = vpop.f32.mrf.mxu2 }
 0x41b   : > { %v7273_v59 = vadd.f32 %v2889_v52, %v7162_v28  ;;  %v3358_v4 = vpop.permute.xlu0 %3357 }
 0x41c   : > { %v3360_v39 = vsel %vm203_vm0, %v3358_v4, 0  ;;  %v2933_v6 = vpop.f32.mrf.mxu1 }
 0x41d   : > { %v2994_v16 = vpop.f32.mrf.mxu0  ;;  %3369 = vmatpush.bf16.msrb.mxu1 %v3360_v39 }
 0x41e   : > { %v7277_v2 = vadd.f32 %v2994_v16, %v7201_v48 }
 0x41f   : > { %v3732_v22 = vld.sshfl [vmem:[#allocation1] sm:$0xff pattern:$0x73625140] }
 0x420   : > { %5799 = vmatmul.msk.bf16.vlgmr.msrb.gmra.mxu1 %vm199_vm1, %v7173_v40  ;;  %3734 = vrot.lane.b32.xlu1 %v3732_v22, %s5930_s24  ;;  %3752 = vst [vmem:[#allocation1] ss:$4 sm:$0xff] %v6026_v23 }
 0x422   : > { %v2891_v54 = vpop.f32.mrf.mxu3  ;;  %v3036_v28 = vpop.f32.mrf.mxu2 }
 0x423   : > { %v7284_v56 = vadd.f32 %v3036_v28, %v7227_v42 }
 0x424   : > { %v3015_v63 = vpop.f32.mrf.mxu1 }
 0x425   : > { %v2996_v1 = vpop.f32.mrf.mxu0  ;;  %v7287_v20 = vadd.f32 %v3015_v63, %v7197_v24 }
 0x427   : > { %v3753_v48 = vld.sshfl [vmem:[#allocation1] sm:$0xff pattern:$0x73625140] }
 0x428   : > { %3713 = vrot.lane.b32.xlu1 %v3711_v30, %s5930_s24  ;;  %3755 = vrot.lane.b32.xlu0 %v3753_v48, %s5930_s24  ;;  %3773 = vst [vmem:[#allocation1] ss:$4 sm:$0xff] %v6032_v25 }
 0x42a   : > { %v2973_v61 = vpop.f32.mrf.mxu3  ;;  %v3038_v31 = vpop.f32.mrf.mxu2 }
 0x42b   : > { %v7293_v51 = vadd.f32 %v2973_v61, %v7188_v10 }
 0x42c   : > { %v3017_v12 = vpop.f32.mrf.mxu1 }
 0x42d   : > { %v3078_v42 = vpop.f32.mrf.mxu0 }
 0x42e   : > { %v7296_v32 = vadd.f32 %v3078_v42, %v7223_v8 }
 0x42f   : > { %v3774_v52 = vld.sshfl [vmem:[#allocation1] sm:$0xff pattern:$0x73625140] }
 0x430   : > { %3776 = vrot.lane.b32.xlu0 %v3774_v52, %s5930_s24  ;;  %3794 = vst [vmem:[#allocation1] ss:$4 sm:$0xff] %v6037_v27 }
 0x432   : > { %v2975_v24 = vpop.f32.mrf.mxu3  ;;  %v3463_v30 = vpop.permute.xlu1 %3462 }
 0x433   : > { %v3465_v57 = vsel %vm203_vm0, %v3463_v30, 0 }
 0x434   : > { %3474 = vmatpush.bf16.msra.mxu2 %v3465_v57 }
 0x435   : > { %v3080_v4 = vpop.f32.mrf.mxu0 }
 0x437   : > { %5804 = vmatmul.msk.bf16.vlgmr.msra.gmra.mxu2 %vm199_vm1, %v7173_v40  ;;  %v3795_v10 = vld.sshfl [vmem:[#allocation1] sm:$0xff pattern:$0x73625140] }
 0x438   : > { %3815 = vst [vmem:[#allocation1] ss:$4 sm:$0xff] %v6464_v33 }
 0x43a   : > { %v3057_v39 = vpop.f32.mrf.mxu3  ;;  %v3120_v8 = vpop.f32.mrf.mxu2 }
 0x43b   : > { %v7305_v6 = vadd.f32 %v3057_v39, %v7213_v55  ;;  %v7308_v16 = vadd.f32 %v3120_v8, %v7251_v60  ;;  %v3442_v22 = vpop.permute.xlu1 %3441  ;;  %v3484_v54 = vpop.permute.xlu0 %3483 }
 0x43c   : > { %v3444_v28 = vsel %vm203_vm0, %v3442_v22, 0  ;;  %v3486_v63 = vsel %vm203_vm0, %v3484_v54, 0  ;;  %v3099_v1 = vpop.f32.mrf.mxu1  ;;  %v3567_v48 = vpop.permute.xlu2 %3566 }
 0x43d   : > { %v7313_v61 = vadd.f32 %v3099_v1, %v7220_v3  ;;  %v3162_v31 = vpop.f32.mrf.mxu0  ;;  %3453 = vmatpush.bf16.msra.mxu1 %v3444_v28  ;;  %3495 = vmatpush.bf16.msra.mxu3 %v3486_v63  ;;  %v3569_v55 = vsel %vm203_vm0, %v3567_v48, 0 }
 0x43e   : > { %v7317_v12 = vadd.f32 %v3162_v31, %v7243_v53  ;;  %3578 = vmatpush.bf16.msrb.mxu2 %v3569_v55  ;;  %v7329_v53 = vld [vmem:[%s8137_s1 + $0x2c] sm:$0xf] }
 0x43f   : > { %v3816_v60 = vld.sshfl [vmem:[#allocation1] sm:$0xff pattern:$0x73625140] }
 0x440   : > { %5803 = vmatmul.msk.bf16.vlgmr.msra.gmra.mxu1 %vm199_vm1, %v7173_v40  ;;  %5805 = vmatmul.msk.bf16.vlgmr.msra.gmra.mxu3 %vm199_vm1, %v7173_v40  ;;  %3836 = vst [vmem:[#allocation1] ss:$4 sm:$0xff] %v6980_v26 }
 0x441   : > { %3818 = vrot.lane.b32.xlu2 %v3816_v60, %s5930_s24 }
 0x442   : > { %v3059_v3 = vpop.f32.mrf.mxu3  ;;  %v3122_v42 = vpop.f32.mrf.mxu2 }
 0x443   : > { %v3505_v52 = vpop.permute.xlu0 %3504 }
 0x444   : > { %v3507_v24 = vsel %vm203_vm0, %v3505_v52, 0  ;;  %v3543_v30 = vpop.permute.xlu2 %3542  ;;  %v3101_v57 = vpop.f32.mrf.mxu1 }
 0x445   : > { %3516 = vmatpush.bf16.msrb.mxu0 %v3507_v24  ;;  %v3548_v4 = vsel %vm203_vm0, %v3543_v30, 0  ;;  %v3164_v39 = vpop.f32.mrf.mxu0 }
 0x446   : > { %3557 = vmatpush.bf16.msrb.mxu1 %v3548_v4 }
 0x447   : > { %5809 = vmatmul.msk.bf16.vlgmr.msrb.gmra.mxu2 %vm199_vm1, %v7329_v53  ;;  %v3837_v8 = vld.sshfl [vmem:[#allocation1] sm:$0xff pattern:$0x73625140] }
 0x448   : > { %5806 = vmatmul.msk.bf16.vlgmr.msrb.gmra.mxu0 %vm199_vm1, %v7173_v40  ;;  %3839 = vrot.lane.b32.xlu1 %v3837_v8, %s5930_s24  ;;  %4092 = vst [vmem:[#allocation1] ss:$4 sm:$0xff] %v5980_v5 }
 0x449   : > { %3797 = vrot.lane.b32.xlu2 %v3795_v10, %s5930_s24 }
 0x44a   : > { %v3141_v22 = vpop.f32.mrf.mxu3 }
 0x44b   : > { %v7340_v54 = vadd.f32 %v3141_v22, %v7231_v58 }
 0x44f   : > { %v4093_v28 = vld.sshfl [vmem:[#allocation1] sm:$0xff pattern:$0x73625140] }
 0x450   : > { %5808 = vmatmul.msk.bf16.vlgmr.msrb.gmra.mxu1 %vm199_vm1, %v7329_v53  ;;  %4095 = vrot.lane.b32.xlu0 %v4093_v28, %s5928_s18  ;;  %4116 = vst [vmem:[#allocation1] ss:$4 sm:$0xff] %v5985_v7 }
 0x452   : > { %v3143_v63 = vpop.f32.mrf.mxu3 }
 0x457   : > { %v4117_v40 = vld.sshfl [vmem:[#allocation1] sm:$0xff pattern:$0x73625140] }
 0x458   : > { %4137 = vst [vmem:[#allocation1] ss:$4 sm:$0xff] %v5991_v9  ;;  %4119 = vrot.lane.b32.xlu2 %v4117_v40, %s5928_s18 }
 0x45a   : > { %v3224_v1 = vpop.f32.mrf.mxu2  ;;  %v3588_v10 = vpop.permute.xlu1 %3587 }
 0x45b   : > { %v7349_v48 = vadd.f32 %v3224_v1, %v7273_v59  ;;  %v3590_v58 = vsel %vm203_vm0, %v3588_v10, 0 }
 0x45c   : > { %3599 = vmatpush.bf16.msrb.mxu3 %v3590_v58 }
 0x45d   : > { %v3183_v31 = vpop.f32.mrf.mxu1 }
 0x45e   : > { %v7353_v55 = vadd.f32 %v3183_v31, %v7238_v18 }
 0x45f   : > { %5810 = vmatmul.msk.bf16.vlgmr.msrb.gmra.mxu3 %vm199_vm1, %v7329_v53  ;;  %v4138_v60 = vld.sshfl [vmem:[#allocation1] sm:$0xff pattern:$0x73625140] }
 0x460   : > { %4158 = vst [vmem:[#allocation1] ss:$4 sm:$0xff] %v5996_v11 }
 0x462   : > { %v3226_v3 = vpop.f32.mrf.mxu2  ;;  %v3609_v42 = vpop.permute.xlu1 %3608 }
 0x463   : > { %v3245_v52 = vpop.f32.mrf.mxu3  ;;  %v3611_v24 = vsel %vm203_vm0, %v3609_v42, 0  ;;  %v3672_v59 = vpop.permute.xlu2 %3671 }
 0x464   : > { %v7360_v30 = vadd.f32 %v3245_v52, %v7255_v62  ;;  %3620 = vmatpush.bf16.msra.mxu0 %v3611_v24  ;;  %v3674_v57 = vsel %vm203_vm0, %v3672_v59, 0 }
 0x465   : > { %v3185_v18 = vpop.f32.mrf.mxu1  ;;  %v3266_v4 = vpop.f32.mrf.mxu0  ;;  %3683 = vmatpush.bf16.msra.mxu3 %v3674_v57 }
 0x466   : > { %v7364_v39 = vadd.f32 %v3266_v4, %v7265_v14 }
 0x467   : > { %5811 = vmatmul.msk.bf16.vlgmr.msra.gmra.mxu0 %vm199_vm1, %v7329_v53  ;;  %v4159_v8 = vld.sshfl [vmem:[#allocation1] sm:$0xff pattern:$0x73625140] }
 0x468   : > { %4161 = vrot.lane.b32.xlu1 %v4159_v8, %s5928_s18  ;;  %4179 = vst [vmem:[#allocation1] ss:$4 sm:$0xff] %v6001_v13 }
 0x46a   : > { %v3308_v22 = vpop.f32.mrf.mxu2 }
 0x46b   : > { %v7371_v62 = vadd.f32 %v3308_v22, %v7293_v51  ;;  %v3693_v28 = vpop.permute.xlu2 %3692  ;;  %v3247_v63 = vpop.f32.mrf.mxu3 }
 0x46c   : > { %v3695_v40 = vsel %vm203_vm0, %v3693_v28, 0 }
 0x46d   : > { %v3287_v1 = vpop.f32.mrf.mxu1  ;;  %3704 = vmatpush.bf16.msrb.mxu0 %v3695_v40  ;;  %v3268_v14 = vpop.f32.mrf.mxu0 }
 0x46e   : > { %v7375_v10 = vadd.f32 %v3287_v1, %v7261_v38 }
 0x46f   : > { %5814 = vmatmul.msk.bf16.vlgmr.msra.gmra.mxu3 %vm199_vm1, %v7329_v53  ;;  %v4180_v58 = vld.sshfl [vmem:[#allocation1] sm:$0xff pattern:$0x73625140] }
 0x470   : > { %4140 = vrot.lane.b32.xlu1 %v4138_v60, %s5928_s18  ;;  %4182 = vrot.lane.b32.xlu0 %v4180_v58, %s5928_s18  ;;  %4200 = vst [vmem:[#allocation1] ss:$4 sm:$0xff] %v6006_v15 }
 0x472   : > { %v3651_v51 = vpop.permute.xlu0 %3650  ;;  %v3310_v31 = vpop.f32.mrf.mxu2 }
 0x473   : > { %v3653_v3 = vsel %vm203_vm0, %v3651_v51, 0 }
 0x474   : > { %3662 = vmatpush.bf16.msra.mxu2 %v3653_v3 }
 0x475   : > { %v3289_v42 = vpop.f32.mrf.mxu1 }
 0x477   : > { %5813 = vmatmul.msk.bf16.vlgmr.msra.gmra.mxu2 %vm199_vm1, %v7329_v53  ;;  %5815 = vmatmul.msk.bf16.vlgmr.msrb.gmra.mxu0 %vm199_vm1, %v7329_v53  ;;  %v4201_v38 = vld.sshfl [vmem:[#allocation1] sm:$0xff pattern:$0x73625140] }
 0x478   : > { %4203 = vrot.lane.b32.xlu0 %v4201_v38, %s5928_s18  ;;  %4221 = vst [vmem:[#allocation1] ss:$4 sm:$0xff] %v6012_v17 }
 0x47a   : > { %v3630_v60 = vpop.permute.xlu0 %3629 }
 0x47b   : > { %v3632_v52 = vsel %vm203_vm0, %v3630_v60, 0 }
 0x47c   : > { %3641 = vmatpush.bf16.msra.mxu1 %v3632_v52 }
 0x47f   : > { %5812 = vmatmul.msk.bf16.vlgmr.msra.gmra.mxu1 %vm199_vm1, %v7329_v53  ;;  %v4222_v24 = vld.sshfl [vmem:[#allocation1] sm:$0xff pattern:$0x73625140] }
 0x480   : > { %4242 = vst [vmem:[#allocation1] ss:$4 sm:$0xff] %v6017_v19 }
 0x483   : > { %v3329_v59 = vpop.f32.mrf.mxu3 }
 0x484   : > { %v7394_v57 = vadd.f32 %v3329_v59, %v7277_v2 }
 0x485   : > { %v3350_v18 = vpop.f32.mrf.mxu0 }
 0x486   : > { %v7397_v4 = vadd.f32 %v3350_v18, %v7287_v20 }
 0x487   : > { %v4243_v8 = vld.sshfl [vmem:[#allocation1] sm:$0xff pattern:$0x73625140] }
 0x488   : > { %4263 = vst [vmem:[#allocation1] ss:$4 sm:$0xff] %v6021_v21  ;;  %4245 = vrot.lane.b32.xlu2 %v4243_v8, %s5928_s18 }
 0x48b   : > { %v3331_v22 = vpop.f32.mrf.mxu3 }
 0x48d   : > { %v3352_v28 = vpop.f32.mrf.mxu0 }
 0x48f   : > { %v4264_v63 = vld.sshfl [vmem:[#allocation1] sm:$0xff pattern:$0x73625140] }
 0x490   : > { %4266 = vrot.lane.b32.xlu1 %v4264_v63, %s5928_s18  ;;  %4284 = vst [vmem:[#allocation1] ss:$4 sm:$0xff] %v6026_v23  ;;  %4224 = vrot.lane.b32.xlu2 %v4222_v24, %s5928_s18 }
 0x492   : > { %v3735_v2 = vpop.permute.xlu1 %3734 }
 0x493   : > { %v3413_v40 = vpop.f32.mrf.mxu3  ;;  %v3737_v1 = vsel %vm203_vm0, %v3735_v2, 0 }
 0x494   : > { %v7406_v20 = vadd.f32 %v3413_v40, %v7296_v32  ;;  %3746 = vmatpush.bf16.msrb.mxu2 %v3737_v1 }
 0x495   : > { %v3434_v14 = vpop.f32.mrf.mxu0 }
 0x496   : > { %v7409_v58 = vadd.f32 %v3434_v14, %v7313_v61 }
 0x497   : > { %5817 = vmatmul.msk.bf16.vlgmr.msrb.gmra.mxu2 %vm199_vm1, %v7329_v53  ;;  %v4285_v51 = vld.sshfl [vmem:[#allocation1] sm:$0xff pattern:$0x73625140] }
 0x498   : > { %4287 = vrot.lane.b32.xlu1 %v4285_v51, %s5928_s18  ;;  %4305 = vst [vmem:[#allocation1] ss:$4 sm:$0xff] %v6032_v25 }
 0x49a   : > { %v3714_v31 = vpop.permute.xlu1 %3713  ;;  %v3756_v3 = vpop.permute.xlu0 %3755 }
 0x49b   : > { %v3392_v42 = vpop.f32.mrf.mxu2  ;;  %v3716_v38 = vsel %vm203_vm0, %v3714_v31, 0  ;;  %v3758_v32 = vsel %vm203_vm0, %v3756_v3, 0  ;;  %v3819_v60 = vpop.permute.xlu2 %3818 }
 0x49c   : > { %v7418_v52 = vadd.f32 %v3392_v42, %v7305_v6  ;;  %3725 = vmatpush.bf16.msrb.mxu1 %v3716_v38  ;;  %3767 = vmatpush.bf16.msrb.mxu3 %v3758_v32  ;;  %v3821_v61 = vsel %vm203_vm0, %v3819_v60, 0  ;;  %v3415_v24 = vpop.f32.mrf.mxu3 }
 0x49d   : > { %v3371_v59 = vpop.f32.mrf.mxu1  ;;  %3830 = vmatpush.bf16.msra.mxu2 %v3821_v61  ;;  %v3436_v18 = vpop.f32.mrf.mxu0 }
 0x49e   : > { %v7422_v8 = vadd.f32 %v3371_v59, %v7284_v56 }
 0x49f   : > { %5816 = vmatmul.msk.bf16.vlgmr.msrb.gmra.mxu1 %vm199_vm1, %v7329_v53  ;;  %5818 = vmatmul.msk.bf16.vlgmr.msrb.gmra.mxu3 %vm199_vm1, %v7329_v53  ;;  %v4306_v6 = vld.sshfl [vmem:[#allocation1] sm:$0xff pattern:$0x73625140] }
 0x4a0   : > { %4326 = vst [vmem:[#allocation1] ss:$4 sm:$0xff] %v6037_v27 }
 0x4a1   : > { %3910 = vmatpush.bf16.msrb.mxu2 %v6164_v35 }
 0x4a2   : > { %v3777_v22 = vpop.permute.xlu0 %3776 }
 0x4a3   : > { %v3779_v28 = vsel %vm203_vm0, %v3777_v22, 0  ;;  %v3798_v63 = vpop.permute.xlu2 %3797  ;;  %v3394_v2 = vpop.f32.mrf.mxu2 }
 0x4a4   : > { %3788 = vmatpush.bf16.msra.mxu0 %v3779_v28  ;;  %v3800_v56 = vsel %vm203_vm0, %v3798_v63, 0 }
 0x4a5   : > { %3809 = vmatpush.bf16.msra.mxu1 %v3800_v56  ;;  %v3373_v40 = vpop.f32.mrf.mxu1 }
 0x4a7   : > { %5819 = vmatmul.msk.bf16.vlgmr.msra.gmra.mxu0 %vm199_vm1, %v7329_v53  ;;  %5821 = vmatmul.msk.bf16.vlgmr.msra.gmra.mxu2 %vm199_vm1, %v7329_v53  ;;  %v4327_v35 = vld.sshfl [vmem:[#allocation1] sm:$0xff pattern:$0x73625140] }
 0x4a8   : > { %3884 = vmatpush.bf16.msrb.mxu0 %v6141_v29  ;;  %4329 = vrot.lane.b32.xlu0 %v4327_v35, %s5928_s18  ;;  %4347 = vst [vmem:[#allocation1] ss:$4 sm:$0xff] %v6464_v33 }
 0x4a9   : > { %3897 = vmatpush.bf16.msrb.mxu1 %v6160_v0  ;;  %3962 = vmatpush.bf16.msra.mxu2 %v6203_v43  ;;  %v7451_v0 = vld [vmem:[%s8137_s1 + $0x30] sm:$0xf] }
 0x4ac   : > { %3936 = vmatpush.bf16.msra.mxu0 %v6172_v37  ;;  %v7454_v37 = vld [vmem:[%s5965_s17 + $0x22] sm:$0x3] }
 0x4af   : > { %5820 = vmatmul.msk.bf16.vlgmr.msra.gmra.mxu1 %vm199_vm1, %v7329_v53  ;;  %v4348_v29 = vld.sshfl [vmem:[#allocation1] sm:$0xff pattern:$0x73625140] }
 0x4b0   : > { %4308 = vrot.lane.b32.xlu0 %v4306_v6, %s5928_s18  ;;  %4350 = vrot.lane.b32.xlu2 %v4348_v29, %s5928_s18  ;;  %4368 = vst [vmem:[#allocation1] ss:$4 sm:$0xff] %v6980_v26 }
 0x4b1   : > { %3949 = vmatpush.bf16.msra.mxu1 %v6194_v41 }
 0x4b7   : > { %5824 = vmatmul.msk.bf16.vlgmr.msrb.gmra.mxu0 %vm199_vm1, %v7451_v0  ;;  %5826 = vmatmul.msk.bf16.vlgmr.msrb.gmra.mxu2 %vm199_vm1, %v7451_v0  ;;  %v4369_v43 = vld.sshfl [vmem:[#allocation1] sm:$0xff pattern:$0x73625140] }
 0x4b8   : > { %4371 = vrot.lane.b32.xlu2 %v4369_v43, %s5928_s18  ;;  %4389 = vst [vmem:[#allocation1] ss:$4 sm:$0xff] %v7454_v37  ;;  %3988 = vmatpush.bf16.msrb.mxu0 %v6211_v45 }
 0x4b9   : > { %4014 = vmatpush.bf16.msrb.mxu2 %v6235_v49 }
 0x4ba   : > { %v3476_v41 = vpop.f32.mrf.mxu2  ;;  %v3840_v1 = vpop.permute.xlu1 %3839 }
 0x4bb   : > { %v7465_v14 = vadd.f32 %v3476_v41, %v7340_v54  ;;  %v3842_v51 = vsel %vm203_vm0, %v3840_v1, 0 }
 0x4bc   : > { %3851 = vmatpush.bf16.msra.mxu3 %v3842_v51 }
 0x4bd   : > { %v3455_v31 = vpop.f32.mrf.mxu1 }
 0x4be   : > { %v7470_v3 = vadd.f32 %v3455_v31, %v7308_v16 }
 0x4bf   : > { %5822 = vmatmul.msk.bf16.vlgmr.msra.gmra.mxu3 %vm199_vm1, %v7329_v53  ;;  %5825 = vmatmul.msk.bf16.vlgmr.msrb.gmra.mxu1 %vm199_vm1, %v7451_v0  ;;  %v4390_v45 = vld.sshfl [vmem:[#allocation1] sm:$0xff pattern:$0x73625140]  ;;  %v4060_v53 = vsel %vm203_vm0, %v7454_v37, 0 }
 0x4c0   : > { %3923 = vmatpush.bf16.msrb.mxu3 %v6168_v36  ;;  %4427 = vst [vmem:[#allocation1] ss:$4 sm:$0xff] %v5980_v5  ;;  %4001 = vmatpush.bf16.msrb.mxu1 %v6215_v46 }
 0x4c2   : > { %v3478_v49 = vpop.f32.mrf.mxu2 }
 0x4c3   : > { %v3497_v54 = vpop.f32.mrf.mxu3 }
 0x4c4   : > { %3975 = vmatpush.bf16.msra.mxu3 %v6207_v44  ;;  %v7480_v36 = vadd.f32 %v3497_v54, %v7317_v12 }
 0x4c5   : > { %v3457_v16 = vpop.f32.mrf.mxu1  ;;  %v3518_v42 = vpop.f32.mrf.mxu0 }
 0x4c6   : > { %v7483_v38 = vadd.f32 %v3518_v42, %v7353_v55 }
 0x4c7   : > { %5828 = vmatmul.msk.bf16.vlgmr.msra.gmra.mxu0 %vm199_vm1, %v7451_v0  ;;  %5830 = vmatmul.msk.bf16.vlgmr.msra.gmra.mxu2 %vm199_vm1, %v7451_v0  ;;  %v4428_v44 = vld.sshfl [vmem:[#allocation1] sm:$0xff pattern:$0x73625140] }
 0x4c8   : > { %4430 = vrot.lane.b32.xlu1 %v4428_v44, %s5929_s19  ;;  %4451 = vst [vmem:[#allocation1] ss:$4 sm:$0xff] %v5985_v7  ;;  %4040 = vmatpush.bf16.msra.mxu0 %v6538_v34 }
 0x4c9   : > { %4069 = vmatpush.bf16.msra.mxu2 %v4060_v53 }
 0x4ca   : > { %v3580_v46 = vpop.f32.mrf.mxu2 }
 0x4cb   : > { %v7495_v12 = vadd.f32 %v3580_v46, %v7360_v30  ;;  %v3499_v55 = vpop.f32.mrf.mxu3 }
 0x4cc   : > { %v7553_v55 = vld [vmem:[%s8137_s1 + $0x34] sm:$0xf] }
 0x4cd   : > { %v3559_v32 = vpop.f32.mrf.mxu1  ;;  %v3520_v60 = vpop.f32.mrf.mxu0 }
 0x4ce   : > { %v7498_v61 = vadd.f32 %v3559_v32, %v7349_v48  ;;  %v4120_v48 = vpop.permute.xlu2 %4119 }
 0x4cf   : > { %5827 = vmatmul.msk.bf16.vlgmr.msrb.gmra.mxu3 %vm199_vm1, %v7451_v0  ;;  %5829 = vmatmul.msk.bf16.vlgmr.msra.gmra.mxu1 %vm199_vm1, %v7451_v0  ;;  %v4452_v24 = vld.sshfl [vmem:[#allocation1] sm:$0xff pattern:$0x73625140]  ;;  %v4122_v30 = vsel %vm203_vm0, %v4120_v48, 0 }
 0x4d0   : > { %4392 = vrot.lane.b32.xlu1 %v4390_v45, %s5928_s18  ;;  %4454 = vrot.lane.b32.xlu0 %v4452_v24, %s5929_s19  ;;  %4472 = vst [vmem:[#allocation1] ss:$4 sm:$0xff] %v5991_v9 }
 0x4d1   : > { %4027 = vmatpush.bf16.msrb.mxu3 %v6239_v50  ;;  %4053 = vmatpush.bf16.msra.mxu1 %v7013_v47  ;;  %v4096_v50 = vpop.permute.xlu0 %4095 }
 0x4d2   : > { %v3582_v34 = vpop.f32.mrf.mxu2  ;;  %v4101_v22 = vsel %vm203_vm0, %v4096_v50, 0 }
 0x4d5   : > { %v3561_v59 = vpop.f32.mrf.mxu1 }
 0x4d7   : > { %5832 = vmatmul.msk.bf16.vlgmr.msrb.gmra.mxu0 %vm199_vm1, %v7451_v0  ;;  %5834 = vmatmul.msk.bf16.vlgmr.msrb.gmra.mxu2 %vm199_vm1, %v7451_v0  ;;  %v4473_v18 = vld.sshfl [vmem:[#allocation1] sm:$0xff pattern:$0x73625140] }
 0x4d8   : > { %4475 = vrot.lane.b32.xlu0 %v4473_v18, %s5929_s19  ;;  %4493 = vst [vmem:[#allocation1] ss:$4 sm:$0xff] %v5996_v11  ;;  %4131 = vmatpush.bf16.msrb.mxu0 %v4122_v30 }
 0x4da   : > { %v4162_v6 = vpop.permute.xlu1 %4161 }
 0x4db   : > { %v4164_v47 = vsel %vm203_vm0, %v4162_v6, 0 }
 0x4dc   : > { %4173 = vmatpush.bf16.msrb.mxu2 %v4164_v47 }
 0x4df   : > { %v4494_v28 = vld.sshfl [vmem:[#allocation1] sm:$0xff pattern:$0x73625140]  ;;  %5831 = vmatmul.msk.bf16.vlgmr.msra.gmra.mxu3 %vm199_vm1, %v7451_v0  ;;  %5833 = vmatmul.msk.bf16.vlgmr.msrb.gmra.mxu1 %vm199_vm1, %v7451_v0 }
 0x4e0   : > { %4514 = vst [vmem:[#allocation1] ss:$4 sm:$0xff] %v6001_v13  ;;  %4110 = vmatpush.bf16.msra.mxu3 %v4101_v22 }
 0x4e2   : > { %v3601_v63 = vpop.f32.mrf.mxu3  ;;  %v4141_v2 = vpop.permute.xlu1 %4140 }
 0x4e3   : > { %v7524_v56 = vadd.f32 %v3601_v63, %v7364_v39  ;;  %v4143_v40 = vsel %vm203_vm0, %v4141_v2, 0  ;;  %v4183_v35 = vpop.permute.xlu0 %4182  ;;  %v4246_v29 = vpop.permute.xlu2 %4245 }
 0x4e4   : > { %v3622_v43 = vpop.f32.mrf.mxu0  ;;  %4152 = vmatpush.bf16.msrb.mxu1 %v4143_v40  ;;  %v4248_v1 = vsel %vm203_vm0, %v4246_v29, 0  ;;  %v4185_v54 = vsel %vm203_vm0, %v4183_v35, 0 }
 0x4e5   : > { %v7528_v41 = vadd.f32 %v3622_v43, %v7375_v10 }
 0x4e7   : > { %5836 = vmatmul.msk.bf16.vlgmr.msra.gmra.mxu0 %vm199_vm1, %v7451_v0  ;;  %5838 = vmatmul.msk.bf16.vlgmr.msra.gmra.mxu2 %vm199_vm1, %v7451_v0  ;;  %v4515_v51 = vld.sshfl [vmem:[#allocation1] sm:$0xff pattern:$0x73625140] }
 0x4e8   : > { %4517 = vrot.lane.b32.xlu2 %v4515_v51, %s5929_s19  ;;  %4535 = vst [vmem:[#allocation1] ss:$4 sm:$0xff] %v6006_v15  ;;  %4257 = vmatpush.bf16.msra.mxu2 %v4248_v1 }
 0x4ea   : > { %v3603_v39 = vpop.f32.mrf.mxu3 }
 0x4eb   : > { %v4204_v31 = vpop.permute.xlu0 %4203  ;;  %v4225_v45 = vpop.permute.xlu2 %4224 }
 0x4ec   : > { %v3624_v49 = vpop.f32.mrf.mxu0  ;;  %v4206_v10 = vsel %vm203_vm0, %v4204_v31, 0  ;;  %v4227_v16 = vsel %vm203_vm0, %v4225_v45, 0 }
 0x4ed   : > { %4215 = vmatpush.bf16.msra.mxu0 %v4206_v10 }
 0x4ef   : > { %5835 = vmatmul.msk.bf16.vlgmr.msrb.gmra.mxu3 %vm199_vm1, %v7451_v0  ;;  %5837 = vmatmul.msk.bf16.vlgmr.msra.gmra.mxu1 %vm199_vm1, %v7451_v0  ;;  %v4536_v42 = vld.sshfl [vmem:[#allocation1] sm:$0xff pattern:$0x73625140] }
 0x4f0   : > { %4538 = vrot.lane.b32.xlu1 %v4536_v42, %s5929_s19  ;;  %4556 = vst [vmem:[#allocation1] ss:$4 sm:$0xff] %v6012_v17  ;;  %4496 = vrot.lane.b32.xlu2 %v4494_v28, %s5929_s19 }
 0x4f1   : > { %4194 = vmatpush.bf16.msrb.mxu3 %v4185_v54  ;;  %4236 = vmatpush.bf16.msra.mxu1 %v4227_v16 }
 0x4f2   : > { %v3685_v53 = vpop.f32.mrf.mxu3 }
 0x4f3   : > { %v7548_v44 = vadd.f32 %v3685_v53, %v7397_v4 }
 0x4f4   : > { %v3706_v46 = vpop.f32.mrf.mxu0 }
 0x4f5   : > { %v7556_v0 = vadd.f32 %v3706_v46, %v7422_v8 }
 0x4f7   : > { %5841 = vmatmul.msk.bf16.vlgmr.msrb.gmra.mxu0 %vm199_vm1, %v7553_v55  ;;  %5843 = vmatmul.msk.bf16.vlgmr.msrb.gmra.mxu2 %vm199_vm1, %v7553_v55  ;;  %v4557_v32 = vld.sshfl [vmem:[#allocation1] sm:$0xff pattern:$0x73625140] }
 0x4f8   : > { %4559 = vrot.lane.b32.xlu1 %v4557_v32, %s5929_s19  ;;  %4577 = vst [vmem:[#allocation1] ss:$4 sm:$0xff] %v6017_v19 }
 0x4fa   : > { %v3664_v4 = vpop.f32.mrf.mxu2  ;;  %v3687_v60 = vpop.f32.mrf.mxu3 }
 0x4fb   : > { %v7565_v24 = vadd.f32 %v3664_v4, %v7394_v57 }
 0x4fc   : > { %v3643_v34 = vpop.f32.mrf.mxu1  ;;  %v3708_v48 = vpop.f32.mrf.mxu0 }
 0x4fd   : > { %v7568_v8 = vadd.f32 %v3643_v34, %v7371_v62 }
 0x4ff   : > { %v4578_v30 = vld.sshfl [vmem:[#allocation1] sm:$0xff pattern:$0x73625140]  ;;  %5840 = vmatmul.msk.bf16.vlgmr.msra.gmra.mxu3 %vm199_vm1, %v7553_v55  ;;  %5842 = vmatmul.msk.bf16.vlgmr.msrb.gmra.mxu1 %vm199_vm1, %v7553_v55 }
 0x500   : > { %4598 = vst [vmem:[#allocation1] ss:$4 sm:$0xff] %v6021_v21 }
 0x502   : > { %v4267_v59 = vpop.permute.xlu1 %4266  ;;  %v3666_v18 = vpop.f32.mrf.mxu2 }
 0x503   : > { %v4269_v50 = vsel %vm203_vm0, %v4267_v59, 0 }
 0x504   : > { %v3645_v57 = vpop.f32.mrf.mxu1  ;;  %4278 = vmatpush.bf16.msra.mxu3 %v4269_v50 }
 0x507   : > { %5845 = vmatmul.msk.bf16.vlgmr.msra.gmra.mxu0 %vm199_vm1, %v7553_v55  ;;  %5847 = vmatmul.msk.bf16.vlgmr.msra.gmra.mxu2 %vm199_vm1, %v7553_v55  ;;  %v4599_v62 = vld.sshfl [vmem:[#allocation1] sm:$0xff pattern:$0x73625140] }
 0x508   : > { %4601 = vrot.lane.b32.xlu0 %v4599_v62, %s5929_s19  ;;  %4619 = vst [vmem:[#allocation1] ss:$4 sm:$0xff] %v6026_v23 }
 0x50a   : > { %v4288_v6 = vpop.permute.xlu1 %4287  ;;  %v4351_v47 = vpop.permute.xlu2 %4350 }
 0x50b   : > { %v4290_v22 = vsel %vm203_vm0, %v4288_v6, 0  ;;  %v4353_v28 = vsel %vm203_vm0, %v4351_v47, 0 }
 0x50c   : > { %4299 = vmatpush.bf16.msrb.mxu0 %v4290_v22 }
 0x50f   : > { %5844 = vmatmul.msk.bf16.vlgmr.msrb.gmra.mxu3 %vm199_vm1, %v7553_v55  ;;  %5846 = vmatmul.msk.bf16.vlgmr.msra.gmra.mxu1 %vm199_vm1, %v7553_v55  ;;  %v4620_v63 = vld.sshfl [vmem:[#allocation1] sm:$0xff pattern:$0x73625140] }
 0x510   : > { %4580 = vrot.lane.b32.xlu0 %v4578_v30, %s5929_s19  ;;  %4622 = vrot.lane.b32.xlu2 %v4620_v63, %s5929_s19  ;;  %4640 = vst [vmem:[#allocation1] ss:$4 sm:$0xff] %v6032_v25 }
 0x511   : > { %4362 = vmatpush.bf16.msrb.mxu3 %v4353_v28 }
 0x512   : > { %v4372_v2 = vpop.permute.xlu2 %4371 }
 0x513   : > { %v4374_v40 = vsel %vm203_vm0, %v4372_v2, 0 }
 0x514   : > { %4383 = vmatpush.bf16.msra.mxu0 %v4374_v40 }
 0x517   : > { %5849 = vmatmul.msk.bf16.vlgmr.msrb.gmra.mxu0 %vm199_vm1, %v7553_v55  ;;  %v4641_v35 = vld.sshfl [vmem:[#allocation1] sm:$0xff pattern:$0x73625140] }
 0x518   : > { %4643 = vrot.lane.b32.xlu2 %v4641_v35, %s5929_s19  ;;  %4661 = vst [vmem:[#allocation1] ss:$4 sm:$0xff] %v6037_v27 }
 0x51a   : > { %v3748_v29 = vpop.f32.mrf.mxu2  ;;  %v4330_v43 = vpop.permute.xlu0 %4329 }
 0x51b   : > { %v7597_v1 = vadd.f32 %v3748_v29, %v7406_v20  ;;  %v4332_v51 = vsel %vm203_vm0, %v4330_v43, 0 }
 0x51c   : > { %v3727_v39 = vpop.f32.mrf.mxu1  ;;  %4341 = vmatpush.bf16.msrb.mxu2 %v4332_v51 }
 0x51d   : > { %v7601_v31 = vadd.f32 %v3727_v39, %v7418_v52 }
 0x51f   : > { %5848 = vmatmul.msk.bf16.vlgmr.msra.gmra.mxu3 %vm199_vm1, %v7553_v55  ;;  %5851 = vmatmul.msk.bf16.vlgmr.msrb.gmra.mxu2 %vm199_vm1, %v7553_v55  ;;  %v4662_v45 = vld.sshfl [vmem:[#allocation1] sm:$0xff pattern:$0x73625140] }
 0x520   : > { %4682 = vst [vmem:[#allocation1] ss:$4 sm:$0xff] %v6464_v33 }
 0x522   : > { %v3750_v49 = vpop.f32.mrf.mxu2  ;;  %v3769_v10 = vpop.f32.mrf.mxu3 }
 0x523   : > { %v7609_v20 = vadd.f32 %v3769_v10, %v7409_v58  ;;  %v4309_v54 = vpop.permute.xlu0 %4308 }
 0x524   : > { %v4311_v16 = vsel %vm203_vm0, %v4309_v54, 0  ;;  %v3729_v42 = vpop.f32.mrf.mxu1  ;;  %v3790_v52 = vpop.f32.mrf.mxu0 }
 0x525   : > { %v7613_v53 = vadd.f32 %v3790_v52, %v7470_v3  ;;  %4320 = vmatpush.bf16.msrb.mxu1 %v4311_v16 }
 0x527   : > { %5853 = vmatmul.msk.bf16.vlgmr.msra.gmra.mxu0 %vm199_vm1, %v7553_v55  ;;  %v4683_v46 = vld.sshfl [vmem:[#allocation1] sm:$0xff pattern:$0x73625140] }
 0x528   : > { %5850 = vmatmul.msk.bf16.vlgmr.msrb.gmra.mxu1 %vm199_vm1, %v7553_v55  ;;  %4685 = vrot.lane.b32.xlu1 %v4683_v46, %s5929_s19  ;;  %4703 = vst [vmem:[#allocation1] ss:$4 sm:$0xff] %v6980_v26 }
 0x52a   : > { %v3832_v58 = vpop.f32.mrf.mxu2  ;;  %v3771_v32 = vpop.f32.mrf.mxu3 }
 0x52b   : > { %v7622_v4 = vadd.f32 %v3832_v58, %v7480_v36 }
 0x52c   : > { %v3792_v60 = vpop.f32.mrf.mxu0  ;;  %v3811_v3 = vpop.f32.mrf.mxu1 }
 0x52d   : > { %v7625_v34 = vadd.f32 %v3811_v3, %v7465_v14 }
 0x52f   : > { %5852 = vmatmul.msk.bf16.vlgmr.msrb.gmra.mxu3 %vm199_vm1, %v7553_v55  ;;  %v4704_v48 = vld.sshfl [vmem:[#allocation1] sm:$0xff pattern:$0x73625140] }
 0x530   : > { %4664 = vrot.lane.b32.xlu1 %v4662_v45, %s5929_s19  ;;  %4706 = vrot.lane.b32.xlu0 %v4704_v48, %s5929_s19  ;;  %4724 = vst [vmem:[#allocation1] ss:$4 sm:$0xff] %v7454_v37 }
 0x532   : > { %v3834_v30 = vpop.f32.mrf.mxu2 }
 0x534   : > { %v3813_v59 = vpop.f32.mrf.mxu1  ;;  %v3886_v18 = vpop.f32.mrf.mxu0 }
 0x535   : > { %v7633_v36 = vadd.f32 %v3886_v18, %v7498_v61  ;;  %v7644_v61 = vld [vmem:[%s8137_s1 + $0x38] sm:$0xf] }
 0x537   : > { %v4725_v50 = vld.sshfl [vmem:[#allocation1] sm:$0xff pattern:$0x73625140] }
 0x538   : > { %4727 = vrot.lane.b32.xlu0 %v4725_v50, %s5929_s19  ;;  %4762 = vst [vmem:[#allocation1] ss:$4 sm:$0xff] %v5980_v5 }
 0x53a   : > { %v3912_v14 = vpop.f32.mrf.mxu2  ;;  %v4431_v57 = vpop.permute.xlu1 %4430 }
 0x53b   : > { %v7638_v62 = vadd.f32 %v3912_v14, %v7524_v56  ;;  %v4436_v6 = vsel %vm203_vm0, %v4431_v57, 0 }
 0x53c   : > { %v3888_v47 = vpop.f32.mrf.mxu0  ;;  %v3899_v22 = vpop.f32.mrf.mxu1  ;;  %4445 = vmatpush.bf16.msra.mxu2 %v4436_v6 }
 0x53d   : > { %v7647_v28 = vadd.f32 %v3899_v22, %v7495_v12 }
 0x53f   : > { %v4763_v63 = vld.sshfl [vmem:[#allocation1] sm:$0xff pattern:$0x73625140]  ;;  %5856 = vmatmul.msk.bf16.vlgmr.msra.gmra.mxu2 %vm199_vm1, %v7644_v61 }
 0x540   : > { %4786 = vst [vmem:[#allocation1] ss:$4 sm:$0xff] %v5985_v7 }
 0x542   : > { %v3853_v5 = vpop.f32.mrf.mxu3  ;;  %v3914_v56 = vpop.f32.mrf.mxu2 }
 0x543   : > { %v7653_v2 = vadd.f32 %v3853_v5, %v7483_v38  ;;  %v4393_v40 = vpop.permute.xlu1 %4392  ;;  %v4455_v35 = vpop.permute.xlu0 %4454 }
 0x544   : > { %v4395_v29 = vsel %vm203_vm0, %v4393_v40, 0  ;;  %v4457_v43 = vsel %vm203_vm0, %v4455_v35, 0  ;;  %v3901_v51 = vpop.f32.mrf.mxu1  ;;  %v3938_v12 = vpop.f32.mrf.mxu0 }
 0x545   : > { %v7658_v39 = vadd.f32 %v3938_v12, %v7568_v8  ;;  %4404 = vmatpush.bf16.msra.mxu1 %v4395_v29  ;;  %4466 = vmatpush.bf16.msra.mxu3 %v4457_v43  ;;  %v4518_v45 = vpop.permute.xlu2 %4517 }
 0x546   : > { %v4520_v7 = vsel %vm203_vm0, %v4518_v45, 0 }
 0x547   : > { %4529 = vmatpush.bf16.msrb.mxu2 %v4520_v7  ;;  %v4787_v49 = vld.sshfl [vmem:[#allocation1] sm:$0xff pattern:$0x73625140] }
 0x548   : > { %5854 = vmatmul.msk.bf16.vlgmr.msra.gmra.mxu1 %vm199_vm1, %v7553_v55  ;;  %5857 = vmatmul.msk.bf16.vlgmr.msra.gmra.mxu3 %vm199_vm1, %v7644_v61  ;;  %4807 = vst [vmem:[#allocation1] ss:$4 sm:$0xff] %v5991_v9 }
 0x549   : > { %4789 = vrot.lane.b32.xlu2 %v4787_v49, %s5930_s24 }
 0x54a   : > { %v3855_v38 = vpop.f32.mrf.mxu3  ;;  %v3964_v8 = vpop.f32.mrf.mxu2 }
 0x54b   : > { %v7668_v10 = vadd.f32 %v3964_v8, %v7548_v44  ;;  %v4476_v54 = vpop.permute.xlu0 %4475 }
 0x54c   : > { %v4478_v16 = vsel %vm203_vm0, %v4476_v54, 0  ;;  %v3940_v42 = vpop.f32.mrf.mxu0  ;;  %v3951_v52 = vpop.f32.mrf.mxu1 }
 0x54d   : > { %v7672_v46 = vadd.f32 %v3951_v52, %v7565_v24  ;;  %4487 = vmatpush.bf16.msrb.mxu0 %v4478_v16  ;;  %v4497_v55 = vpop.permute.xlu2 %4496 }
 0x54e   : > { %v4499_v58 = vsel %vm203_vm0, %v4497_v55, 0 }
 0x54f   : > { %5860 = vmatmul.msk.bf16.vlgmr.msrb.gmra.mxu2 %vm199_vm1, %v7644_v61  ;;  %v4808_v9 = vld.sshfl [vmem:[#allocation1] sm:$0xff pattern:$0x73625140]  ;;  %4508 = vmatpush.bf16.msrb.mxu1 %v4499_v58 }
 0x550   : > { %5858 = vmatmul.msk.bf16.vlgmr.msrb.gmra.mxu0 %vm199_vm1, %v7644_v61  ;;  %4810 = vrot.lane.b32.xlu1 %v4808_v9, %s5930_s24  ;;  %4828 = vst [vmem:[#allocation1] ss:$4 sm:$0xff] %v5996_v11 }
 0x551   : > { %4765 = vrot.lane.b32.xlu2 %v4763_v63, %s5930_s24 }
 0x552   : > { %v3925_v44 = vpop.f32.mrf.mxu3  ;;  %v3966_v24 = vpop.f32.mrf.mxu2 }
 0x553   : > { %v4078_v32 = vadd.f32 %v3925_v44, %v7528_v41 }
 0x554   : > { %v3953_v60 = vpop.f32.mrf.mxu1  ;;  %v3990_v3 = vpop.f32.mrf.mxu0 }
 0x555   : > { %v7684_v48 = vadd.f32 %v3990_v3, %v7601_v31 }
 0x557   : > { %v4829_v30 = vld.sshfl [vmem:[#allocation1] sm:$0xff pattern:$0x73625140] }
 0x558   : > { %5859 = vmatmul.msk.bf16.vlgmr.msrb.gmra.mxu1 %vm199_vm1, %v7644_v61  ;;  %4831 = vrot.lane.b32.xlu1 %v4829_v30, %s5930_s24  ;;  %4849 = vst [vmem:[#allocation1] ss:$4 sm:$0xff] %v6001_v13 }
 0x55a   : > { %v3927_v11 = vpop.f32.mrf.mxu3  ;;  %v4016_v59 = vpop.f32.mrf.mxu2 }
 0x55b   : > { %v7691_v18 = vadd.f32 %v4016_v59, %v7609_v20 }
 0x55c   : > { %v3992_v50 = vpop.f32.mrf.mxu0  ;;  %v4003_v41 = vpop.f32.mrf.mxu1 }
 0x55d   : > { %v7694_v14 = vadd.f32 %v4003_v41, %v7597_v1 }
 0x55f   : > { %v4850_v31 = vld.sshfl [vmem:[#allocation1] sm:$0xff pattern:$0x73625140] }
 0x560   : > { %4870 = vst [vmem:[#allocation1] ss:$4 sm:$0xff] %v6006_v15 }
 0x562   : > { %v3977_v57 = vpop.f32.mrf.mxu3  ;;  %v4018_v6 = vpop.f32.mrf.mxu2 }
 0x563   : > { %v7698_v47 = vadd.f32 %v3977_v57, %v7556_v0  ;;  %v4539_v22 = vpop.permute.xlu1 %4538 }
 0x564   : > { %v4541_v13 = vsel %vm203_vm0, %v4539_v22, 0  ;;  %v4005_v63 = vpop.f32.mrf.mxu1  ;;  %v7701_v5 = vpop.f32.mrf.mxu0 }
 0x565   : > { %4550 = vmatpush.bf16.msrb.mxu3 %v4541_v13 }
 0x567   : > { %v4871_v20 = vld.sshfl [vmem:[#allocation1] sm:$0xff pattern:$0x73625140] }
 0x568   : > { %5861 = vmatmul.msk.bf16.vlgmr.msrb.gmra.mxu3 %vm199_vm1, %v7644_v61  ;;  %4873 = vrot.lane.b32.xlu0 %v4871_v20, %s5930_s24  ;;  %4891 = vst [vmem:[#allocation1] ss:$4 sm:$0xff] %v6012_v17 }
 0x56a   : > { %v3979_v15 = vpop.f32.mrf.mxu3  ;;  %v7707_v1 = vpop.f32.mrf.mxu2 }
 0x56b   : > { %v4560_v0 = vpop.permute.xlu1 %4559  ;;  %v4623_v56 = vpop.permute.xlu2 %4622 }
 0x56c   : > { %v4562_v40 = vsel %vm203_vm0, %v4560_v0, 0  ;;  %v4044_v35 = vpop.f32.mrf.mxu0  ;;  %v7710_v29 = vpop.f32.mrf.mxu1  ;;  %v4625_v43 = vsel %vm203_vm0, %v4623_v56, 0 }
 0x56d   : > { %4571 = vmatpush.bf16.msra.mxu0 %v4562_v40  ;;  %4634 = vmatpush.bf16.msra.mxu3 %v4625_v43  ;;  %v4088_v40 = vadd.f32 %v7710_v29, %v7622_v4 }
 0x56f   : > { %v4892_v51 = vld.sshfl [vmem:[#allocation1] sm:$0xff pattern:$0x73625140] }
 0x570   : > { %5862 = vmatmul.msk.bf16.vlgmr.msra.gmra.mxu0 %vm199_vm1, %v7644_v61  ;;  %4852 = vrot.lane.b32.xlu0 %v4850_v31, %s5930_s24  ;;  %4912 = vst [vmem:[#allocation1] ss:$4 sm:$0xff] %v6017_v19 }
 0x571   : > { %4894 = vrot.lane.b32.xlu2 %v4892_v51, %s5930_s24 }
 0x572   : > { %v4029_v17 = vpop.f32.mrf.mxu3  ;;  %v4073_v12 = vpop.f32.mrf.mxu2 }
 0x573   : > { %v7719_v45 = vadd.f32 %v4029_v17, %v7613_v53  ;;  %v4644_v7 = vpop.permute.xlu2 %4643 }
 0x574   : > { %v4057_v49 = vpop.f32.mrf.mxu1  ;;  %v4133_v38 = vpop.f32.mrf.mxu0  ;;  %v4646_v8 = vsel %vm203_vm0, %v4644_v7, 0 }
 0x575   : > { %v7723_v54 = vadd.f32 %v4133_v38, %v7647_v28  ;;  %4655 = vmatpush.bf16.msrb.mxu0 %v4646_v8 }
 0x577   : > { %v4913_v16 = vld.sshfl [vmem:[#allocation1] sm:$0xff pattern:$0x73625140] }
 0x578   : > { %5865 = vmatmul.msk.bf16.vlgmr.msra.gmra.mxu3 %vm199_vm1, %v7644_v61  ;;  %4933 = vst [vmem:[#allocation1] ss:$4 sm:$0xff] %v6021_v21 }
 0x579   : > { %4915 = vrot.lane.b32.xlu2 %v4913_v16, %s5930_s24 }
 0x57a   : > { %v4031_v19 = vpop.f32.mrf.mxu3  ;;  %v4175_v53 = vpop.f32.mrf.mxu2 }
 0x57b   : > { %v7729_v42 = vadd.f32 %v4175_v53, %v4078_v32  ;;  %v4602_v52 = vpop.permute.xlu0 %4601 }
 0x57c   : > { %v4604_v55 = vsel %vm203_vm0, %v4602_v52, 0  ;;  %v4135_v58 = vpop.f32.mrf.mxu0  ;;  %v4154_v9 = vpop.f32.mrf.mxu1 }
 0x57d   : > { %v7733_v28 = vadd.f32 %v4154_v9, %v7638_v62  ;;  %4613 = vmatpush.bf16.msra.mxu2 %v4604_v55  ;;  %v4087_v9 = vadd.f32 %v7701_v5, %v7625_v34  ;;  %v4089_v34 = vadd.f32 %v7707_v1, %v7653_v2 }
 0x57f   : > { %v4934_v44 = vld.sshfl [vmem:[#allocation1] sm:$0xff pattern:$0x73625140] }
 0x580   : > { %5864 = vmatmul.msk.bf16.vlgmr.msra.gmra.mxu2 %vm199_vm1, %v7644_v61  ;;  %5866 = vmatmul.msk.bf16.vlgmr.msrb.gmra.mxu0 %vm199_vm1, %v7644_v61  ;;  %4954 = vst [vmem:[#allocation1] ss:$4 sm:$0xff] %v6026_v23 }
 0x582   : > { %v7740_v21 = vpop.f32.mrf.mxu3  ;;  %v4177_v24 = vpop.f32.mrf.mxu2 }
 0x583   : > { %v4581_v32 = vpop.permute.xlu0 %4580 }
 0x584   : > { %v4583_v60 = vsel %vm203_vm0, %v4581_v32, 0  ;;  %v4156_v3 = vpop.f32.mrf.mxu1  ;;  %v4217_v30 = vpop.f32.mrf.mxu0 }
 0x585   : > { %v7744_v62 = vadd.f32 %v4217_v30, %v7672_v46  ;;  %4592 = vmatpush.bf16.msra.mxu1 %v4583_v60  ;;  %v4410_v60 = vadd.f32 %v7740_v21, %v7633_v36 }
 0x587   : > { %v4955_v11 = vld.sshfl [vmem:[#allocation1] sm:$0xff pattern:$0x73625140] }
 0x588   : > { %5863 = vmatmul.msk.bf16.vlgmr.msra.gmra.mxu1 %vm199_vm1, %v7644_v61  ;;  %4957 = vrot.lane.b32.xlu1 %v4955_v11, %s5930_s24  ;;  %4975 = vst [vmem:[#allocation1] ss:$4 sm:$0xff] %v6032_v25 }
 0x58a   : > { %v4114_v23 = vpop.f32.mrf.mxu3  ;;  %v4259_v59 = vpop.f32.mrf.mxu2 }
 0x58b   : > { %v7751_v50 = vadd.f32 %v4259_v59, %v7698_v47 }
 0x58c   : > { %v4219_v41 = vpop.f32.mrf.mxu0  ;;  %v4238_v31 = vpop.f32.mrf.mxu1 }
 0x58d   : > { %v7754_v57 = vadd.f32 %v4238_v31, %v7668_v10 }
 0x58f   : > { %v4976_v46 = vld.sshfl [vmem:[#allocation1] sm:$0xff pattern:$0x73625140] }
 0x590   : > { %4936 = vrot.lane.b32.xlu1 %v4934_v44, %s5930_s24  ;;  %4978 = vrot.lane.b32.xlu0 %v4976_v46, %s5930_s24  ;;  %4996 = vst [vmem:[#allocation1] ss:$4 sm:$0xff] %v6037_v27 }
 0x592   : > { %v4196_v6 = vpop.f32.mrf.mxu3  ;;  %v4261_v22 = vpop.f32.mrf.mxu2 }
 0x593   : > { %v7760_v25 = vadd.f32 %v4196_v6, %v7658_v39 }
 0x594   : > { %v4301_v13 = vpop.f32.mrf.mxu0  ;;  %v4240_v47 = vpop.f32.mrf.mxu1 }
 0x595   : > { %v7763_v63 = vadd.f32 %v4301_v13, %v7694_v14 }
 0x597   : > { %v4997_v20 = vld.sshfl [vmem:[#allocation1] sm:$0xff pattern:$0x73625140] }
 0x598   : > { %4999 = vrot.lane.b32.xlu0 %v4997_v20, %s5930_s24  ;;  %5017 = vst [vmem:[#allocation1] ss:$4 sm:$0xff] %v6464_v33 }
 0x59a   : > { %v4198_v10 = vpop.f32.mrf.mxu3  ;;  %v4686_v15 = vpop.permute.xlu1 %4685 }
 0x59b   : > { %v4688_v0 = vsel %vm203_vm0, %v4686_v15, 0 }
 0x59c   : > { %v4303_v27 = vpop.f32.mrf.mxu0  ;;  %4697 = vmatpush.bf16.msrb.mxu2 %v4688_v0 }
 0x59f   : > { %v5018_v56 = vld.sshfl [vmem:[#allocation1] sm:$0xff pattern:$0x73625140]  ;;  %5868 = vmatmul.msk.bf16.vlgmr.msrb.gmra.mxu2 %vm199_vm1, %v7644_v61 }
 0x5a0   : > { %5038 = vst [vmem:[#allocation1] ss:$4 sm:$0xff] %v6980_v26 }
 0x5a2   : > { %v4280_v39 = vpop.f32.mrf.mxu3  ;;  %v4343_v14 = vpop.f32.mrf.mxu2 }
 0x5a3   : > { %v7774_v35 = vadd.f32 %v4280_v39, %v7684_v48  ;;  %v7777_v33 = vadd.f32 %v4343_v14, %v7719_v45  ;;  %v4665_v43 = vpop.permute.xlu1 %4664  ;;  %v4707_v51 = vpop.permute.xlu0 %4706 }
 0x5a4   : > { %v4667_v17 = vsel %vm203_vm0, %v4665_v43, 0  ;;  %v4709_v12 = vsel %vm203_vm0, %v4707_v51, 0  ;;  %v4385_v7 = vpop.f32.mrf.mxu0  ;;  %v4790_v49 = vpop.permute.xlu2 %4789 }
 0x5a5   : > { %v4322_v26 = vpop.f32.mrf.mxu1  ;;  %v7781_v38 = vadd.f32 %v4385_v7, %v4088_v40  ;;  %4676 = vmatpush.bf16.msrb.mxu1 %v4667_v17  ;;  %4718 = vmatpush.bf16.msrb.mxu3 %v4709_v12  ;;  %v4792_v4 = vsel %vm203_vm0, %v4790_v49, 0 }
 0x5a6   : > { %v7785_v48 = vadd.f32 %v4322_v26, %v7691_v18  ;;  %4801 = vmatpush.bf16.msra.mxu2 %v4792_v4  ;;  %v7797_v18 = vld [vmem:[%s8137_s1 + $0x3c] sm:$0xf] }
 0x5a7   : > { %v5039_v29 = vld.sshfl [vmem:[#allocation1] sm:$0xff pattern:$0x73625140] }
 0x5a8   : > { %5867 = vmatmul.msk.bf16.vlgmr.msrb.gmra.mxu1 %vm199_vm1, %v7644_v61  ;;  %5869 = vmatmul.msk.bf16.vlgmr.msrb.gmra.mxu3 %vm199_vm1, %v7644_v61  ;;  %5059 = vst [vmem:[#allocation1] ss:$4 sm:$0xff] %v7454_v37 }
 0x5a9   : > { %5041 = vrot.lane.b32.xlu2 %v5039_v29, %s5930_s24 }
 0x5aa   : > { %v4282_v45 = vpop.f32.mrf.mxu3  ;;  %v4345_v8 = vpop.f32.mrf.mxu2 }
 0x5ab   : > { %v4728_v16 = vpop.permute.xlu0 %4727 }
 0x5ac   : > { %v4730_v19 = vsel %vm203_vm0, %v4728_v16, 0  ;;  %v4766_v53 = vpop.permute.xlu2 %4765  ;;  %v4387_v52 = vpop.f32.mrf.mxu0 }
 0x5ad   : > { %4739 = vmatpush.bf16.msra.mxu0 %v4730_v19  ;;  %v4771_v55 = vsel %vm203_vm0, %v4766_v53, 0  ;;  %v4324_v58 = vpop.f32.mrf.mxu1 }
 0x5ae   : > { %4780 = vmatpush.bf16.msra.mxu1 %v4771_v55 }
 0x5af   : > { %5873 = vmatmul.msk.bf16.vlgmr.msra.gmra.mxu2 %vm199_vm1, %v7797_v18  ;;  %v5060_v37 = vld.sshfl [vmem:[#allocation1] sm:$0xff pattern:$0x73625140] }
 0x5b0   : > { %5870 = vmatmul.msk.bf16.vlgmr.msra.gmra.mxu0 %vm199_vm1, %v7644_v61  ;;  %5062 = vrot.lane.b32.xlu1 %v5060_v37, %s5930_s24 }
 0x5b1   : > { %5020 = vrot.lane.b32.xlu2 %v5018_v56, %s5930_s24 }
 0x5b2   : > { %v4364_v44 = vpop.f32.mrf.mxu3 }
 0x5b3   : > { %v7808_v24 = vadd.f32 %v4364_v44, %v4087_v9 }
 0x5b8   : > { %5872 = vmatmul.msk.bf16.vlgmr.msra.gmra.mxu1 %vm199_vm1, %v7797_v18 }
 0x5ba   : > { %v4366_v32 = vpop.f32.mrf.mxu3 }
 0x5c2   : > { %v4447_v3 = vpop.f32.mrf.mxu2  ;;  %v4811_v30 = vpop.permute.xlu1 %4810 }
 0x5c3   : > { %v7814_v61 = vadd.f32 %v4447_v3, %v4410_v60  ;;  %v4813_v11 = vsel %vm203_vm0, %v4811_v30, 0 }
 0x5c4   : > { %4822 = vmatpush.bf16.msra.mxu3 %v4813_v11 }
 0x5c5   : > { %v4406_v5 = vpop.f32.mrf.mxu1 }
 0x5c6   : > { %v7819_v23 = vadd.f32 %v4406_v5, %v4089_v34 }
 0x5c7   : > { %5874 = vmatmul.msk.bf16.vlgmr.msra.gmra.mxu3 %vm199_vm1, %v7797_v18 }
 0x5ca   : > { %v4449_v59 = vpop.f32.mrf.mxu2  ;;  %v4832_v41 = vpop.permute.xlu1 %4831 }
 0x5cb   : > { %v4468_v31 = vpop.f32.mrf.mxu3  ;;  %v4834_v36 = vsel %vm203_vm0, %v4832_v41, 0  ;;  %v4895_v21 = vpop.permute.xlu2 %4894 }
 0x5cc   : > { %v7825_v46 = vadd.f32 %v4468_v31, %v7723_v54  ;;  %4843 = vmatpush.bf16.msrb.mxu0 %v4834_v36  ;;  %v4897_v6 = vsel %vm203_vm0, %v4895_v21, 0 }
 0x5cd   : > { %v4408_v2 = vpop.f32.mrf.mxu1  ;;  %v4489_v1 = vpop.f32.mrf.mxu0  ;;  %4906 = vmatpush.bf16.msrb.mxu3 %v4897_v6 }
 0x5ce   : > { %v7829_v22 = vadd.f32 %v4489_v1, %v7733_v28 }
 0x5cf   : > { %5875 = vmatmul.msk.bf16.vlgmr.msrb.gmra.mxu0 %vm199_vm1, %v7797_v18 }
 0x5d2   : > { %v4531_v13 = vpop.f32.mrf.mxu2 }
 0x5d3   : > { %v7834_v47 = vadd.f32 %v4531_v13, %v7760_v25  ;;  %v4916_v20 = vpop.permute.xlu2 %4915  ;;  %v4470_v10 = vpop.f32.mrf.mxu3 }
 0x5d4   : > { %v4918_v54 = vsel %vm203_vm0, %v4916_v20, 0 }
 0x5d5   : > { %v4510_v15 = vpop.f32.mrf.mxu1  ;;  %4927 = vmatpush.bf16.msra.mxu0 %v4918_v54  ;;  %v4491_v0 = vpop.f32.mrf.mxu0 }
 0x5d6   : > { %v7838_v27 = vadd.f32 %v4510_v15, %v7729_v42 }
 0x5d7   : > { %5878 = vmatmul.msk.bf16.vlgmr.msrb.gmra.mxu3 %vm199_vm1, %v7797_v18 }
 0x5da   : > { %v4874_v28 = vpop.permute.xlu0 %4873  ;;  %v4533_v56 = vpop.f32.mrf.mxu2 }
 0x5db   : > { %v4876_v39 = vsel %vm203_vm0, %v4874_v28, 0 }
 0x5dc   : > { %4885 = vmatpush.bf16.msrb.mxu2 %v4876_v39 }
 0x5dd   : > { %v4512_v25 = vpop.f32.mrf.mxu1 }
 0x5df   : > { %5877 = vmatmul.msk.bf16.vlgmr.msrb.gmra.mxu2 %vm199_vm1, %v7797_v18  ;;  %5879 = vmatmul.msk.bf16.vlgmr.msra.gmra.mxu0 %vm199_vm1, %v7797_v18 }
 0x5e2   : > { %v4853_v14 = vpop.permute.xlu0 %4852 }
 0x5e3   : > { %v4855_v40 = vsel %vm203_vm0, %v4853_v14, 0 }
 0x5e4   : > { %4864 = vmatpush.bf16.msrb.mxu1 %v4855_v40 }
 0x5e7   : > { %5876 = vmatmul.msk.bf16.vlgmr.msrb.gmra.mxu1 %vm199_vm1, %v7797_v18 }
 0x5eb   : > { %v4552_v42 = vpop.f32.mrf.mxu3 }
 0x5ec   : > { %v7851_v43 = vadd.f32 %v4552_v42, %v7744_v62 }
 0x5ed   : > { %v4573_v51 = vpop.f32.mrf.mxu0 }
 0x5ee   : > { %v7854_v17 = vadd.f32 %v4573_v51, %v7754_v57 }
 0x5f3   : > { %v4554_v12 = vpop.f32.mrf.mxu3 }
 0x5f5   : > { %v4575_v7 = vpop.f32.mrf.mxu0 }
 0x5fa   : > { %v4958_v49 = vpop.permute.xlu1 %4957 }
 0x5fb   : > { %v4636_v26 = vpop.f32.mrf.mxu3  ;;  %v4960_v4 = vsel %vm203_vm0, %v4958_v49, 0 }
 0x5fc   : > { %v7858_v29 = vadd.f32 %v4636_v26, %v7763_v63  ;;  %4969 = vmatpush.bf16.msra.mxu2 %v4960_v4 }
 0x5fd   : > { %v4657_v45 = vpop.f32.mrf.mxu0 }
 0x5fe   : > { %v7861_v8 = vadd.f32 %v4657_v45, %v7785_v48 }
 0x5ff   : > { %5881 = vmatmul.msk.bf16.vlgmr.msra.gmra.mxu2 %vm199_vm1, %v7797_v18 }
 0x602   : > { %v4937_v62 = vpop.permute.xlu1 %4936  ;;  %v4979_v57 = vpop.permute.xlu0 %4978 }
 0x603   : > { %v4615_v16 = vpop.f32.mrf.mxu2  ;;  %v4939_v19 = vsel %vm203_vm0, %v4937_v62, 0  ;;  %v4981_v53 = vsel %vm203_vm0, %v4979_v57, 0  ;;  %v5042_v52 = vpop.permute.xlu2 %5041 }
 0x604   : > { %v7868_v55 = vadd.f32 %v4615_v16, %v7774_v35  ;;  %4948 = vmatpush.bf16.msra.mxu1 %v4939_v19  ;;  %4990 = vmatpush.bf16.msra.mxu3 %v4981_v53  ;;  %v5044_v63 = vsel %vm203_vm0, %v5042_v52, 0  ;;  %v4638_v48 = vpop.f32.mrf.mxu3 }
 0x605   : > { %v4594_v58 = vpop.f32.mrf.mxu1  ;;  %5053 = vmatpush.bf16.msrb.mxu2 %v5044_v63  ;;  %v4659_v37 = vpop.f32.mrf.mxu0 }
 0x606   : > { %v7872_v9 = vadd.f32 %v4594_v58, %v7751_v50 }
 0x607   : > { %5880 = vmatmul.msk.bf16.vlgmr.msra.gmra.mxu1 %vm199_vm1, %v7797_v18  ;;  %5882 = vmatmul.msk.bf16.vlgmr.msra.gmra.mxu3 %vm199_vm1, %v7797_v18 }
 0x60a   : > { %v5000_v44 = vpop.permute.xlu0 %4999 }
 0x60b   : > { %v5002_v35 = vsel %vm203_vm0, %v5000_v44, 0  ;;  %v5021_v32 = vpop.permute.xlu2 %5020  ;;  %v4617_v60 = vpop.f32.mrf.mxu2 }
 0x60c   : > { %5011 = vmatpush.bf16.msrb.mxu0 %v5002_v35  ;;  %v5023_v3 = vsel %vm203_vm0, %v5021_v32, 0 }
 0x60d   : > { %5032 = vmatpush.bf16.msrb.mxu1 %v5023_v3  ;;  %v4596_v30 = vpop.f32.mrf.mxu1 }
 0x60f   : > { %5883 = vmatmul.msk.bf16.vlgmr.msrb.gmra.mxu0 %vm199_vm1, %v7797_v18  ;;  %5885 = vmatmul.msk.bf16.vlgmr.msrb.gmra.mxu2 %vm199_vm1, %v7797_v18 }
 0x617   : > { %5884 = vmatmul.msk.bf16.vlgmr.msrb.gmra.mxu1 %vm199_vm1, %v7797_v18 }
 0x622   : > { %v4699_v50 = vpop.f32.mrf.mxu2  ;;  %v5063_v11 = vpop.permute.xlu1 %5062 }
 0x623   : > { %v7887_v34 = vadd.f32 %v4699_v50, %v7808_v24  ;;  %v5065_v5 = vsel %vm203_vm0, %v5063_v11, 0 }
 0x624   : > { %5074 = vmatpush.bf16.msrb.mxu3 %v5065_v5 }
 0x625   : > { %v4678_v59 = vpop.f32.mrf.mxu1 }
 0x626   : > { %v7891_v41 = vadd.f32 %v4678_v59, %v7777_v33 }
 0x627   : > { %5886 = vmatmul.msk.bf16.vlgmr.msrb.gmra.mxu3 %vm199_vm1, %v7797_v18 }
 0x62a   : > { %v4701_v31 = vpop.f32.mrf.mxu2 }
 0x62b   : > { %v4720_v36 = vpop.f32.mrf.mxu3 }
 0x62c   : > { %v7896_v21 = vadd.f32 %v4720_v36, %v7781_v38 }
 0x62d   : > { %v4680_v6 = vpop.f32.mrf.mxu1  ;;  %v4741_v2 = vpop.f32.mrf.mxu0 }
 0x62e   : > { %v7899_v24 = vadd.f32 %v4741_v2, %v7819_v23 }
 0x632   : > { %v4803_v1 = vpop.f32.mrf.mxu2 }
 0x633   : > { %v7902_v13 = vadd.f32 %v4803_v1, %v7825_v46  ;;  %v4722_v33 = vpop.f32.mrf.mxu3 }
 0x635   : > { %v4782_v20 = vpop.f32.mrf.mxu1  ;;  %v5099_v18 = vsel %vm5095_vm2, %v7902_v13, 0.0  ;;  %v4743_v10 = vpop.f32.mrf.mxu0 }
 0x636   : > { %v7907_v54 = vadd.f32 %v4782_v20, %v7814_v61  ;;  %5100 = vadd.xlane.f32.xlu1 %v5099_v18 }
 0x638   : > { %v5096_v38 = vsel %vm5095_vm2, %v7907_v54, 0.0 }
 0x639   : > { %5097 = vadd.xlane.f32.xlu0 %v5096_v38 }
 0x63a   : > { %v4805_v23 = vpop.f32.mrf.mxu2 }
 0x63d   : > { %v4784_v15 = vpop.f32.mrf.mxu1 }
 0x64a   : > { %v4824_v0 = vpop.f32.mrf.mxu3 }
 0x64b   : > { %v7912_v46 = vadd.f32 %v4824_v0, %v7829_v22 }
 0x64c   : > { %v4845_v28 = vpop.f32.mrf.mxu0 }
 0x64d   : > { %v5102_v56 = vsel %vm5095_vm2, %v7912_v46, 0.0  ;;  %v7917_v39 = vadd.f32 %v4845_v28, %v7838_v27 }
 0x64e   : > { %5103 = vadd.xlane.f32.xlu2 %v5102_v56 }
 0x64f   : > { %v5105_v14 = vsel %vm5095_vm2, %v7917_v39, 0.0 }
 0x652   : > { %v4826_v61 = vpop.f32.mrf.mxu3 }
 0x654   : > { %v4847_v25 = vpop.f32.mrf.mxu0 }
 0x656   : > { %5106 = vadd.xlane.f32.xlu2 %v5105_v14 }
 0x65a   : > { %v4908_v40 = vpop.f32.mrf.mxu3 }
 0x65b   : > { %v7922_v42 = vadd.f32 %v4908_v40, %v7854_v17 }
 0x65c   : > { %v4929_v22 = vpop.f32.mrf.mxu0 }
 0x65d   : > { %v5114_v51 = vsel %vm5095_vm2, %v7922_v42, 0.0  ;;  %v7937_v57 = vadd.f32 %v4929_v22, %v7872_v9 }
 0x65e   : > { %5115 = vadd.xlane.f32.xlu2 %v5114_v51 }
 0x662   : > { %v4887_v12 = vpop.f32.mrf.mxu2  ;;  %v4910_v7 = vpop.f32.mrf.mxu3 }
 0x663   : > { %v7927_v27 = vadd.f32 %v4887_v12, %v7851_v43  ;;  %v5117_v43 = vsel %vm5095_vm2, %v7937_v57, 0.0 }
 0x664   : > { %v4866_v49 = vpop.f32.mrf.mxu1  ;;  %v4931_v26 = vpop.f32.mrf.mxu0 }
 0x665   : > { %v7930_v4 = vadd.f32 %v4866_v49, %v7834_v47  ;;  %v5111_v45 = vsel %vm5095_vm2, %v7927_v27, 0.0 }
 0x666   : > { %5112 = vadd.xlane.f32.xlu1 %v5111_v45 }
 0x667   : > { %v5108_v17 = vsel %vm5095_vm2, %v7930_v4, 0.0 }
 0x668   : > { %5109 = vadd.xlane.f32.xlu0 %v5108_v17 }
 0x66a   : > { %v4889_v62 = vpop.f32.mrf.mxu2 }
 0x66c   : > { %v4868_v16 = vpop.f32.mrf.mxu1 }
 0x670   : > { %5118 = vadd.xlane.f32.xlu0 %v5117_v43 }
 0x682   : > { %v4971_v19 = vpop.f32.mrf.mxu2 }
 0x683   : > { %v7942_v47 = vadd.f32 %v4971_v19, %v7858_v29 }
 0x684   : > { %v4950_v53 = vpop.f32.mrf.mxu1 }
 0x685   : > { %v7945_v52 = vadd.f32 %v4950_v53, %v7868_v55  ;;  %v5123_v63 = vsel %vm5095_vm2, %v7942_v47, 0.0 }
 0x686   : > { %5124 = vadd.xlane.f32.xlu2 %v5123_v63 }
 0x687   : > { %v5120_v48 = vsel %vm5095_vm2, %v7945_v52, 0.0 }
 0x688   : > { %5121 = vadd.xlane.f32.xlu1 %v5120_v48 }
 0x68a   : > { %v4973_v58 = vpop.f32.mrf.mxu2  ;;  %v4992_v37 = vpop.f32.mrf.mxu3 }
 0x68b   : > { %v7952_v9 = vadd.f32 %v4992_v37, %v7861_v8 }
 0x68c   : > { %v4952_v44 = vpop.f32.mrf.mxu1  ;;  %v5013_v29 = vpop.f32.mrf.mxu0 }
 0x68d   : > { %v7955_v35 = vadd.f32 %v5013_v29, %v7891_v41  ;;  %v5126_v55 = vsel %vm5095_vm2, %v7952_v9, 0.0 }
 0x68e   : > { %5127 = vadd.xlane.f32.xlu0 %v5126_v55 }
 0x68f   : > { %v5129_v32 = vsel %vm5095_vm2, %v7955_v35, 0.0 }
 0x690   : > { %5130 = vadd.xlane.f32.xlu1 %v5129_v32 }
 0x692   : > { %v5055_v60 = vpop.f32.mrf.mxu2  ;;  %v4994_v3 = vpop.f32.mrf.mxu3 }
 0x693   : > { %v7962_v30 = vadd.f32 %v5055_v60, %v7896_v21 }
 0x694   : > { %v5034_v8 = vpop.f32.mrf.mxu1  ;;  %v5015_v50 = vpop.f32.mrf.mxu0 }
 0x695   : > { %v7965_v11 = vadd.f32 %v5034_v8, %v7887_v34  ;;  %v5135_v5 = vsel %vm5095_vm2, %v7962_v30, 0.0 }
 0x696   : > { %5136 = vadd.xlane.f32.xlu0 %v5135_v5 }
 0x697   : > { %v5132_v59 = vsel %vm5095_vm2, %v7965_v11, 0.0 }
 0x698   : > { %5133 = vadd.xlane.f32.xlu2 %v5132_v59 }
 0x69a   : > { %v5057_v41 = vpop.f32.mrf.mxu2 }
 0x69c   : > { %v5036_v31 = vpop.f32.mrf.mxu1 }
 0x6a9   : > { %v5101_v33 = vpop.xlane.xlu1 %5100 }
 0x6aa   : > { %v5076_v36 = vpop.f32.mrf.mxu3 }
 0x6ab   : > { %v7972_v6 = vadd.f32 %v5076_v36, %v7899_v24 }
 0x6ac   : > { %v5098_v1 = vpop.xlane.xlu0 %5097 }
 0x6ad   : > { %v5138_v21 = vsel %vm5095_vm2, %v7972_v6, 0.0  ;;  %v5141_v20 = vadd.f32 %v5101_v33, %v5098_v1 }
 0x6ae   : > { %5139 = vadd.xlane.f32.xlu1 %v5138_v21 }
 0x6b2   : > { %v5078_v34 = vpop.f32.mrf.mxu3 }
 0x6c1   : > { %v5104_v2 = vpop.xlane.xlu2 %5103 }
 0x6c2   : > { %v5142_v10 = vadd.f32 %v5141_v20, %v5104_v2 }
 0x6c9   : > { %v5107_v18 = vpop.xlane.xlu2 %5106 }
 0x6ca   : > { %v5143_v23 = vadd.f32 %v5142_v10, %v5107_v18 }
 0x6d1   : > { %v5116_v56 = vpop.xlane.xlu2 %5115 }
 0x6d9   : > { %v5113_v0 = vpop.xlane.xlu1 %5112 }
 0x6db   : > { %v5110_v38 = vpop.xlane.xlu0 %5109 }
 0x6dc   : > { %v5144_v15 = vadd.f32 %v5143_v23, %v5110_v38 }
 0x6de   : > { %v5145_v28 = vadd.f32 %v5144_v15, %v5113_v0 }
 0x6e0   : > { %v5146_v24 = vadd.f32 %v5145_v28, %v5116_v56 }
 0x6e3   : > { %v5119_v61 = vpop.xlane.xlu0 %5118 }
 0x6e4   : > { %v5147_v14 = vadd.f32 %v5146_v24, %v5119_v61 }
 0x6f9   : > { %v5125_v22 = vpop.xlane.xlu2 %5124 }
 0x6fb   : > { %v5122_v25 = vpop.xlane.xlu1 %5121 }
 0x6fc   : > { %v5148_v40 = vadd.f32 %v5147_v14, %v5122_v25 }
 0x6fe   : > { %v5149_v12 = vadd.f32 %v5148_v40, %v5125_v22 }
 0x701   : > { %v5128_v51 = vpop.xlane.xlu0 %5127 }
 0x702   : > { %v5150_v7 = vadd.f32 %v5149_v12, %v5128_v51 }
 0x703   : > { %v5131_v49 = vpop.xlane.xlu1 %5130 }
 0x704   : > { %v5151_v45 = vadd.f32 %v5150_v7, %v5131_v49 }
 0x709   : > { %v5137_v62 = vpop.xlane.xlu0 %5136 }
 0x70b   : > { %v5134_v26 = vpop.xlane.xlu2 %5133 }
 0x70c   : > { %v5152_v17 = vadd.f32 %v5151_v45, %v5134_v26 }
 0x70e   : > { %v5153_v16 = vadd.f32 %v5152_v17, %v5137_v62 }
 0x721   : > { %v5140_v43 = vpop.xlane.xlu1 %5139 }
 0x722   : > { %v5154_v19 = vadd.f32 %v5153_v16, %v5140_v43 }
 0x724   : > { %v5155_v53 = vmul.f32 0.0044444446, %v5154_v19 }
 0x726   : > { %v7977_v63 = vsub.f32 %v7912_v46, %v5155_v53  ;;  %v7980_v48 = vsub.f32 %v7902_v13, %v5155_v53  ;;  %v7983_v58 = vsub.f32 %v7907_v54, %v5155_v53  ;;  %v7992_v55 = vsub.f32 %v7927_v27, %v5155_v53 }
 0x727   : > { %v7998_v54 = vsub.f32 %v7930_v4, %v5155_v53  ;;  %v8001_v60 = vsub.f32 %v7917_v39, %v5155_v53  ;;  %v8012_v5 = vsub.f32 %v7945_v52, %v5155_v53  ;;  %v8015_v39 = vsub.f32 %v7937_v57, %v5155_v53 }
 0x728   : > { %v5173_v37 = vmul.f32 %v7977_v63, %v7977_v63  ;;  %v5172_v44 = vmul.f32 %v7980_v48, %v7980_v48  ;;  %v5171_v29 = vmul.f32 %v7983_v58, %v7983_v58  ;;  %v5176_v3 = vmul.f32 %v7992_v55, %v7992_v55 }
 0x729   : > { %v5175_v27 = vmul.f32 %v7998_v54, %v7998_v54  ;;  %v5174_v8 = vmul.f32 %v8001_v60, %v8001_v60  ;;  %v8019_v41 = vsub.f32 %v7922_v42, %v5155_v53  ;;  %v5179_v31 = vmul.f32 %v8012_v5, %v8012_v5 }
 0x72a   : > { %v5192_v46 = vsel %vm5095_vm2, %v5173_v37, 0.0  ;;  %v5189_v13 = vsel %vm5095_vm2, %v5172_v44, 0.0  ;;  %v5186_v32 = vsel %vm5095_vm2, %v5171_v29, 0.0  ;;  %v5201_v50 = vsel %vm5095_vm2, %v5176_v3, 0.0 }
 0x72b   : > { %5193 = vadd.xlane.f32.xlu1 %v5192_v46  ;;  %5190 = vadd.xlane.f32.xlu0 %v5189_v13  ;;  %v5198_v4 = vsel %vm5095_vm2, %v5175_v27, 0.0  ;;  %v5195_v59 = vsel %vm5095_vm2, %v5174_v8, 0.0  ;;  %v5178_v36 = vmul.f32 %v8015_v39, %v8015_v39  ;;  %v5177_v52 = vmul.f32 %v8019_v41, %v8019_v41  ;;  %v5371_v46 = vld [vmem:[%s8138_s2 + $0x8] sm:$0x7f]  ;;  %v5370_v13 = vld [vmem:[%s8138_s2] sm:$0xff] }
 0x72c   : > { %5187 = vadd.xlane.f32.xlu2 %v5186_v32  ;;  %v5210_v57 = vsel %vm5095_vm2, %v5179_v31, 0.0  ;;  %v8030_v34 = vsub.f32 %v7955_v35, %v5155_v53  ;;  %v8033_v42 = vsub.f32 %v7952_v9, %v5155_v53  ;;  %v8037_v1 = vsub.f32 %v7942_v47, %v5155_v53  ;;  %5887 = vmatpush.msk.msra.mxu0 %vm5375_vm3, %v5371_v46 }
 0x72d   : > { %v5207_v21 = vsel %vm5095_vm2, %v5178_v36, 0.0  ;;  %v5204_v2 = vsel %vm5095_vm2, %v5177_v52, 0.0  ;;  %v8048_v10 = vsub.f32 %v7972_v6, %v5155_v53  ;;  %v8051_v47 = vsub.f32 %v7962_v30, %v5155_v53  ;;  %5889 = vmatpush.msk.msra.mxu1 %vm5375_vm3, %v5371_v46  ;;  %5891 = vmatpush.msk.msra.mxu2 %vm5375_vm3, %v5371_v46 }
 0x72e   : > { %v5182_v33 = vmul.f32 %v8030_v34, %v8030_v34  ;;  %v5181_v20 = vmul.f32 %v8033_v42, %v8033_v42  ;;  %v5180_v35 = vmul.f32 %v8037_v1, %v8037_v1  ;;  %v8055_v23 = vsub.f32 %v7965_v11, %v5155_v53  ;;  %5893 = vmatpush.msk.msra.mxu3 %vm5375_vm3, %v5371_v46 }
 0x72f   : > { %v5185_v15 = vmul.f32 %v8048_v10, %v8048_v10  ;;  %v5184_v0 = vmul.f32 %v8051_v47, %v8051_v47  ;;  %5394 = vmatpush.msra.mxu0 %v5370_v13  ;;  %5417 = vmatpush.msra.mxu1 %v5370_v13 }
 0x730   : > { %v5219_v9 = vsel %vm5095_vm2, %v5182_v33, 0.0  ;;  %v5216_v18 = vsel %vm5095_vm2, %v5181_v20, 0.0  ;;  %v5213_v38 = vsel %vm5095_vm2, %v5180_v35, 0.0  ;;  %v5183_v6 = vmul.f32 %v8055_v23, %v8055_v23  ;;  %5440 = vmatpush.msra.mxu2 %v5370_v13  ;;  %5463 = vmatpush.msra.mxu3 %v5370_v13 }
 0x731   : > { %v5228_v30 = vsel %vm5095_vm2, %v5185_v15, 0.0  ;;  %v5225_v28 = vsel %vm5095_vm2, %v5184_v0, 0.0  ;;  %5895 = vmatpush.msk.msrb.mxu0 %vm5375_vm3, %v5371_v46  ;;  %5897 = vmatpush.msk.msrb.mxu1 %vm5375_vm3, %v5371_v46 }
 0x732   : > { %v5222_v56 = vsel %vm5095_vm2, %v5183_v6, 0.0  ;;  %5899 = vmatpush.msk.msrb.mxu2 %vm5375_vm3, %v5371_v46  ;;  %5901 = vmatpush.msk.msrb.mxu3 %vm5375_vm3, %v5371_v46 }
 0x733   : > { %5202 = vadd.xlane.f32.xlu1 %v5201_v50  ;;  %5199 = vadd.xlane.f32.xlu0 %v5198_v4 }
 0x734   : > { %5196 = vadd.xlane.f32.xlu2 %v5195_v59  ;;  %5486 = vmatpush.msrb.mxu0 %v5370_v13 }
 0x735   : > { %5509 = vmatpush.msrb.mxu1 %v5370_v13  ;;  %5532 = vmatpush.msrb.mxu2 %v5370_v13 }
 0x736   : > { %5555 = vmatpush.msrb.mxu3 %v5370_v13 }
 0x73b   : > { %5211 = vadd.xlane.f32.xlu1 %v5210_v57  ;;  %5208 = vadd.xlane.f32.xlu0 %v5207_v21 }
 0x73c   : > { %5205 = vadd.xlane.f32.xlu2 %v5204_v2 }
 0x743   : > { %5220 = vadd.xlane.f32.xlu1 %v5219_v9  ;;  %5217 = vadd.xlane.f32.xlu0 %v5216_v18 }
 0x744   : > { %5214 = vadd.xlane.f32.xlu2 %v5213_v38 }
 0x74b   : > { %5229 = vadd.xlane.f32.xlu1 %v5228_v30  ;;  %5226 = vadd.xlane.f32.xlu0 %v5225_v28 }
 0x74c   : > { %5223 = vadd.xlane.f32.xlu2 %v5222_v56 }
 0x79e   : > { %v5194_v11 = vpop.xlane.xlu1 %5193  ;;  %v5191_v61 = vpop.xlane.xlu0 %5190 }
 0x79f   : > { %v5188_v24 = vpop.xlane.xlu2 %5187 }
 0x7a0   : > { %v5231_v25 = vadd.f32 %v5191_v61, %v5188_v24 }
 0x7a2   : > { %v5232_v22 = vadd.f32 %v5231_v25, %v5194_v11 }
 0x7a6   : > { %v5203_v14 = vpop.xlane.xlu1 %5202  ;;  %v5200_v40 = vpop.xlane.xlu0 %5199 }
 0x7a7   : > { %v5197_v51 = vpop.xlane.xlu2 %5196 }
 0x7a8   : > { %v5233_v12 = vadd.f32 %v5232_v22, %v5197_v51 }
 0x7aa   : > { %v5234_v7 = vadd.f32 %v5233_v12, %v5200_v40 }
 0x7ac   : > { %v5235_v26 = vadd.f32 %v5234_v7, %v5203_v14 }
 0x7ae   : > { %v5209_v49 = vpop.xlane.xlu0 %5208  ;;  %v5212_v45 = vpop.xlane.xlu1 %5211 }
 0x7af   : > { %v5206_v17 = vpop.xlane.xlu2 %5205 }
 0x7b0   : > { %v5236_v62 = vadd.f32 %v5235_v26, %v5206_v17 }
 0x7b2   : > { %v5237_v16 = vadd.f32 %v5236_v62, %v5209_v49 }
 0x7b4   : > { %v5238_v43 = vadd.f32 %v5237_v16, %v5212_v45 }
 0x7b6   : > { %v5218_v19 = vpop.xlane.xlu0 %5217  ;;  %v5221_v44 = vpop.xlane.xlu1 %5220 }
 0x7b7   : > { %v5215_v53 = vpop.xlane.xlu2 %5214 }
 0x7b8   : > { %v5239_v37 = vadd.f32 %v5238_v43, %v5215_v53 }
 0x7ba   : > { %v5240_v29 = vadd.f32 %v5239_v37, %v5218_v19 }
 0x7bc   : > { %v5241_v32 = vadd.f32 %v5240_v29, %v5221_v44 }
 0x7be   : > { %v5227_v8 = vpop.xlane.xlu0 %5226  ;;  %v5230_v4 = vpop.xlane.xlu1 %5229 }
 0x7bf   : > { %v5224_v3 = vpop.xlane.xlu2 %5223 }
 0x7c0   : > { %v5242_v27 = vadd.f32 %v5241_v32, %v5224_v3 }
 0x7c2   : > { %v5243_v50 = vadd.f32 %v5242_v27, %v5227_v8 }
 0x7c4   : > { %v5244_v59 = vadd.f32 %v5243_v50, %v5230_v4 }
 0x7c6   : > { %v5245_v31 = vmul.f32 0.0044444446, %v5244_v59 }
 0x7c8   : > { %v5246_v36 = vadd.f32 1e-05, %v5245_v31 }
 0x7ca   : > { %5918 = vrsqrt.f32 %v5246_v36  ;;  %vm5253_vm5 = vweird.f32 %v5246_v36 }
 0x7d0   : > { %v5919_v52 = vpop.eup %5918 }
 0x7d1   : > { %v5248_v57 = vmul.f32 %v5919_v52, %v5246_v36  ;;  %vm5254_vm4 = vweird.f32 %v5919_v52 }
 0x7d2   : > { %vm5255_vm6 = vmor %vm5253_vm5, %vm5254_vm4 }
 0x7d3   : > { %v5249_v21 = vmul.f32 %v5919_v52, %v5248_v57 }
 0x7d5   : > { %v5250_v2 = vmul.f32 0.5, %v5249_v21 }
 0x7d7   : > { %v5251_v33 = vsub.f32 1.5, %v5250_v2 }
 0x7d9   : > { %v5252_v20 = vmul.f32 %v5919_v52, %v5251_v33 }
 0x7db   : > { %v8080_v35 = vsel %vm5255_vm6, %v5919_v52, %v5252_v20 }
 0x7dc   : > { %v5257_v9 = vmul.f32 %v8080_v35, %v7983_v58  ;;  %v5258_v18 = vmul.f32 %v8080_v35, %v7980_v48  ;;  %v5259_v38 = vmul.f32 %v8080_v35, %v7977_v63  ;;  %v5260_v15 = vmul.f32 %v8080_v35, %v8001_v60 }
 0x7dd   : > { %v5261_v0 = vmul.f32 %v8080_v35, %v7998_v54  ;;  %v5262_v6 = vmul.f32 %v8080_v35, %v7992_v55  ;;  %v5263_v30 = vmul.f32 %v8080_v35, %v8019_v41  ;;  %v5264_v58 = vmul.f32 %v8080_v35, %v8015_v39 }
 0x7de   : > { %vm5272_vm7 = vcmp.ge.f32.partialorder %v5257_v9, 0.0  ;;  %vm5273_vm8 = vcmp.ge.f32.partialorder %v5258_v18, 0.0  ;;  %vm5274_vm9 = vcmp.ge.f32.partialorder %v5259_v38, 0.0  ;;  %v5287_v48 = vmul.f32 0.2, %v5257_v9 }
 0x7df   : > { %v5288_v63 = vmul.f32 0.2, %v5258_v18  ;;  %v5289_v28 = vmul.f32 0.2, %v5259_v38  ;;  %vm5275_vm10 = vcmp.ge.f32.partialorder %v5260_v15, 0.0  ;;  %vm5276_vm11 = vcmp.ge.f32.partialorder %v5261_v0, 0.0 }
 0x7e0   : > { %v5302_v60 = vsel %vm5272_vm7, %v5257_v9, %v5287_v48  ;;  %v5290_v56 = vmul.f32 0.2, %v5260_v15  ;;  %v5291_v54 = vmul.f32 0.2, %v5261_v0  ;;  %vm5277_vm12 = vcmp.ge.f32.partialorder %v5262_v6, 0.0 }
 0x7e1   : > { %v5303_v11 = vsel %vm5273_vm8, %v5258_v18, %v5288_v63  ;;  %v5304_v55 = vsel %vm5274_vm9, %v5259_v38, %v5289_v28  ;;  %v5324_v61 = vmul.f32 0.375, %v5302_v60  ;;  %vm5278_vm13 = vcmp.ge.f32.partialorder %v5263_v30, 0.0 }
 0x7e2   : > { %v5317_v41 = vmul.f32 0.125, %v5303_v11  ;;  %v5325_v24 = vmul.f32 0.375, %v5304_v55  ;;  %v5340_v25 = vmul.f32 0.375, %v5303_v11  ;;  %v5355_v39 = vmul.f32 0.125, %v5304_v55 }
 0x7e3   : > { %v5305_v14 = vsel %vm5275_vm10, %v5260_v15, %v5290_v56  ;;  %v5306_v40 = vsel %vm5276_vm11, %v5261_v0, %v5291_v54  ;;  %v5292_v22 = vmul.f32 0.2, %v5262_v6  ;;  %v5293_v51 = vmul.f32 0.2, %v5263_v30 }
 0x7e4   : > { %v5332_v12 = vadd.f32 %v5324_v61, %v5317_v41  ;;  %v5326_v7 = vmul.f32 0.375, %v5306_v40  ;;  %v5333_v49 = vadd.f32 %v5325_v24, %v5317_v41  ;;  %v5341_v26 = vmul.f32 0.375, %v5305_v14 }
 0x7e5   : > { %v5356_v45 = vmul.f32 0.125, %v5306_v40  ;;  %v5307_v17 = vsel %vm5277_vm12, %v5262_v6, %v5292_v22  ;;  %v5308_v62 = vsel %vm5278_vm13, %v5263_v30, %v5293_v51  ;;  %v5318_v16 = vmul.f32 0.125, %v5305_v14 }
 0x7e6   : > { %v5347_v43 = vadd.f32 %v5340_v25, %v5332_v12  ;;  %v5348_v19 = vadd.f32 %v5341_v26, %v5333_v49  ;;  %v5327_v53 = vmul.f32 0.375, %v5308_v62  ;;  %v5342_v37 = vmul.f32 0.375, %v5307_v17 }
 0x7e7   : > { %v5334_v44 = vadd.f32 %v5326_v7, %v5318_v16  ;;  %v5357_v29 = vmul.f32 0.125, %v5308_v62  ;;  %v5265_v46 = vmul.f32 %v8080_v35, %v8012_v5  ;;  %vm5279_vm14 = vcmp.ge.f32.partialorder %v5264_v58, 0.0 }
 0x7e8   : > { %v5362_v13 = vadd.f32 %v5355_v39, %v5347_v43  ;;  %v5363_v32 = vadd.f32 %v5356_v45, %v5348_v19  ;;  %v5294_v3 = vmul.f32 0.2, %v5264_v58  ;;  %v5319_v27 = vmul.f32 0.125, %v5307_v17 }
 0x7e9   : > { %v5349_v8 = vadd.f32 %v5342_v37, %v5334_v44  ;;  %vm5280_vm15 = vcmp.ge.f32.partialorder %v5265_v46, 0.0  ;;  %v5295_v50 = vmul.f32 0.2, %v5265_v46  ;;  %v5266_v4 = vmul.f32 %v8080_v35, %v8037_v1 }
 0x7ea   : > { %5888 = vmatmul.msk.f32.vlgmr.msra.gmra.mxu0 %vm5095_vm2, %v5362_v13  ;;  %5890 = vmatmul.msk.f32.vlgmr.msra.gmra.mxu1 %vm5095_vm2, %v5363_v32  ;;  %v5309_v59 = vsel %vm5279_vm14, %v5264_v58, %v5294_v3  ;;  %v5335_v31 = vadd.f32 %v5327_v53, %v5319_v27  ;;  %v5267_v5 = vmul.f32 %v8080_v35, %v8033_v42  ;;  %vm5560_vm7 = vcmask 64512  }
 0x7eb   : > { %v5364_v36 = vadd.f32 %v5357_v29, %v5349_v8  ;;  %v5310_v52 = vsel %vm5280_vm15, %v5265_v46, %v5295_v50  ;;  %v5343_v57 = vmul.f32 0.375, %v5309_v59  ;;  %vm5281_vm0 = vcmp.ge.f32.partialorder %v5266_v4, 0.0 }
 0x7ec   : > { %v5328_v21 = vmul.f32 0.375, %v5310_v52  ;;  %v5358_v2 = vmul.f32 0.125, %v5310_v52  ;;  %vm5282_vm1 = vcmp.ge.f32.partialorder %v5267_v5, 0.0  ;;  %v5296_v33 = vmul.f32 0.2, %v5266_v4 }
 0x7ed   : > { %5892 = vmatmul.msk.f32.vlgmr.msra.gmra.mxu2 %vm5095_vm2, %v5364_v36  ;;  %v5350_v1 = vadd.f32 %v5343_v57, %v5335_v31  ;;  %v5297_v20 = vmul.f32 0.2, %v5267_v5  ;;  %v5320_v9 = vmul.f32 0.125, %v5309_v59  ;;  %v5268_v18 = vmul.f32 %v8080_v35, %v8030_v34 }
 0x7ee   : > { %v5311_v38 = vsel %vm5281_vm0, %v5266_v4, %v5296_v33  ;;  %v5269_v42 = vmul.f32 %v8080_v35, %v8055_v23  ;;  %v5270_v15 = vmul.f32 %v8080_v35, %v8051_v47  ;;  %v5271_v0 = vmul.f32 %v8080_v35, %v8048_v10 }
 0x7ef   : > { %v5365_v6 = vadd.f32 %v5358_v2, %v5350_v1  ;;  %v5312_v30 = vsel %vm5282_vm1, %v5267_v5, %v5297_v20  ;;  %v5336_v58 = vadd.f32 %v5328_v21, %v5320_v9  ;;  %v5344_v48 = vmul.f32 0.375, %v5311_v38 }
 0x7f0   : > { %v5329_v63 = vmul.f32 0.375, %v5312_v30  ;;  %v5359_v28 = vmul.f32 0.125, %v5312_v30  ;;  %vm5283_vm3 = vcmp.ge.f32.partialorder %v5268_v18, 0.0  ;;  %vm5284_vm4 = vcmp.ge.f32.partialorder %v5269_v42, 0.0 }
 0x7f1   : > { %5894 = vmatmul.msk.f32.vlgmr.msra.gmra.mxu3 %vm5095_vm2, %v5365_v6  ;;  %v5351_v34 = vadd.f32 %v5344_v48, %v5336_v58  ;;  %v5298_v60 = vmul.f32 0.2, %v5268_v18  ;;  %v5299_v56 = vmul.f32 0.2, %v5269_v42  ;;  %v5321_v23 = vmul.f32 0.125, %v5311_v38 }
 0x7f2   : > { %vm5285_vm5 = vcmp.ge.f32.partialorder %v5270_v15, 0.0  ;;  %vm5286_vm6 = vcmp.ge.f32.partialorder %v5271_v0, 0.0  ;;  %v5300_v47 = vmul.f32 0.2, %v5270_v15  ;;  %v5301_v54 = vmul.f32 0.2, %v5271_v0 }
 0x7f3   : > { %v5366_v11 = vadd.f32 %v5359_v28, %v5351_v34  ;;  %v5313_v10 = vsel %vm5283_vm3, %v5268_v18, %v5298_v60  ;;  %v5314_v35 = vsel %vm5284_vm4, %v5269_v42, %v5299_v56  ;;  %v5337_v55 = vadd.f32 %v5329_v63, %v5321_v23 }
 0x7f4   : > { %v5330_v61 = vmul.f32 0.375, %v5314_v35  ;;  %v5345_v41 = vmul.f32 0.375, %v5313_v10  ;;  %v5315_v24 = vsel %vm5285_vm5, %v5270_v15, %v5300_v47  ;;  %v5316_v25 = vsel %vm5286_vm6, %v5271_v0, %v5301_v54 }
 0x7f5   : > { %5896 = vmatmul.msk.f32.vlgmr.msrb.gmra.mxu0 %vm5095_vm2, %v5366_v11  ;;  %v5322_v39 = vmul.f32 0.125, %v5313_v10  ;;  %v5323_v14 = vmul.f32 0.125, %v5315_v24  ;;  %v5360_v22 = vmul.f32 0.125, %v5314_v35  ;;  %v5331_v51 = vmul.f32 0.375, %v5316_v25 }
 0x7f6   : > { %v5352_v40 = vadd.f32 %v5345_v41, %v5337_v55  ;;  %v5346_v7 = vmul.f32 0.375, %v5315_v24  ;;  %v5361_v17 = vmul.f32 0.125, %v5316_v25 }
 0x7f7   : > { %v5338_v12 = vadd.f32 %v5330_v61, %v5322_v39  ;;  %v5339_v26 = vadd.f32 %v5331_v51, %v5323_v14 }
 0x7f8   : > { %v5367_v49 = vadd.f32 %v5360_v22, %v5352_v40 }
 0x7f9   : > { %v5353_v45 = vadd.f32 %v5346_v7, %v5338_v12  ;;  %v5354_v62 = vadd.f32 %v5346_v7, %v5339_v26 }
 0x7fa   : > { %5898 = vmatmul.msk.f32.vlgmr.msrb.gmra.mxu1 %vm5095_vm2, %v5367_v49 }
 0x7fb   : > { %v5368_v16 = vadd.f32 %v5361_v17, %v5353_v45  ;;  %v5369_v43 = vadd.f32 %v5360_v22, %v5354_v62 }
 0x7fd   : > { %5900 = vmatmul.msk.f32.vlgmr.msrb.gmra.mxu2 %vm5095_vm2, %v5368_v16  ;;  %5902 = vmatmul.msk.f32.vlgmr.msrb.gmra.mxu3 %vm5095_vm2, %v5369_v43 }
 0x867   : > { %v5396_v19 = vpop.f32.mrf.mxu0  ;;  %v5419_v53 = vpop.f32.mrf.mxu1 }
 0x868   : > { %5561 = vst.msk [vmem:[%s170_s8] sm:$0xff] %vm5560_vm7, %v5396_v19 }
 0x869   : > { %5562 = vst.msk [vmem:[%s170_s8 + $0x8] sm:$0xff] %vm5560_vm7, %v5419_v53 }
 0x870   : > { %v5442_v37 = vpop.f32.mrf.mxu2 }
 0x871   : > { %5563 = vst.msk [vmem:[%s170_s8 + $0x10] sm:$0xff] %vm5560_vm7, %v5442_v37 }
 0x872   : > { %v5488_v44 = vpop.f32.mrf.mxu0 }
 0x873   : > { %5565 = vst.msk [vmem:[%s170_s8 + $0x20] sm:$0xff] %vm5560_vm7, %v5488_v44 }
 0x874   : > { %v5465_v29 = vpop.f32.mrf.mxu3 }
 0x875   : > { %5564 = vst.msk [vmem:[%s170_s8 + $0x18] sm:$0xff] %vm5560_vm7, %v5465_v29 }
 0x877   : > { %v5511_v46 = vpop.f32.mrf.mxu1 }
 0x878   : > { %5566 = vst.msk [vmem:[%s170_s8 + $0x28] sm:$0xff] %vm5560_vm7, %v5511_v46 }
 0x880   : > { %v5534_v13 = vpop.f32.mrf.mxu2  ;;  %v5557_v32 = vpop.f32.mrf.mxu3 }
 0x881   : > { %5567 = vst.msk [vmem:[%s170_s8 + $0x30] sm:$0xff] %vm5560_vm7, %v5534_v13 }
 0x882   : > { %5568 = vst.msk [vmem:[%s170_s8 + $0x38] sm:$0xff] %vm5560_vm7, %v5557_v32 }
 0x883 PF: > { %s13_s12 = sadd.s32 1, %s5926_s12  }
 0x884   : > { %p10_p4 = scmp.ge.s32.totalorder %s13_s12, 4  }
 0x886   :  { %12 = sbr.rel (!%p10_p4) target bundleno = 1 (0x1), region = 77 }

</bundles_post_ra>
